<compile_context>
chip_gen: v6e
topology: v6e:2x2x1
jax: 0.10.0
libtpu: 0.0.40
codegen_flags: <defaults>
</compile_context>

<pallas_src>
import functools

import jax
import jax.numpy as jnp
from jax.experimental import pallas as pl
from jax.experimental.pallas import tpu as pltpu

LANES = 128          # vreg lane width: Cout is padded up to this for lane-dense stores
MAX_TILE_M = 256     # rows per MXU tile (matches v6e/v7x 256-wide MXU; fine on v5e too)
_BN_EPS = 1e-5


def _round_up(x, m):
    return ((x + m - 1) // m) * m


# ------------------------------ Pallas kernel ------------------------------
def _fused_matmul_kernel(p_ref, w_ref, t_ref, o_ref, *, act):
    # (TM, K) @ (K, Cpad) on the MXU (bf16 in, f32 accumulate), then the fused
    # per-channel shift (conv bias + folded eval-BatchNorm offset) and activation.
    y = jnp.dot(p_ref[...], w_ref[...], preferred_element_type=jnp.float32)
    y = y + t_ref[...]
    if act == "leaky_relu":
        y = jnp.where(y > 0, y, 0.2 * y)
    elif act == "relu":
        y = jnp.maximum(y, 0.0)
    elif act == "tanh":
        y = jnp.tanh(y)
    o_ref[...] = y.astype(o_ref.dtype)


def fused_conv_matmul(patches, w2d, shift, act, out_dtype):
    """patches (M,K) @ w2d (K,Cout) + shift[None,:], then activation.

    The BatchNorm scale is already folded into w2d by the caller.  M is padded to a
    multiple of the tile size and Cout to a multiple of 128 lanes (padded columns
    are all-zero weight + zero shift, so every supported activation maps them to 0);
    padding is sliced off before returning.
    """
    M, K = patches.shape
    Cout = w2d.shape[1]
    Cout_pad = _round_up(Cout, LANES)
    # Keep the M tile a multiple of 16 (bf16 sublane packing); cap at MAX_TILE_M so
    # the biggest layers still get >=2 parallel grid steps.
    tile_m = MAX_TILE_M if M >= MAX_TILE_M else _round_up(M, 16)
    M_pad = _round_up(M, tile_m)

    patches = patches.astype(jnp.bfloat16)
    if M_pad != M:
        patches = jnp.pad(patches, ((0, M_pad - M), (0, 0)))
    if Cout_pad != Cout:
        w2d = jnp.pad(w2d, ((0, 0), (0, Cout_pad - Cout)))
        shift = jnp.pad(shift, ((0, Cout_pad - Cout),))
    w_bf = w2d.astype(jnp.bfloat16)
    shift2 = shift.reshape(1, Cout_pad).astype(jnp.float32)

    kernel = functools.partial(_fused_matmul_kernel, act=act)
    out = pl.pallas_call(
        kernel,
        out_shape=jax.ShapeDtypeStruct((M_pad, Cout_pad), out_dtype),
        grid_spec=pltpu.PrefetchScalarGridSpec(
            num_scalar_prefetch=0,
            grid=(M_pad // tile_m,),
            in_specs=[
                pl.BlockSpec((tile_m, K), lambda i: (i, 0)),
                pl.BlockSpec((K, Cout_pad), lambda i: (0, 0)),
                pl.BlockSpec((1, Cout_pad), lambda i: (0, 0)),
            ],
            out_specs=pl.BlockSpec((tile_m, Cout_pad), lambda i: (i, 0)),
        ),
        compiler_params=pltpu.CompilerParams(dimension_semantics=("parallel",)),
    )(patches, w_bf, shift2)
    return out[:M, :Cout]


# ------------------------------- conv glue ---------------------------------
def _im2col(x_nhwc, k, stride):
    # NOTE: patch extraction is still materialized by XLA in HBM; fusing it into the
    # Pallas kernel (k*k shifted dots on a VMEM-resident tile) would cut input HBM
    # traffic by ~k^2 but is left out here to keep the kernel simple and robust.
    N, H, W, C = x_nhwc.shape
    Ho = (H - k) // stride + 1
    Wo = (W - k) // stride + 1
    cols = []
    for di in range(k):
        for dj in range(k):
            cols.append(x_nhwc[:, di:di + stride * Ho:stride, dj:dj + stride * Wo:stride, :])
    p = jnp.concatenate(cols, axis=-1)               # (N, Ho, Wo, k*k*C), (di,dj,C) order
    return p.reshape(N * Ho * Wo, k * k * C), (N, Ho, Wo)


def conv2d(x_nhwc, weight_oihw, *, stride=1, pad=0, pad_mode="zero",
           bias=None, bn=None, act="linear", out_dtype=jnp.bfloat16):
    """Conv2d(+bias)(+BatchNorm2d eval)(+activation); compute runs in the Pallas kernel."""
    Cout, Cin, kh, kw = weight_oihw.shape
    if pad > 0:
        mode = "reflect" if pad_mode == "reflect" else "constant"
        x_nhwc = jnp.pad(x_nhwc, ((0, 0), (pad, pad), (pad, pad), (0, 0)), mode=mode)
    patches, (N, Ho, Wo) = _im2col(x_nhwc, kh, stride)
    w2d = jnp.transpose(weight_oihw, (2, 3, 1, 0)).reshape(kh * kw * Cin, Cout)
    w2d = w2d.astype(jnp.float32)
    scale = jnp.ones((Cout,), jnp.float32)
    shift = jnp.zeros((Cout,), jnp.float32)
    if bias is not None:
        shift = shift + bias
    if bn is not None:
        gamma, beta, rm, rv = bn
        s = gamma / jnp.sqrt(rv + _BN_EPS)
        scale = scale * s
        shift = shift * s + (beta - rm * s)
    w2d = w2d * scale[None, :]          # fold BN scale into the weight (MXU does it for free)
    out = fused_conv_matmul(patches, w2d, shift, act, out_dtype)
    return out.reshape(N, Ho, Wo, Cout)


def conv_transpose2d(x_nhwc, weight_iohw, *, bias=None, bn=None, act="linear",
                     out_dtype=jnp.bfloat16):
    """ConvTranspose2d(k=4, s=2, p=1) via sub-pixel decomposition.

    One stride-1, zero-pad-1, 3x3 conv on the *un-dilated* input producing 4*Cout
    channels (one block per output parity (r, c)), then a pixel shuffle.  Each parity
    block holds the flipped 2x2 sub-kernel w_conv[:, :, r::2, c::2] placed at window
    offset (r, c).  Mathematically identical to zero-dilate + pad(k-1-p) + conv, but
    without the 4x zero FLOPs and the dilated intermediate.
    """
    Cin, Cout, kh, kw = weight_iohw.shape
    assert (kh, kw) == (4, 4), "sub-pixel path assumes kernel_size=4, stride=2, pad=1"
    w_conv = jnp.transpose(jnp.flip(weight_iohw, axis=(2, 3)), (1, 0, 2, 3))  # (Cout,Cin,4,4)
    blocks = []
    for r in (0, 1):
        for c in (0, 1):
            sub = w_conv[:, :, r::2, c::2]                        # (Cout, Cin, 2, 2)
            blk = jnp.zeros((Cout, Cin, 3, 3), w_conv.dtype)
            blk = blk.at[:, :, r:r + 2, c:c + 2].set(sub)
            blocks.append(blk)
    w_comb = jnp.concatenate(blocks, axis=0)                      # (4*Cout, Cin, 3, 3)
    bias_c = None if bias is None else jnp.tile(bias, 4)
    bn_c = None if bn is None else tuple(jnp.tile(p, 4) for p in bn)
    y = conv2d(x_nhwc, w_comb, stride=1, pad=1, pad_mode="zero",
               bias=bias_c, bn=bn_c, act=act, out_dtype=out_dtype)  # (N, H, W, 4*Cout)
    N, H, W, _ = y.shape
    y = y.reshape(N, H, W, 2, 2, Cout)                            # (..., r, c, o)
    y = jnp.transpose(y, (0, 1, 3, 2, 4, 5)).reshape(N, 2 * H, 2 * W, Cout)
    return y


# ------------------------- deterministic parameters -------------------------
class ParamGen:
    def __init__(self, key):
        self.key = key

    def _next(self):
        self.key, sub = jax.random.split(self.key)
        return sub

    def conv(self, cout, cin, k, bias):
        w = 0.2 * jax.random.normal(self._next(), (cout, cin, k, k), jnp.float32)
        b = 0.1 * jax.random.normal(self._next(), (cout,), jnp.float32) if bias else None
        return {"w": w, "b": b}

    def convT(self, cin, cout, k, bias):
        w = 0.2 * jax.random.normal(self._next(), (cin, cout, k, k), jnp.float32)
        b = 0.1 * jax.random.normal(self._next(), (cout,), jnp.float32) if bias else None
        return {"w": w, "b": b}

    def bn(self, c):
        gamma = 1.0 + 0.1 * jax.random.normal(self._next(), (c,), jnp.float32)
        beta = 0.1 * jax.random.normal(self._next(), (c,), jnp.float32)
        rm = 0.1 * jax.random.normal(self._next(), (c,), jnp.float32)
        rv = 1.0 + 0.1 * jax.random.uniform(self._next(), (c,), jnp.float32)
        return (gamma, beta, rm, rv)


def num_divisible_by_2(n):
    i = 0
    while n % 2 == 0:
        n //= 2
        i += 1
    return i


# ------------------------------ block builders ------------------------------
def build_down_block(pg, cin, cout, use_norm):
    bias = not use_norm
    return {
        "conv1": pg.conv(cin, cin, 3, bias), "bn1": pg.bn(cin) if use_norm else None,
        "conv2": pg.conv(cout, cin, 4, bias), "bn2": pg.bn(cout) if use_norm else None,
    }


def apply_down_block(blk, x):
    # TODO(synk): Dropout2d treated as identity (inference mode).
    x = conv2d(x, blk["conv1"]["w"], stride=1, pad=1, pad_mode="reflect",
               bias=blk["conv1"]["b"], bn=blk["bn1"], act="leaky_relu")
    x = conv2d(x, blk["conv2"]["w"], stride=2, pad=1, pad_mode="reflect",
               bias=blk["conv2"]["b"], bn=blk["bn2"], act="leaky_relu")
    return x


def build_up_block(pg, cin, cout, use_norm):
    bias = not use_norm
    return {
        "convT": pg.convT(cin, cout, 4, bias), "bn1": pg.bn(cout) if use_norm else None,
        "conv": pg.conv(cout, cout, 3, bias), "bn2": pg.bn(cout) if use_norm else None,
    }


def apply_up_block(blk, x):
    x = conv_transpose2d(x, blk["convT"]["w"], bias=blk["convT"]["b"],
                         bn=blk["bn1"], act="relu")
    x = conv2d(x, blk["conv"]["w"], stride=1, pad=1, pad_mode="reflect",
               bias=blk["conv"]["b"], bn=blk["bn2"], act="relu")
    return x


def build_unet_skip(pg, nf0, num_down, max_ch):
    levels = []
    for i in range(num_down):
        innermost = (i == num_down - 1)
        if innermost:
            outer = inner = min(2 ** (num_down - 1) * nf0, max_ch)
            use_norm = False          # innermost block has norm=None (spatial dim 1)
        else:
            outer = min(2 ** i * nf0, max_ch)
            inner = min(2 ** (i + 1) * nf0, max_ch)
            use_norm = True
        up_in = inner if innermost else 2 * inner
        levels.append({"down": build_down_block(pg, outer, inner, use_norm),
                       "up": build_up_block(pg, up_in, outer, use_norm)})
    return levels


def apply_unet_skip(levels, x, i=0):
    down = apply_down_block(levels[i]["down"], x)
    mid = down if i == len(levels) - 1 else apply_unet_skip(levels, down, i + 1)
    up = apply_up_block(levels[i]["up"], mid)
    return jnp.concatenate([x, up], axis=-1)   # torch.cat([x, fwd], dim=1) (channels)


def build_unet(pg, in_channels, out_channels, nf0, num_down, max_ch, outermost_linear):
    return {
        "in_conv": pg.conv(nf0, in_channels, 3, bias=False),   # norm=BN -> no bias
        "in_bn": pg.bn(nf0),
        "skip": build_unet_skip(pg, nf0, num_down, max_ch),
        "out_conv": pg.conv(out_channels, 2 * nf0, 3, bias=outermost_linear),
        "out_bn": None if outermost_linear else pg.bn(out_channels),
        "outermost_linear": outermost_linear,
    }


def apply_unet(p, x, final_act=None):
    x = conv2d(x, p["in_conv"]["w"], stride=1, pad=1, pad_mode="reflect",
               bias=p["in_conv"]["b"], bn=p["in_bn"], act="leaky_relu")
    x = apply_unet_skip(p["skip"], x)
    if p["outermost_linear"]:
        act = final_act if final_act is not None else "linear"
        od = jnp.float32          # network output: keep f32
    else:
        act = "relu"
        od = jnp.bfloat16
    return conv2d(x, p["out_conv"]["w"], stride=1, pad=1, pad_mode="reflect",
                  bias=p["out_conv"]["b"], bn=p["out_bn"], act=act, out_dtype=od)


def build_upsampling_net(pg, per_layer_out_ch, in_channels):
    blocks, prev = [], in_channels
    for c in per_layer_out_ch:
        blocks.append(build_up_block(pg, prev, c, use_norm=True))
        prev = c
    return blocks


# ------------------------------- RenderingNet -------------------------------
def build_rendering_net(key, nf0, in_channels, input_resolution, img_sidelength):
    pg = ParamGen(key)
    num_down = num_divisible_by_2(input_resolution)
    num_up = num_divisible_by_2(img_sidelength) - num_down
    unet_out = 3 if num_up <= 0 else 4 * nf0
    p = {
        "num_up": num_up,
        "unet": build_unet(pg, in_channels, unet_out,
                           nf0=int(nf0 * 2 ** max(num_up, 0)),
                           num_down=num_down, max_ch=8 * nf0,
                           outermost_linear=(num_up <= 0)),
    }
    if num_up > 0:
        p["ups"] = build_upsampling_net(pg, num_up * [nf0], 4 * nf0)
        p["conv_a"] = pg.conv(nf0 // 2, nf0, 3, bias=False)
        p["bn_a"] = pg.bn(nf0 // 2)
        p["conv_b"] = pg.conv(3, nf0 // 2, 3, bias=True)
    return p


def rendering_net_forward(p, x_nchw):
    x = jnp.transpose(x_nchw, (0, 2, 3, 1))          # NCHW -> NHWC
    if p["num_up"] > 0:
        x = apply_unet(p["unet"], x)
        for blk in p["ups"]:
            x = apply_up_block(blk, x)
        x = conv2d(x, p["conv_a"]["w"], stride=1, pad=1, pad_mode="reflect",
                   bias=None, bn=p["bn_a"], act="relu")
        x = conv2d(x, p["conv_b"]["w"], stride=1, pad=1, pad_mode="reflect",
                   bias=p["conv_b"]["b"], bn=None, act="tanh",
                   out_dtype=jnp.float32)             # fused nn.Tanh, f32 output
    else:
        x = apply_unet(p["unet"], x, final_act="tanh")  # fused nn.Tanh
    return jnp.transpose(x, (0, 3, 1, 2)).astype(jnp.float32)   # NHWC -> NCHW


if __name__ == "__main__":
    key = jax.random.PRNGKey(0)
    pkey, xkey = jax.random.split(key)

    nf0, in_channels, input_resolution, img_sidelength = 4, 4, 8, 16
    params = build_rendering_net(pkey, nf0, in_channels, input_resolution, img_sidelength)

    x = jax.random.normal(xkey, (2, in_channels, input_resolution, input_resolution),
                          jnp.float32)

    fwd = jax.jit(lambda inp: rendering_net_forward(params, inp))
    out = jax.block_until_ready(fwd(x))

    assert out.shape == (2, 3, img_sidelength, img_sidelength), out.shape
    assert bool(jnp.all(jnp.isfinite(out)))
    print("KERNEL_OK")
</pallas_src>

<mosaic_0001>
module attributes {stable_mosaic.version = 11 : i64} {
  func.func @_fused_matmul_kernel(%arg0: i32, %arg1: memref<128x36xbf16, #tpu.memory_space<vmem>>, %arg2: memref<36x128xbf16, #tpu.memory_space<vmem>>, %arg3: memref<1x128xf32, #tpu.memory_space<vmem>>, %arg4: memref<128x128xbf16, #tpu.memory_space<vmem>>) attributes {dimension_semantics = [#tpu.dimension_semantics<parallel>], iteration_bounds = array<i64: 1>, scalar_prefetch = 0 : i64, scratch_operands = 0 : i64, tpu.core_type = #tpu.core_type<tc>, window_params = [{transform_indices = @transform_0, window_bounds = array<i64: 128, 36>}, {pipeline_mode = #tpu.pipeline_mode<synchronous>, transform_indices = @transform_1, window_bounds = array<i64: 36, 128>}, {pipeline_mode = #tpu.pipeline_mode<synchronous>, transform_indices = @transform_2, window_bounds = array<i64: 1, 128>}, {transform_indices = @transform_3, window_bounds = array<i64: 128, 128>}]} {
    %c0 = arith.constant 0 : index
    %c0_0 = arith.constant 0 : index
    %0 = vector.load %arg1[%c0, %c0_0] : memref<128x36xbf16, #tpu.memory_space<vmem>>, vector<128x36xbf16>
    %c0_1 = arith.constant 0 : index
    %c0_2 = arith.constant 0 : index
    %1 = vector.load %arg2[%c0_1, %c0_2] : memref<36x128xbf16, #tpu.memory_space<vmem>>, vector<36x128xbf16>
    %cst = arith.constant dense<0.000000e+00> : vector<128x128xf32>
    %2 = tpu.matmul %0, %1, %cst {dimension_numbers = #tpu.dot_dimension_numbers<[1], [0], [0], [1], [0, 0, 1, 1], [], []>} : vector<128x36xbf16>, vector<36x128xbf16>, vector<128x128xf32> -> vector<128x128xf32>
    %c0_3 = arith.constant 0 : index
    %c0_4 = arith.constant 0 : index
    %3 = vector.load %arg3[%c0_3, %c0_4] : memref<1x128xf32, #tpu.memory_space<vmem>>, vector<1x128xf32>
    %4 = vector.broadcast %3 : vector<1x128xf32> to vector<128x128xf32>
    %5 = arith.addf %2, %4 : vector<128x128xf32>
    %cst_5 = arith.constant 0.000000e+00 : f32
    %6 = vector.broadcast %cst_5 : f32 to vector<128x128xf32>
    %7 = arith.cmpf ogt, %5, %6 : vector<128x128xf32>
    %cst_6 = arith.constant 2.000000e-01 : f32
    %8 = vector.broadcast %cst_6 : f32 to vector<128x128xf32>
    %9 = arith.mulf %8, %5 : vector<128x128xf32>
    %10 = arith.select %7, %5, %9 : vector<128x128xi1>, vector<128x128xf32>
    %11 = arith.truncf %10 : vector<128x128xf32> to vector<128x128xbf16>
    %c0_7 = arith.constant 0 : index
    %c0_8 = arith.constant 0 : index
    %12 = vector.load %arg4[%c0_7, %c0_8] : memref<128x128xbf16, #tpu.memory_space<vmem>>, vector<128x128xbf16>
    tpu.vector_store %arg4[%c0_7, %c0_8], %11 {strides = array<i32>} : memref<128x128xbf16, #tpu.memory_space<vmem>>, vector<128x128xbf16>,
    return
  }
  func.func @transform_0(%arg0: i32) -> (i32, i32) {
    %c0_i32 = arith.constant 0 : i32
    %c0_i32_0 = arith.constant 0 : i32
    return %arg0, %c0_i32 : i32, i32
  }
  func.func @transform_1(%arg0: i32) -> (i32, i32) {
    %c0_i32 = arith.constant 0 : i32
    %c0_i32_0 = arith.constant 0 : i32
    %c0_i32_1 = arith.constant 0 : i32
    return %c0_i32, %c0_i32_0 : i32, i32
  }
  func.func @transform_2(%arg0: i32) -> (i32, i32) {
    %c0_i32 = arith.constant 0 : i32
    %c0_i32_0 = arith.constant 0 : i32
    %c0_i32_1 = arith.constant 0 : i32
    return %c0_i32, %c0_i32_0 : i32, i32
  }
  func.func @transform_3(%arg0: i32) -> (i32, i32) {
    %c0_i32 = arith.constant 0 : i32
    %c0_i32_0 = arith.constant 0 : i32
    return %arg0, %c0_i32 : i32, i32
  }
}

module attributes {stable_mosaic.version = 11 : i64} {
  func.func @_fused_matmul_kernel(%arg0: i32, %arg1: memref<128x72xbf16, #tpu.memory_space<vmem>>, %arg2: memref<72x128xbf16, #tpu.memory_space<vmem>>, %arg3: memref<1x128xf32, #tpu.memory_space<vmem>>, %arg4: memref<128x128xbf16, #tpu.memory_space<vmem>>) attributes {dimension_semantics = [#tpu.dimension_semantics<parallel>], iteration_bounds = array<i64: 1>, scalar_prefetch = 0 : i64, scratch_operands = 0 : i64, tpu.core_type = #tpu.core_type<tc>, window_params = [{transform_indices = @transform_0, window_bounds = array<i64: 128, 72>}, {pipeline_mode = #tpu.pipeline_mode<synchronous>, transform_indices = @transform_1, window_bounds = array<i64: 72, 128>}, {pipeline_mode = #tpu.pipeline_mode<synchronous>, transform_indices = @transform_2, window_bounds = array<i64: 1, 128>}, {transform_indices = @transform_3, window_bounds = array<i64: 128, 128>}]} {
    %c0 = arith.constant 0 : index
    %c0_0 = arith.constant 0 : index
    %0 = vector.load %arg1[%c0, %c0_0] : memref<128x72xbf16, #tpu.memory_space<vmem>>, vector<128x72xbf16>
    %c0_1 = arith.constant 0 : index
    %c0_2 = arith.constant 0 : index
    %1 = vector.load %arg2[%c0_1, %c0_2] : memref<72x128xbf16, #tpu.memory_space<vmem>>, vector<72x128xbf16>
    %cst = arith.constant dense<0.000000e+00> : vector<128x128xf32>
    %2 = tpu.matmul %0, %1, %cst {dimension_numbers = #tpu.dot_dimension_numbers<[1], [0], [0], [1], [0, 0, 1, 1], [], []>} : vector<128x72xbf16>, vector<72x128xbf16>, vector<128x128xf32> -> vector<128x128xf32>
    %c0_3 = arith.constant 0 : index
    %c0_4 = arith.constant 0 : index
    %3 = vector.load %arg3[%c0_3, %c0_4] : memref<1x128xf32, #tpu.memory_space<vmem>>, vector<1x128xf32>
    %4 = vector.broadcast %3 : vector<1x128xf32> to vector<128x128xf32>
    %5 = arith.addf %2, %4 : vector<128x128xf32>
    %cst_5 = arith.constant 0.000000e+00 : f32
    %6 = vector.broadcast %cst_5 : f32 to vector<128x128xf32>
    %7 = arith.cmpf ogt, %5, %6 : vector<128x128xf32>
    %cst_6 = arith.constant 2.000000e-01 : f32
    %8 = vector.broadcast %cst_6 : f32 to vector<128x128xf32>
    %9 = arith.mulf %8, %5 : vector<128x128xf32>
    %10 = arith.select %7, %5, %9 : vector<128x128xi1>, vector<128x128xf32>
    %11 = arith.truncf %10 : vector<128x128xf32> to vector<128x128xbf16>
    %c0_7 = arith.constant 0 : index
    %c0_8 = arith.constant 0 : index
    %12 = vector.load %arg4[%c0_7, %c0_8] : memref<128x128xbf16, #tpu.memory_space<vmem>>, vector<128x128xbf16>
    tpu.vector_store %arg4[%c0_7, %c0_8], %11 {strides = array<i32>} : memref<128x128xbf16, #tpu.memory_space<vmem>>, vector<128x128xbf16>,
    return
  }
  func.func @transform_0(%arg0: i32) -> (i32, i32) {
    %c0_i32 = arith.constant 0 : i32
    %c0_i32_0 = arith.constant 0 : i32
    return %arg0, %c0_i32 : i32, i32
  }
  func.func @transform_1(%arg0: i32) -> (i32, i32) {
    %c0_i32 = arith.constant 0 : i32
    %c0_i32_0 = arith.constant 0 : i32
    %c0_i32_1 = arith.constant 0 : i32
    return %c0_i32, %c0_i32_0 : i32, i32
  }
  func.func @transform_2(%arg0: i32) -> (i32, i32) {
    %c0_i32 = arith.constant 0 : i32
    %c0_i32_0 = arith.constant 0 : i32
    %c0_i32_1 = arith.constant 0 : i32
    return %c0_i32, %c0_i32_0 : i32, i32
  }
  func.func @transform_3(%arg0: i32) -> (i32, i32) {
    %c0_i32 = arith.constant 0 : i32
    %c0_i32_0 = arith.constant 0 : i32
    return %arg0, %c0_i32 : i32, i32
  }
}

module attributes {stable_mosaic.version = 11 : i64} {
  func.func @_fused_matmul_kernel(%arg0: i32, %arg1: memref<32x128xbf16, #tpu.memory_space<vmem>>, %arg2: memref<128x128xbf16, #tpu.memory_space<vmem>>, %arg3: memref<1x128xf32, #tpu.memory_space<vmem>>, %arg4: memref<32x128xbf16, #tpu.memory_space<vmem>>) attributes {dimension_semantics = [#tpu.dimension_semantics<parallel>], iteration_bounds = array<i64: 1>, scalar_prefetch = 0 : i64, scratch_operands = 0 : i64, tpu.core_type = #tpu.core_type<tc>, window_params = [{transform_indices = @transform_0, window_bounds = array<i64: 32, 128>}, {pipeline_mode = #tpu.pipeline_mode<synchronous>, transform_indices = @transform_1, window_bounds = array<i64: 128, 128>}, {pipeline_mode = #tpu.pipeline_mode<synchronous>, transform_indices = @transform_2, window_bounds = array<i64: 1, 128>}, {transform_indices = @transform_3, window_bounds = array<i64: 32, 128>}]} {
    %c0 = arith.constant 0 : index
    %c0_0 = arith.constant 0 : index
    %0 = vector.load %arg1[%c0, %c0_0] : memref<32x128xbf16, #tpu.memory_space<vmem>>, vector<32x128xbf16>
    %c0_1 = arith.constant 0 : index
    %c0_2 = arith.constant 0 : index
    %1 = vector.load %arg2[%c0_1, %c0_2] : memref<128x128xbf16, #tpu.memory_space<vmem>>, vector<128x128xbf16>
    %cst = arith.constant dense<0.000000e+00> : vector<32x128xf32>
    %2 = tpu.matmul %0, %1, %cst {dimension_numbers = #tpu.dot_dimension_numbers<[1], [0], [0], [1], [0, 0, 1, 1], [], []>} : vector<32x128xbf16>, vector<128x128xbf16>, vector<32x128xf32> -> vector<32x128xf32>
    %c0_3 = arith.constant 0 : index
    %c0_4 = arith.constant 0 : index
    %3 = vector.load %arg3[%c0_3, %c0_4] : memref<1x128xf32, #tpu.memory_space<vmem>>, vector<1x128xf32>
    %4 = vector.broadcast %3 : vector<1x128xf32> to vector<32x128xf32>
    %5 = arith.addf %2, %4 : vector<32x128xf32>
    %cst_5 = arith.constant 0.000000e+00 : f32
    %6 = vector.broadcast %cst_5 : f32 to vector<32x128xf32>
    %7 = arith.cmpf ogt, %5, %6 : vector<32x128xf32>
    %cst_6 = arith.constant 2.000000e-01 : f32
    %8 = vector.broadcast %cst_6 : f32 to vector<32x128xf32>
    %9 = arith.mulf %8, %5 : vector<32x128xf32>
    %10 = arith.select %7, %5, %9 : vector<32x128xi1>, vector<32x128xf32>
    %11 = arith.truncf %10 : vector<32x128xf32> to vector<32x128xbf16>
    %c0_7 = arith.constant 0 : index
    %c0_8 = arith.constant 0 : index
    %12 = vector.load %arg4[%c0_7, %c0_8] : memref<32x128xbf16, #tpu.memory_space<vmem>>, vector<32x128xbf16>
    tpu.vector_store %arg4[%c0_7, %c0_8], %11 {strides = array<i32>} : memref<32x128xbf16, #tpu.memory_space<vmem>>, vector<32x128xbf16>,
    return
  }
  func.func @transform_0(%arg0: i32) -> (i32, i32) {
    %c0_i32 = arith.constant 0 : i32
    %c0_i32_0 = arith.constant 0 : i32
    return %arg0, %c0_i32 : i32, i32
  }
  func.func @transform_1(%arg0: i32) -> (i32, i32) {
    %c0_i32 = arith.constant 0 : i32
    %c0_i32_0 = arith.constant 0 : i32
    %c0_i32_1 = arith.constant 0 : i32
    return %c0_i32, %c0_i32_0 : i32, i32
  }
  func.func @transform_2(%arg0: i32) -> (i32, i32) {
    %c0_i32 = arith.constant 0 : i32
    %c0_i32_0 = arith.constant 0 : i32
    %c0_i32_1 = arith.constant 0 : i32
    return %c0_i32, %c0_i32_0 : i32, i32
  }
  func.func @transform_3(%arg0: i32) -> (i32, i32) {
    %c0_i32 = arith.constant 0 : i32
    %c0_i32_0 = arith.constant 0 : i32
    return %arg0, %c0_i32 : i32, i32
  }
}

module attributes {stable_mosaic.version = 11 : i64} {
  func.func @_fused_matmul_kernel(%arg0: i32, %arg1: memref<32x144xbf16, #tpu.memory_space<vmem>>, %arg2: memref<144x128xbf16, #tpu.memory_space<vmem>>, %arg3: memref<1x128xf32, #tpu.memory_space<vmem>>, %arg4: memref<32x128xbf16, #tpu.memory_space<vmem>>) attributes {dimension_semantics = [#tpu.dimension_semantics<parallel>], iteration_bounds = array<i64: 1>, scalar_prefetch = 0 : i64, scratch_operands = 0 : i64, tpu.core_type = #tpu.core_type<tc>, window_params = [{transform_indices = @transform_0, window_bounds = array<i64: 32, 144>}, {pipeline_mode = #tpu.pipeline_mode<synchronous>, transform_indices = @transform_1, window_bounds = array<i64: 144, 128>}, {pipeline_mode = #tpu.pipeline_mode<synchronous>, transform_indices = @transform_2, window_bounds = array<i64: 1, 128>}, {transform_indices = @transform_3, window_bounds = array<i64: 32, 128>}]} {
    %c0 = arith.constant 0 : index
    %c0_0 = arith.constant 0 : index
    %0 = vector.load %arg1[%c0, %c0_0] : memref<32x144xbf16, #tpu.memory_space<vmem>>, vector<32x144xbf16>
    %c0_1 = arith.constant 0 : index
    %c0_2 = arith.constant 0 : index
    %1 = vector.load %arg2[%c0_1, %c0_2] : memref<144x128xbf16, #tpu.memory_space<vmem>>, vector<144x128xbf16>
    %cst = arith.constant dense<0.000000e+00> : vector<32x128xf32>
    %2 = tpu.matmul %0, %1, %cst {dimension_numbers = #tpu.dot_dimension_numbers<[1], [0], [0], [1], [0, 0, 1, 1], [], []>} : vector<32x144xbf16>, vector<144x128xbf16>, vector<32x128xf32> -> vector<32x128xf32>
    %c0_3 = arith.constant 0 : index
    %c0_4 = arith.constant 0 : index
    %3 = vector.load %arg3[%c0_3, %c0_4] : memref<1x128xf32, #tpu.memory_space<vmem>>, vector<1x128xf32>
    %4 = vector.broadcast %3 : vector<1x128xf32> to vector<32x128xf32>
    %5 = arith.addf %2, %4 : vector<32x128xf32>
    %cst_5 = arith.constant 0.000000e+00 : f32
    %6 = vector.broadcast %cst_5 : f32 to vector<32x128xf32>
    %7 = arith.cmpf ogt, %5, %6 : vector<32x128xf32>
    %cst_6 = arith.constant 2.000000e-01 : f32
    %8 = vector.broadcast %cst_6 : f32 to vector<32x128xf32>
    %9 = arith.mulf %8, %5 : vector<32x128xf32>
    %10 = arith.select %7, %5, %9 : vector<32x128xi1>, vector<32x128xf32>
    %11 = arith.truncf %10 : vector<32x128xf32> to vector<32x128xbf16>
    %c0_7 = arith.constant 0 : index
    %c0_8 = arith.constant 0 : index
    %12 = vector.load %arg4[%c0_7, %c0_8] : memref<32x128xbf16, #tpu.memory_space<vmem>>, vector<32x128xbf16>
    tpu.vector_store %arg4[%c0_7, %c0_8], %11 {strides = array<i32>} : memref<32x128xbf16, #tpu.memory_space<vmem>>, vector<32x128xbf16>,
    return
  }
  func.func @transform_0(%arg0: i32) -> (i32, i32) {
    %c0_i32 = arith.constant 0 : i32
    %c0_i32_0 = arith.constant 0 : i32
    return %arg0, %c0_i32 : i32, i32
  }
  func.func @transform_1(%arg0: i32) -> (i32, i32) {
    %c0_i32 = arith.constant 0 : i32
    %c0_i32_0 = arith.constant 0 : i32
    %c0_i32_1 = arith.constant 0 : i32
    return %c0_i32, %c0_i32_0 : i32, i32
  }
  func.func @transform_2(%arg0: i32) -> (i32, i32) {
    %c0_i32 = arith.constant 0 : i32
    %c0_i32_0 = arith.constant 0 : i32
    %c0_i32_1 = arith.constant 0 : i32
    return %c0_i32, %c0_i32_0 : i32, i32
  }
  func.func @transform_3(%arg0: i32) -> (i32, i32) {
    %c0_i32 = arith.constant 0 : i32
    %c0_i32_0 = arith.constant 0 : i32
    return %arg0, %c0_i32 : i32, i32
  }
}

module attributes {stable_mosaic.version = 11 : i64} {
  func.func @_fused_matmul_kernel(%arg0: i32, %arg1: memref<16x256xbf16, #tpu.memory_space<vmem>>, %arg2: memref<256x128xbf16, #tpu.memory_space<vmem>>, %arg3: memref<1x128xf32, #tpu.memory_space<vmem>>, %arg4: memref<16x128xbf16, #tpu.memory_space<vmem>>) attributes {dimension_semantics = [#tpu.dimension_semantics<parallel>], iteration_bounds = array<i64: 1>, scalar_prefetch = 0 : i64, scratch_operands = 0 : i64, tpu.core_type = #tpu.core_type<tc>, window_params = [{transform_indices = @transform_0, window_bounds = array<i64: 16, 256>}, {pipeline_mode = #tpu.pipeline_mode<synchronous>, transform_indices = @transform_1, window_bounds = array<i64: 256, 128>}, {pipeline_mode = #tpu.pipeline_mode<synchronous>, transform_indices = @transform_2, window_bounds = array<i64: 1, 128>}, {transform_indices = @transform_3, window_bounds = array<i64: 16, 128>}]} {
    %c0 = arith.constant 0 : index
    %c0_0 = arith.constant 0 : index
    %0 = vector.load %arg1[%c0, %c0_0] : memref<16x256xbf16, #tpu.memory_space<vmem>>, vector<16x256xbf16>
    %c0_1 = arith.constant 0 : index
    %c0_2 = arith.constant 0 : index
    %1 = vector.load %arg2[%c0_1, %c0_2] : memref<256x128xbf16, #tpu.memory_space<vmem>>, vector<256x128xbf16>
    %cst = arith.constant dense<0.000000e+00> : vector<16x128xf32>
    %2 = tpu.matmul %0, %1, %cst {dimension_numbers = #tpu.dot_dimension_numbers<[1], [0], [0], [1], [0, 0, 1, 1], [], []>} : vector<16x256xbf16>, vector<256x128xbf16>, vector<16x128xf32> -> vector<16x128xf32>
    %c0_3 = arith.constant 0 : index
    %c0_4 = arith.constant 0 : index
    %3 = vector.load %arg3[%c0_3, %c0_4] : memref<1x128xf32, #tpu.memory_space<vmem>>, vector<1x128xf32>
    %4 = vector.broadcast %3 : vector<1x128xf32> to vector<16x128xf32>
    %5 = arith.addf %2, %4 : vector<16x128xf32>
    %cst_5 = arith.constant 0.000000e+00 : f32
    %6 = vector.broadcast %cst_5 : f32 to vector<16x128xf32>
    %7 = arith.cmpf ogt, %5, %6 : vector<16x128xf32>
    %cst_6 = arith.constant 2.000000e-01 : f32
    %8 = vector.broadcast %cst_6 : f32 to vector<16x128xf32>
    %9 = arith.mulf %8, %5 : vector<16x128xf32>
    %10 = arith.select %7, %5, %9 : vector<16x128xi1>, vector<16x128xf32>
    %11 = arith.truncf %10 : vector<16x128xf32> to vector<16x128xbf16>
    %c0_7 = arith.constant 0 : index
    %c0_8 = arith.constant 0 : index
    %12 = vector.load %arg4[%c0_7, %c0_8] : memref<16x128xbf16, #tpu.memory_space<vmem>>, vector<16x128xbf16>
    tpu.vector_store %arg4[%c0_7, %c0_8], %11 {strides = array<i32>} : memref<16x128xbf16, #tpu.memory_space<vmem>>, vector<16x128xbf16>,
    return
  }
  func.func @transform_0(%arg0: i32) -> (i32, i32) {
    %c0_i32 = arith.constant 0 : i32
    %c0_i32_0 = arith.constant 0 : i32
    return %arg0, %c0_i32 : i32, i32
  }
  func.func @transform_1(%arg0: i32) -> (i32, i32) {
    %c0_i32 = arith.constant 0 : i32
    %c0_i32_0 = arith.constant 0 : i32
    %c0_i32_1 = arith.constant 0 : i32
    return %c0_i32, %c0_i32_0 : i32, i32
  }
  func.func @transform_2(%arg0: i32) -> (i32, i32) {
    %c0_i32 = arith.constant 0 : i32
    %c0_i32_0 = arith.constant 0 : i32
    %c0_i32_1 = arith.constant 0 : i32
    return %c0_i32, %c0_i32_0 : i32, i32
  }
  func.func @transform_3(%arg0: i32) -> (i32, i32) {
    %c0_i32 = arith.constant 0 : i32
    %c0_i32_0 = arith.constant 0 : i32
    return %arg0, %c0_i32 : i32, i32
  }
}

module attributes {stable_mosaic.version = 11 : i64} {
  func.func @_fused_matmul_kernel(%arg0: i32, %arg1: memref<16x288xbf16, #tpu.memory_space<vmem>>, %arg2: memref<288x128xbf16, #tpu.memory_space<vmem>>, %arg3: memref<1x128xf32, #tpu.memory_space<vmem>>, %arg4: memref<16x128xbf16, #tpu.memory_space<vmem>>) attributes {dimension_semantics = [#tpu.dimension_semantics<parallel>], iteration_bounds = array<i64: 1>, scalar_prefetch = 0 : i64, scratch_operands = 0 : i64, tpu.core_type = #tpu.core_type<tc>, window_params = [{transform_indices = @transform_0, window_bounds = array<i64: 16, 288>}, {pipeline_mode = #tpu.pipeline_mode<synchronous>, transform_indices = @transform_1, window_bounds = array<i64: 288, 128>}, {pipeline_mode = #tpu.pipeline_mode<synchronous>, transform_indices = @transform_2, window_bounds = array<i64: 1, 128>}, {transform_indices = @transform_3, window_bounds = array<i64: 16, 128>}]} {
    %c0 = arith.constant 0 : index
    %c0_0 = arith.constant 0 : index
    %0 = vector.load %arg1[%c0, %c0_0] : memref<16x288xbf16, #tpu.memory_space<vmem>>, vector<16x288xbf16>
    %c0_1 = arith.constant 0 : index
    %c0_2 = arith.constant 0 : index
    %1 = vector.load %arg2[%c0_1, %c0_2] : memref<288x128xbf16, #tpu.memory_space<vmem>>, vector<288x128xbf16>
    %cst = arith.constant dense<0.000000e+00> : vector<16x128xf32>
    %2 = tpu.matmul %0, %1, %cst {dimension_numbers = #tpu.dot_dimension_numbers<[1], [0], [0], [1], [0, 0, 1, 1], [], []>} : vector<16x288xbf16>, vector<288x128xbf16>, vector<16x128xf32> -> vector<16x128xf32>
    %c0_3 = arith.constant 0 : index
    %c0_4 = arith.constant 0 : index
    %3 = vector.load %arg3[%c0_3, %c0_4] : memref<1x128xf32, #tpu.memory_space<vmem>>, vector<1x128xf32>
    %4 = vector.broadcast %3 : vector<1x128xf32> to vector<16x128xf32>
    %5 = arith.addf %2, %4 : vector<16x128xf32>
    %cst_5 = arith.constant 0.000000e+00 : f32
    %6 = vector.broadcast %cst_5 : f32 to vector<16x128xf32>
    %7 = arith.cmpf ogt, %5, %6 : vector<16x128xf32>
    %cst_6 = arith.constant 2.000000e-01 : f32
    %8 = vector.broadcast %cst_6 : f32 to vector<16x128xf32>
    %9 = arith.mulf %8, %5 : vector<16x128xf32>
    %10 = arith.select %7, %5, %9 : vector<16x128xi1>, vector<16x128xf32>
    %11 = arith.truncf %10 : vector<16x128xf32> to vector<16x128xbf16>
    %c0_7 = arith.constant 0 : index
    %c0_8 = arith.constant 0 : index
    %12 = vector.load %arg4[%c0_7, %c0_8] : memref<16x128xbf16, #tpu.memory_space<vmem>>, vector<16x128xbf16>
    tpu.vector_store %arg4[%c0_7, %c0_8], %11 {strides = array<i32>} : memref<16x128xbf16, #tpu.memory_space<vmem>>, vector<16x128xbf16>,
    return
  }
  func.func @transform_0(%arg0: i32) -> (i32, i32) {
    %c0_i32 = arith.constant 0 : i32
    %c0_i32_0 = arith.constant 0 : i32
    return %arg0, %c0_i32 : i32, i32
  }
  func.func @transform_1(%arg0: i32) -> (i32, i32) {
    %c0_i32 = arith.constant 0 : i32
    %c0_i32_0 = arith.constant 0 : i32
    %c0_i32_1 = arith.constant 0 : i32
    return %c0_i32, %c0_i32_0 : i32, i32
  }
  func.func @transform_2(%arg0: i32) -> (i32, i32) {
    %c0_i32 = arith.constant 0 : i32
    %c0_i32_0 = arith.constant 0 : i32
    %c0_i32_1 = arith.constant 0 : i32
    return %c0_i32, %c0_i32_0 : i32, i32
  }
  func.func @transform_3(%arg0: i32) -> (i32, i32) {
    %c0_i32 = arith.constant 0 : i32
    %c0_i32_0 = arith.constant 0 : i32
    return %arg0, %c0_i32 : i32, i32
  }
}

module attributes {stable_mosaic.version = 11 : i64} {
  func.func @_fused_matmul_kernel(%arg0: i32, %arg1: memref<16x512xbf16, #tpu.memory_space<vmem>>, %arg2: memref<512x128xbf16, #tpu.memory_space<vmem>>, %arg3: memref<1x128xf32, #tpu.memory_space<vmem>>, %arg4: memref<16x128xbf16, #tpu.memory_space<vmem>>) attributes {dimension_semantics = [#tpu.dimension_semantics<parallel>], iteration_bounds = array<i64: 1>, scalar_prefetch = 0 : i64, scratch_operands = 0 : i64, tpu.core_type = #tpu.core_type<tc>, window_params = [{transform_indices = @transform_0, window_bounds = array<i64: 16, 512>}, {pipeline_mode = #tpu.pipeline_mode<synchronous>, transform_indices = @transform_1, window_bounds = array<i64: 512, 128>}, {pipeline_mode = #tpu.pipeline_mode<synchronous>, transform_indices = @transform_2, window_bounds = array<i64: 1, 128>}, {transform_indices = @transform_3, window_bounds = array<i64: 16, 128>}]} {
    %c0 = arith.constant 0 : index
    %c0_0 = arith.constant 0 : index
    %0 = vector.load %arg1[%c0, %c0_0] : memref<16x512xbf16, #tpu.memory_space<vmem>>, vector<16x512xbf16>
    %c0_1 = arith.constant 0 : index
    %c0_2 = arith.constant 0 : index
    %1 = vector.load %arg2[%c0_1, %c0_2] : memref<512x128xbf16, #tpu.memory_space<vmem>>, vector<512x128xbf16>
    %cst = arith.constant dense<0.000000e+00> : vector<16x128xf32>
    %2 = tpu.matmul %0, %1, %cst {dimension_numbers = #tpu.dot_dimension_numbers<[1], [0], [0], [1], [0, 0, 1, 1], [], []>} : vector<16x512xbf16>, vector<512x128xbf16>, vector<16x128xf32> -> vector<16x128xf32>
    %c0_3 = arith.constant 0 : index
    %c0_4 = arith.constant 0 : index
    %3 = vector.load %arg3[%c0_3, %c0_4] : memref<1x128xf32, #tpu.memory_space<vmem>>, vector<1x128xf32>
    %4 = vector.broadcast %3 : vector<1x128xf32> to vector<16x128xf32>
    %5 = arith.addf %2, %4 : vector<16x128xf32>
    %cst_5 = arith.constant 0.000000e+00 : f32
    %6 = vector.broadcast %cst_5 : f32 to vector<16x128xf32>
    %7 = arith.cmpf ogt, %5, %6 : vector<16x128xf32>
    %cst_6 = arith.constant 2.000000e-01 : f32
    %8 = vector.broadcast %cst_6 : f32 to vector<16x128xf32>
    %9 = arith.mulf %8, %5 : vector<16x128xf32>
    %10 = arith.select %7, %5, %9 : vector<16x128xi1>, vector<16x128xf32>
    %11 = arith.truncf %10 : vector<16x128xf32> to vector<16x128xbf16>
    %c0_7 = arith.constant 0 : index
    %c0_8 = arith.constant 0 : index
    %12 = vector.load %arg4[%c0_7, %c0_8] : memref<16x128xbf16, #tpu.memory_space<vmem>>, vector<16x128xbf16>
    tpu.vector_store %arg4[%c0_7, %c0_8], %11 {strides = array<i32>} : memref<16x128xbf16, #tpu.memory_space<vmem>>, vector<16x128xbf16>,
    return
  }
  func.func @transform_0(%arg0: i32) -> (i32, i32) {
    %c0_i32 = arith.constant 0 : i32
    %c0_i32_0 = arith.constant 0 : i32
    return %arg0, %c0_i32 : i32, i32
  }
  func.func @transform_1(%arg0: i32) -> (i32, i32) {
    %c0_i32 = arith.constant 0 : i32
    %c0_i32_0 = arith.constant 0 : i32
    %c0_i32_1 = arith.constant 0 : i32
    return %c0_i32, %c0_i32_0 : i32, i32
  }
  func.func @transform_2(%arg0: i32) -> (i32, i32) {
    %c0_i32 = arith.constant 0 : i32
    %c0_i32_0 = arith.constant 0 : i32
    %c0_i32_1 = arith.constant 0 : i32
    return %c0_i32, %c0_i32_0 : i32, i32
  }
  func.func @transform_3(%arg0: i32) -> (i32, i32) {
    %c0_i32 = arith.constant 0 : i32
    %c0_i32_0 = arith.constant 0 : i32
    return %arg0, %c0_i32 : i32, i32
  }
}

module attributes {stable_mosaic.version = 11 : i64} {
  func.func @_fused_matmul_kernel(%arg0: i32, %arg1: memref<16x288xbf16, #tpu.memory_space<vmem>>, %arg2: memref<288x128xbf16, #tpu.memory_space<vmem>>, %arg3: memref<1x128xf32, #tpu.memory_space<vmem>>, %arg4: memref<16x128xbf16, #tpu.memory_space<vmem>>) attributes {dimension_semantics = [#tpu.dimension_semantics<parallel>], iteration_bounds = array<i64: 1>, scalar_prefetch = 0 : i64, scratch_operands = 0 : i64, tpu.core_type = #tpu.core_type<tc>, window_params = [{transform_indices = @transform_0, window_bounds = array<i64: 16, 288>}, {pipeline_mode = #tpu.pipeline_mode<synchronous>, transform_indices = @transform_1, window_bounds = array<i64: 288, 128>}, {pipeline_mode = #tpu.pipeline_mode<synchronous>, transform_indices = @transform_2, window_bounds = array<i64: 1, 128>}, {transform_indices = @transform_3, window_bounds = array<i64: 16, 128>}]} {
    %c0 = arith.constant 0 : index
    %c0_0 = arith.constant 0 : index
    %0 = vector.load %arg1[%c0, %c0_0] : memref<16x288xbf16, #tpu.memory_space<vmem>>, vector<16x288xbf16>
    %c0_1 = arith.constant 0 : index
    %c0_2 = arith.constant 0 : index
    %1 = vector.load %arg2[%c0_1, %c0_2] : memref<288x128xbf16, #tpu.memory_space<vmem>>, vector<288x128xbf16>
    %cst = arith.constant dense<0.000000e+00> : vector<16x128xf32>
    %2 = tpu.matmul %0, %1, %cst {dimension_numbers = #tpu.dot_dimension_numbers<[1], [0], [0], [1], [0, 0, 1, 1], [], []>} : vector<16x288xbf16>, vector<288x128xbf16>, vector<16x128xf32> -> vector<16x128xf32>
    %c0_3 = arith.constant 0 : index
    %c0_4 = arith.constant 0 : index
    %3 = vector.load %arg3[%c0_3, %c0_4] : memref<1x128xf32, #tpu.memory_space<vmem>>, vector<1x128xf32>
    %4 = vector.broadcast %3 : vector<1x128xf32> to vector<16x128xf32>
    %5 = arith.addf %2, %4 : vector<16x128xf32>
    %cst_5 = arith.constant 0.000000e+00 : f32
    %6 = vector.broadcast %cst_5 : f32 to vector<16x128xf32>
    %7 = arith.maximumf %5, %6 : vector<16x128xf32>
    %8 = arith.truncf %7 : vector<16x128xf32> to vector<16x128xbf16>
    %c0_6 = arith.constant 0 : index
    %c0_7 = arith.constant 0 : index
    %9 = vector.load %arg4[%c0_6, %c0_7] : memref<16x128xbf16, #tpu.memory_space<vmem>>, vector<16x128xbf16>
    tpu.vector_store %arg4[%c0_6, %c0_7], %8 {strides = array<i32>} : memref<16x128xbf16, #tpu.memory_space<vmem>>, vector<16x128xbf16>,
    return
  }
  func.func @transform_0(%arg0: i32) -> (i32, i32) {
    %c0_i32 = arith.constant 0 : i32
    %c0_i32_0 = arith.constant 0 : i32
    return %arg0, %c0_i32 : i32, i32
  }
  func.func @transform_1(%arg0: i32) -> (i32, i32) {
    %c0_i32 = arith.constant 0 : i32
    %c0_i32_0 = arith.constant 0 : i32
    %c0_i32_1 = arith.constant 0 : i32
    return %c0_i32, %c0_i32_0 : i32, i32
  }
  func.func @transform_2(%arg0: i32) -> (i32, i32) {
    %c0_i32 = arith.constant 0 : i32
    %c0_i32_0 = arith.constant 0 : i32
    %c0_i32_1 = arith.constant 0 : i32
    return %c0_i32, %c0_i32_0 : i32, i32
  }
  func.func @transform_3(%arg0: i32) -> (i32, i32) {
    %c0_i32 = arith.constant 0 : i32
    %c0_i32_0 = arith.constant 0 : i32
    return %arg0, %c0_i32 : i32, i32
  }
}

module attributes {stable_mosaic.version = 11 : i64} {
  func.func @_fused_matmul_kernel(%arg0: i32, %arg1: memref<16x576xbf16, #tpu.memory_space<vmem>>, %arg2: memref<576x128xbf16, #tpu.memory_space<vmem>>, %arg3: memref<1x128xf32, #tpu.memory_space<vmem>>, %arg4: memref<16x128xbf16, #tpu.memory_space<vmem>>) attributes {dimension_semantics = [#tpu.dimension_semantics<parallel>], iteration_bounds = array<i64: 1>, scalar_prefetch = 0 : i64, scratch_operands = 0 : i64, tpu.core_type = #tpu.core_type<tc>, window_params = [{transform_indices = @transform_0, window_bounds = array<i64: 16, 576>}, {pipeline_mode = #tpu.pipeline_mode<synchronous>, transform_indices = @transform_1, window_bounds = array<i64: 576, 128>}, {pipeline_mode = #tpu.pipeline_mode<synchronous>, transform_indices = @transform_2, window_bounds = array<i64: 1, 128>}, {transform_indices = @transform_3, window_bounds = array<i64: 16, 128>}]} {
    %c0 = arith.constant 0 : index
    %c0_0 = arith.constant 0 : index
    %0 = vector.load %arg1[%c0, %c0_0] : memref<16x576xbf16, #tpu.memory_space<vmem>>, vector<16x576xbf16>
    %c0_1 = arith.constant 0 : index
    %c0_2 = arith.constant 0 : index
    %1 = vector.load %arg2[%c0_1, %c0_2] : memref<576x128xbf16, #tpu.memory_space<vmem>>, vector<576x128xbf16>
    %cst = arith.constant dense<0.000000e+00> : vector<16x128xf32>
    %2 = tpu.matmul %0, %1, %cst {dimension_numbers = #tpu.dot_dimension_numbers<[1], [0], [0], [1], [0, 0, 1, 1], [], []>} : vector<16x576xbf16>, vector<576x128xbf16>, vector<16x128xf32> -> vector<16x128xf32>
    %c0_3 = arith.constant 0 : index
    %c0_4 = arith.constant 0 : index
    %3 = vector.load %arg3[%c0_3, %c0_4] : memref<1x128xf32, #tpu.memory_space<vmem>>, vector<1x128xf32>
    %4 = vector.broadcast %3 : vector<1x128xf32> to vector<16x128xf32>
    %5 = arith.addf %2, %4 : vector<16x128xf32>
    %cst_5 = arith.constant 0.000000e+00 : f32
    %6 = vector.broadcast %cst_5 : f32 to vector<16x128xf32>
    %7 = arith.maximumf %5, %6 : vector<16x128xf32>
    %8 = arith.truncf %7 : vector<16x128xf32> to vector<16x128xbf16>
    %c0_6 = arith.constant 0 : index
    %c0_7 = arith.constant 0 : index
    %9 = vector.load %arg4[%c0_6, %c0_7] : memref<16x128xbf16, #tpu.memory_space<vmem>>, vector<16x128xbf16>
    tpu.vector_store %arg4[%c0_6, %c0_7], %8 {strides = array<i32>} : memref<16x128xbf16, #tpu.memory_space<vmem>>, vector<16x128xbf16>,
    return
  }
  func.func @transform_0(%arg0: i32) -> (i32, i32) {
    %c0_i32 = arith.constant 0 : i32
    %c0_i32_0 = arith.constant 0 : i32
    return %arg0, %c0_i32 : i32, i32
  }
  func.func @transform_1(%arg0: i32) -> (i32, i32) {
    %c0_i32 = arith.constant 0 : i32
    %c0_i32_0 = arith.constant 0 : i32
    %c0_i32_1 = arith.constant 0 : i32
    return %c0_i32, %c0_i32_0 : i32, i32
  }
  func.func @transform_2(%arg0: i32) -> (i32, i32) {
    %c0_i32 = arith.constant 0 : i32
    %c0_i32_0 = arith.constant 0 : i32
    %c0_i32_1 = arith.constant 0 : i32
    return %c0_i32, %c0_i32_0 : i32, i32
  }
  func.func @transform_3(%arg0: i32) -> (i32, i32) {
    %c0_i32 = arith.constant 0 : i32
    %c0_i32_0 = arith.constant 0 : i32
    return %arg0, %c0_i32 : i32, i32
  }
}

module attributes {stable_mosaic.version = 11 : i64} {
  func.func @_fused_matmul_kernel(%arg0: i32, %arg1: memref<32x144xbf16, #tpu.memory_space<vmem>>, %arg2: memref<144x128xbf16, #tpu.memory_space<vmem>>, %arg3: memref<1x128xf32, #tpu.memory_space<vmem>>, %arg4: memref<32x128xbf16, #tpu.memory_space<vmem>>) attributes {dimension_semantics = [#tpu.dimension_semantics<parallel>], iteration_bounds = array<i64: 1>, scalar_prefetch = 0 : i64, scratch_operands = 0 : i64, tpu.core_type = #tpu.core_type<tc>, window_params = [{transform_indices = @transform_0, window_bounds = array<i64: 32, 144>}, {pipeline_mode = #tpu.pipeline_mode<synchronous>, transform_indices = @transform_1, window_bounds = array<i64: 144, 128>}, {pipeline_mode = #tpu.pipeline_mode<synchronous>, transform_indices = @transform_2, window_bounds = array<i64: 1, 128>}, {transform_indices = @transform_3, window_bounds = array<i64: 32, 128>}]} {
    %c0 = arith.constant 0 : index
    %c0_0 = arith.constant 0 : index
    %0 = vector.load %arg1[%c0, %c0_0] : memref<32x144xbf16, #tpu.memory_space<vmem>>, vector<32x144xbf16>
    %c0_1 = arith.constant 0 : index
    %c0_2 = arith.constant 0 : index
    %1 = vector.load %arg2[%c0_1, %c0_2] : memref<144x128xbf16, #tpu.memory_space<vmem>>, vector<144x128xbf16>
    %cst = arith.constant dense<0.000000e+00> : vector<32x128xf32>
    %2 = tpu.matmul %0, %1, %cst {dimension_numbers = #tpu.dot_dimension_numbers<[1], [0], [0], [1], [0, 0, 1, 1], [], []>} : vector<32x144xbf16>, vector<144x128xbf16>, vector<32x128xf32> -> vector<32x128xf32>
    %c0_3 = arith.constant 0 : index
    %c0_4 = arith.constant 0 : index
    %3 = vector.load %arg3[%c0_3, %c0_4] : memref<1x128xf32, #tpu.memory_space<vmem>>, vector<1x128xf32>
    %4 = vector.broadcast %3 : vector<1x128xf32> to vector<32x128xf32>
    %5 = arith.addf %2, %4 : vector<32x128xf32>
    %cst_5 = arith.constant 0.000000e+00 : f32
    %6 = vector.broadcast %cst_5 : f32 to vector<32x128xf32>
    %7 = arith.maximumf %5, %6 : vector<32x128xf32>
    %8 = arith.truncf %7 : vector<32x128xf32> to vector<32x128xbf16>
    %c0_6 = arith.constant 0 : index
    %c0_7 = arith.constant 0 : index
    %9 = vector.load %arg4[%c0_6, %c0_7] : memref<32x128xbf16, #tpu.memory_space<vmem>>, vector<32x128xbf16>
    tpu.vector_store %arg4[%c0_6, %c0_7], %8 {strides = array<i32>} : memref<32x128xbf16, #tpu.memory_space<vmem>>, vector<32x128xbf16>,
    return
  }
  func.func @transform_0(%arg0: i32) -> (i32, i32) {
    %c0_i32 = arith.constant 0 : i32
    %c0_i32_0 = arith.constant 0 : i32
    return %arg0, %c0_i32 : i32, i32
  }
  func.func @transform_1(%arg0: i32) -> (i32, i32) {
    %c0_i32 = arith.constant 0 : i32
    %c0_i32_0 = arith.constant 0 : i32
    %c0_i32_1 = arith.constant 0 : i32
    return %c0_i32, %c0_i32_0 : i32, i32
  }
  func.func @transform_2(%arg0: i32) -> (i32, i32) {
    %c0_i32 = arith.constant 0 : i32
    %c0_i32_0 = arith.constant 0 : i32
    %c0_i32_1 = arith.constant 0 : i32
    return %c0_i32, %c0_i32_0 : i32, i32
  }
  func.func @transform_3(%arg0: i32) -> (i32, i32) {
    %c0_i32 = arith.constant 0 : i32
    %c0_i32_0 = arith.constant 0 : i32
    return %arg0, %c0_i32 : i32, i32
  }
}

module attributes {stable_mosaic.version = 11 : i64} {
  func.func @_fused_matmul_kernel(%arg0: i32, %arg1: memref<32x288xbf16, #tpu.memory_space<vmem>>, %arg2: memref<288x128xbf16, #tpu.memory_space<vmem>>, %arg3: memref<1x128xf32, #tpu.memory_space<vmem>>, %arg4: memref<32x128xbf16, #tpu.memory_space<vmem>>) attributes {dimension_semantics = [#tpu.dimension_semantics<parallel>], iteration_bounds = array<i64: 1>, scalar_prefetch = 0 : i64, scratch_operands = 0 : i64, tpu.core_type = #tpu.core_type<tc>, window_params = [{transform_indices = @transform_0, window_bounds = array<i64: 32, 288>}, {pipeline_mode = #tpu.pipeline_mode<synchronous>, transform_indices = @transform_1, window_bounds = array<i64: 288, 128>}, {pipeline_mode = #tpu.pipeline_mode<synchronous>, transform_indices = @transform_2, window_bounds = array<i64: 1, 128>}, {transform_indices = @transform_3, window_bounds = array<i64: 32, 128>}]} {
    %c0 = arith.constant 0 : index
    %c0_0 = arith.constant 0 : index
    %0 = vector.load %arg1[%c0, %c0_0] : memref<32x288xbf16, #tpu.memory_space<vmem>>, vector<32x288xbf16>
    %c0_1 = arith.constant 0 : index
    %c0_2 = arith.constant 0 : index
    %1 = vector.load %arg2[%c0_1, %c0_2] : memref<288x128xbf16, #tpu.memory_space<vmem>>, vector<288x128xbf16>
    %cst = arith.constant dense<0.000000e+00> : vector<32x128xf32>
    %2 = tpu.matmul %0, %1, %cst {dimension_numbers = #tpu.dot_dimension_numbers<[1], [0], [0], [1], [0, 0, 1, 1], [], []>} : vector<32x288xbf16>, vector<288x128xbf16>, vector<32x128xf32> -> vector<32x128xf32>
    %c0_3 = arith.constant 0 : index
    %c0_4 = arith.constant 0 : index
    %3 = vector.load %arg3[%c0_3, %c0_4] : memref<1x128xf32, #tpu.memory_space<vmem>>, vector<1x128xf32>
    %4 = vector.broadcast %3 : vector<1x128xf32> to vector<32x128xf32>
    %5 = arith.addf %2, %4 : vector<32x128xf32>
    %cst_5 = arith.constant 0.000000e+00 : f32
    %6 = vector.broadcast %cst_5 : f32 to vector<32x128xf32>
    %7 = arith.maximumf %5, %6 : vector<32x128xf32>
    %8 = arith.truncf %7 : vector<32x128xf32> to vector<32x128xbf16>
    %c0_6 = arith.constant 0 : index
    %c0_7 = arith.constant 0 : index
    %9 = vector.load %arg4[%c0_6, %c0_7] : memref<32x128xbf16, #tpu.memory_space<vmem>>, vector<32x128xbf16>
    tpu.vector_store %arg4[%c0_6, %c0_7], %8 {strides = array<i32>} : memref<32x128xbf16, #tpu.memory_space<vmem>>, vector<32x128xbf16>,
    return
  }
  func.func @transform_0(%arg0: i32) -> (i32, i32) {
    %c0_i32 = arith.constant 0 : i32
    %c0_i32_0 = arith.constant 0 : i32
    return %arg0, %c0_i32 : i32, i32
  }
  func.func @transform_1(%arg0: i32) -> (i32, i32) {
    %c0_i32 = arith.constant 0 : i32
    %c0_i32_0 = arith.constant 0 : i32
    %c0_i32_1 = arith.constant 0 : i32
    return %c0_i32, %c0_i32_0 : i32, i32
  }
  func.func @transform_2(%arg0: i32) -> (i32, i32) {
    %c0_i32 = arith.constant 0 : i32
    %c0_i32_0 = arith.constant 0 : i32
    %c0_i32_1 = arith.constant 0 : i32
    return %c0_i32, %c0_i32_0 : i32, i32
  }
  func.func @transform_3(%arg0: i32) -> (i32, i32) {
    %c0_i32 = arith.constant 0 : i32
    %c0_i32_0 = arith.constant 0 : i32
    return %arg0, %c0_i32 : i32, i32
  }
}

module attributes {stable_mosaic.version = 11 : i64} {
  func.func @_fused_matmul_kernel(%arg0: i32, %arg1: memref<128x72xbf16, #tpu.memory_space<vmem>>, %arg2: memref<72x128xbf16, #tpu.memory_space<vmem>>, %arg3: memref<1x128xf32, #tpu.memory_space<vmem>>, %arg4: memref<128x128xbf16, #tpu.memory_space<vmem>>) attributes {dimension_semantics = [#tpu.dimension_semantics<parallel>], iteration_bounds = array<i64: 1>, scalar_prefetch = 0 : i64, scratch_operands = 0 : i64, tpu.core_type = #tpu.core_type<tc>, window_params = [{transform_indices = @transform_0, window_bounds = array<i64: 128, 72>}, {pipeline_mode = #tpu.pipeline_mode<synchronous>, transform_indices = @transform_1, window_bounds = array<i64: 72, 128>}, {pipeline_mode = #tpu.pipeline_mode<synchronous>, transform_indices = @transform_2, window_bounds = array<i64: 1, 128>}, {transform_indices = @transform_3, window_bounds = array<i64: 128, 128>}]} {
    %c0 = arith.constant 0 : index
    %c0_0 = arith.constant 0 : index
    %0 = vector.load %arg1[%c0, %c0_0] : memref<128x72xbf16, #tpu.memory_space<vmem>>, vector<128x72xbf16>
    %c0_1 = arith.constant 0 : index
    %c0_2 = arith.constant 0 : index
    %1 = vector.load %arg2[%c0_1, %c0_2] : memref<72x128xbf16, #tpu.memory_space<vmem>>, vector<72x128xbf16>
    %cst = arith.constant dense<0.000000e+00> : vector<128x128xf32>
    %2 = tpu.matmul %0, %1, %cst {dimension_numbers = #tpu.dot_dimension_numbers<[1], [0], [0], [1], [0, 0, 1, 1], [], []>} : vector<128x72xbf16>, vector<72x128xbf16>, vector<128x128xf32> -> vector<128x128xf32>
    %c0_3 = arith.constant 0 : index
    %c0_4 = arith.constant 0 : index
    %3 = vector.load %arg3[%c0_3, %c0_4] : memref<1x128xf32, #tpu.memory_space<vmem>>, vector<1x128xf32>
    %4 = vector.broadcast %3 : vector<1x128xf32> to vector<128x128xf32>
    %5 = arith.addf %2, %4 : vector<128x128xf32>
    %cst_5 = arith.constant 0.000000e+00 : f32
    %6 = vector.broadcast %cst_5 : f32 to vector<128x128xf32>
    %7 = arith.maximumf %5, %6 : vector<128x128xf32>
    %8 = arith.truncf %7 : vector<128x128xf32> to vector<128x128xbf16>
    %c0_6 = arith.constant 0 : index
    %c0_7 = arith.constant 0 : index
    %9 = vector.load %arg4[%c0_6, %c0_7] : memref<128x128xbf16, #tpu.memory_space<vmem>>, vector<128x128xbf16>
    tpu.vector_store %arg4[%c0_6, %c0_7], %8 {strides = array<i32>} : memref<128x128xbf16, #tpu.memory_space<vmem>>, vector<128x128xbf16>,
    return
  }
  func.func @transform_0(%arg0: i32) -> (i32, i32) {
    %c0_i32 = arith.constant 0 : i32
    %c0_i32_0 = arith.constant 0 : i32
    return %arg0, %c0_i32 : i32, i32
  }
  func.func @transform_1(%arg0: i32) -> (i32, i32) {
    %c0_i32 = arith.constant 0 : i32
    %c0_i32_0 = arith.constant 0 : i32
    %c0_i32_1 = arith.constant 0 : i32
    return %c0_i32, %c0_i32_0 : i32, i32
  }
  func.func @transform_2(%arg0: i32) -> (i32, i32) {
    %c0_i32 = arith.constant 0 : i32
    %c0_i32_0 = arith.constant 0 : i32
    %c0_i32_1 = arith.constant 0 : i32
    return %c0_i32, %c0_i32_0 : i32, i32
  }
  func.func @transform_3(%arg0: i32) -> (i32, i32) {
    %c0_i32 = arith.constant 0 : i32
    %c0_i32_0 = arith.constant 0 : i32
    return %arg0, %c0_i32 : i32, i32
  }
}

module attributes {stable_mosaic.version = 11 : i64} {
  func.func @_fused_matmul_kernel(%arg0: i32, %arg1: memref<128x144xbf16, #tpu.memory_space<vmem>>, %arg2: memref<144x128xbf16, #tpu.memory_space<vmem>>, %arg3: memref<1x128xf32, #tpu.memory_space<vmem>>, %arg4: memref<128x128xbf16, #tpu.memory_space<vmem>>) attributes {dimension_semantics = [#tpu.dimension_semantics<parallel>], iteration_bounds = array<i64: 1>, scalar_prefetch = 0 : i64, scratch_operands = 0 : i64, tpu.core_type = #tpu.core_type<tc>, window_params = [{transform_indices = @transform_0, window_bounds = array<i64: 128, 144>}, {pipeline_mode = #tpu.pipeline_mode<synchronous>, transform_indices = @transform_1, window_bounds = array<i64: 144, 128>}, {pipeline_mode = #tpu.pipeline_mode<synchronous>, transform_indices = @transform_2, window_bounds = array<i64: 1, 128>}, {transform_indices = @transform_3, window_bounds = array<i64: 128, 128>}]} {
    %c0 = arith.constant 0 : index
    %c0_0 = arith.constant 0 : index
    %0 = vector.load %arg1[%c0, %c0_0] : memref<128x144xbf16, #tpu.memory_space<vmem>>, vector<128x144xbf16>
    %c0_1 = arith.constant 0 : index
    %c0_2 = arith.constant 0 : index
    %1 = vector.load %arg2[%c0_1, %c0_2] : memref<144x128xbf16, #tpu.memory_space<vmem>>, vector<144x128xbf16>
    %cst = arith.constant dense<0.000000e+00> : vector<128x128xf32>
    %2 = tpu.matmul %0, %1, %cst {dimension_numbers = #tpu.dot_dimension_numbers<[1], [0], [0], [1], [0, 0, 1, 1], [], []>} : vector<128x144xbf16>, vector<144x128xbf16>, vector<128x128xf32> -> vector<128x128xf32>
    %c0_3 = arith.constant 0 : index
    %c0_4 = arith.constant 0 : index
    %3 = vector.load %arg3[%c0_3, %c0_4] : memref<1x128xf32, #tpu.memory_space<vmem>>, vector<1x128xf32>
    %4 = vector.broadcast %3 : vector<1x128xf32> to vector<128x128xf32>
    %5 = arith.addf %2, %4 : vector<128x128xf32>
    %cst_5 = arith.constant 0.000000e+00 : f32
    %6 = vector.broadcast %cst_5 : f32 to vector<128x128xf32>
    %7 = arith.maximumf %5, %6 : vector<128x128xf32>
    %8 = arith.truncf %7 : vector<128x128xf32> to vector<128x128xbf16>
    %c0_6 = arith.constant 0 : index
    %c0_7 = arith.constant 0 : index
    %9 = vector.load %arg4[%c0_6, %c0_7] : memref<128x128xbf16, #tpu.memory_space<vmem>>, vector<128x128xbf16>
    tpu.vector_store %arg4[%c0_6, %c0_7], %8 {strides = array<i32>} : memref<128x128xbf16, #tpu.memory_space<vmem>>, vector<128x128xbf16>,
    return
  }
  func.func @transform_0(%arg0: i32) -> (i32, i32) {
    %c0_i32 = arith.constant 0 : i32
    %c0_i32_0 = arith.constant 0 : i32
    return %arg0, %c0_i32 : i32, i32
  }
  func.func @transform_1(%arg0: i32) -> (i32, i32) {
    %c0_i32 = arith.constant 0 : i32
    %c0_i32_0 = arith.constant 0 : i32
    %c0_i32_1 = arith.constant 0 : i32
    return %c0_i32, %c0_i32_0 : i32, i32
  }
  func.func @transform_2(%arg0: i32) -> (i32, i32) {
    %c0_i32 = arith.constant 0 : i32
    %c0_i32_0 = arith.constant 0 : i32
    %c0_i32_1 = arith.constant 0 : i32
    return %c0_i32, %c0_i32_0 : i32, i32
  }
  func.func @transform_3(%arg0: i32) -> (i32, i32) {
    %c0_i32 = arith.constant 0 : i32
    %c0_i32_0 = arith.constant 0 : i32
    return %arg0, %c0_i32 : i32, i32
  }
}

module attributes {stable_mosaic.version = 11 : i64} {
  func.func @_fused_matmul_kernel(%arg0: i32, %arg1: memref<256x36xbf16, #tpu.memory_space<vmem>>, %arg2: memref<36x128xbf16, #tpu.memory_space<vmem>>, %arg3: memref<1x128xf32, #tpu.memory_space<vmem>>, %arg4: memref<256x128xbf16, #tpu.memory_space<vmem>>) attributes {dimension_semantics = [#tpu.dimension_semantics<parallel>], iteration_bounds = array<i64: 2>, scalar_prefetch = 0 : i64, scratch_operands = 0 : i64, tpu.core_type = #tpu.core_type<tc>, window_params = [{transform_indices = @transform_0, window_bounds = array<i64: 256, 36>}, {pipeline_mode = #tpu.pipeline_mode<synchronous>, transform_indices = @transform_1, window_bounds = array<i64: 36, 128>}, {pipeline_mode = #tpu.pipeline_mode<synchronous>, transform_indices = @transform_2, window_bounds = array<i64: 1, 128>}, {transform_indices = @transform_3, window_bounds = array<i64: 256, 128>}]} {
    %c0 = arith.constant 0 : index
    %c0_0 = arith.constant 0 : index
    %0 = vector.load %arg1[%c0, %c0_0] : memref<256x36xbf16, #tpu.memory_space<vmem>>, vector<256x36xbf16>
    %c0_1 = arith.constant 0 : index
    %c0_2 = arith.constant 0 : index
    %1 = vector.load %arg2[%c0_1, %c0_2] : memref<36x128xbf16, #tpu.memory_space<vmem>>, vector<36x128xbf16>
    %cst = arith.constant dense<0.000000e+00> : vector<256x128xf32>
    %2 = tpu.matmul %0, %1, %cst {dimension_numbers = #tpu.dot_dimension_numbers<[1], [0], [0], [1], [0, 0, 1, 1], [], []>} : vector<256x36xbf16>, vector<36x128xbf16>, vector<256x128xf32> -> vector<256x128xf32>
    %c0_3 = arith.constant 0 : index
    %c0_4 = arith.constant 0 : index
    %3 = vector.load %arg3[%c0_3, %c0_4] : memref<1x128xf32, #tpu.memory_space<vmem>>, vector<1x128xf32>
    %4 = vector.broadcast %3 : vector<1x128xf32> to vector<256x128xf32>
    %5 = arith.addf %2, %4 : vector<256x128xf32>
    %cst_5 = arith.constant 0.000000e+00 : f32
    %6 = vector.broadcast %cst_5 : f32 to vector<256x128xf32>
    %7 = arith.maximumf %5, %6 : vector<256x128xf32>
    %8 = arith.truncf %7 : vector<256x128xf32> to vector<256x128xbf16>
    %c0_6 = arith.constant 0 : index
    %c0_7 = arith.constant 0 : index
    %9 = vector.load %arg4[%c0_6, %c0_7] : memref<256x128xbf16, #tpu.memory_space<vmem>>, vector<256x128xbf16>
    tpu.vector_store %arg4[%c0_6, %c0_7], %8 {strides = array<i32>} : memref<256x128xbf16, #tpu.memory_space<vmem>>, vector<256x128xbf16>,
    return
  }
  func.func @transform_0(%arg0: i32) -> (i32, i32) {
    %c0_i32 = arith.constant 0 : i32
    %c0_i32_0 = arith.constant 0 : i32
    return %arg0, %c0_i32 : i32, i32
  }
  func.func @transform_1(%arg0: i32) -> (i32, i32) {
    %c0_i32 = arith.constant 0 : i32
    %c0_i32_0 = arith.constant 0 : i32
    %c0_i32_1 = arith.constant 0 : i32
    return %c0_i32, %c0_i32_0 : i32, i32
  }
  func.func @transform_2(%arg0: i32) -> (i32, i32) {
    %c0_i32 = arith.constant 0 : i32
    %c0_i32_0 = arith.constant 0 : i32
    %c0_i32_1 = arith.constant 0 : i32
    return %c0_i32, %c0_i32_0 : i32, i32
  }
  func.func @transform_3(%arg0: i32) -> (i32, i32) {
    %c0_i32 = arith.constant 0 : i32
    %c0_i32_0 = arith.constant 0 : i32
    return %arg0, %c0_i32 : i32, i32
  }
}

module attributes {stable_mosaic.version = 11 : i64} {
  func.func @_fused_matmul_kernel(%arg0: i32, %arg1: memref<256x18xbf16, #tpu.memory_space<vmem>>, %arg2: memref<18x128xbf16, #tpu.memory_space<vmem>>, %arg3: memref<1x128xf32, #tpu.memory_space<vmem>>, %arg4: memref<256x128xf32, #tpu.memory_space<vmem>>) attributes {dimension_semantics = [#tpu.dimension_semantics<parallel>], iteration_bounds = array<i64: 2>, scalar_prefetch = 0 : i64, scratch_operands = 0 : i64, tpu.core_type = #tpu.core_type<tc>, window_params = [{transform_indices = @transform_0, window_bounds = array<i64: 256, 18>}, {pipeline_mode = #tpu.pipeline_mode<synchronous>, transform_indices = @transform_1, window_bounds = array<i64: 18, 128>}, {pipeline_mode = #tpu.pipeline_mode<synchronous>, transform_indices = @transform_2, window_bounds = array<i64: 1, 128>}, {transform_indices = @transform_3, window_bounds = array<i64: 256, 128>}]} {
    %c0 = arith.constant 0 : index
    %c0_0 = arith.constant 0 : index
    %0 = vector.load %arg1[%c0, %c0_0] : memref<256x18xbf16, #tpu.memory_space<vmem>>, vector<256x18xbf16>
    %c0_1 = arith.constant 0 : index
    %c0_2 = arith.constant 0 : index
    %1 = vector.load %arg2[%c0_1, %c0_2] : memref<18x128xbf16, #tpu.memory_space<vmem>>, vector<18x128xbf16>
    %cst = arith.constant dense<0.000000e+00> : vector<256x128xf32>
    %2 = tpu.matmul %0, %1, %cst {dimension_numbers = #tpu.dot_dimension_numbers<[1], [0], [0], [1], [0, 0, 1, 1], [], []>} : vector<256x18xbf16>, vector<18x128xbf16>, vector<256x128xf32> -> vector<256x128xf32>
    %c0_3 = arith.constant 0 : index
    %c0_4 = arith.constant 0 : index
    %3 = vector.load %arg3[%c0_3, %c0_4] : memref<1x128xf32, #tpu.memory_space<vmem>>, vector<1x128xf32>
    %4 = vector.broadcast %3 : vector<1x128xf32> to vector<256x128xf32>
    %5 = arith.addf %2, %4 : vector<256x128xf32>
    %6 = math.tanh %5 : vector<256x128xf32>
    %c0_5 = arith.constant 0 : index
    %c0_6 = arith.constant 0 : index
    %7 = vector.load %arg4[%c0_5, %c0_6] : memref<256x128xf32, #tpu.memory_space<vmem>>, vector<256x128xf32>
    tpu.vector_store %arg4[%c0_5, %c0_6], %6 {strides = array<i32>} : memref<256x128xf32, #tpu.memory_space<vmem>>, vector<256x128xf32>,
    return
  }
  func.func @transform_0(%arg0: i32) -> (i32, i32) {
    %c0_i32 = arith.constant 0 : i32
    %c0_i32_0 = arith.constant 0 : i32
    return %arg0, %c0_i32 : i32, i32
  }
  func.func @transform_1(%arg0: i32) -> (i32, i32) {
    %c0_i32 = arith.constant 0 : i32
    %c0_i32_0 = arith.constant 0 : i32
    %c0_i32_1 = arith.constant 0 : i32
    return %c0_i32, %c0_i32_0 : i32, i32
  }
  func.func @transform_2(%arg0: i32) -> (i32, i32) {
    %c0_i32 = arith.constant 0 : i32
    %c0_i32_0 = arith.constant 0 : i32
    %c0_i32_1 = arith.constant 0 : i32
    return %c0_i32, %c0_i32_0 : i32, i32
  }
  func.func @transform_3(%arg0: i32) -> (i32, i32) {
    %c0_i32 = arith.constant 0 : i32
    %c0_i32_0 = arith.constant 0 : i32
    return %arg0, %c0_i32 : i32, i32
  }
}

</mosaic_0001>

<bundles_post_ra>
// kernel: tile.55
= control target key start
LH: loop header
LB: loop body
LE: loop exit
PB: predicated region body
PF: predicated region fallthrough
CT: control target
= control target key end

     0   :  { %vm8_vm0 = vcmask 261120   ;;  %s40_s8 = smov 32   ;;  %s41_s9 = smov 64   ;;  %vm14_vm1 = vcmask 1048320   ;;  %vm20_vm2 = vcmask 785920   ;;  %vm26_vm3 = vcmask 523520   ;;  %s58_s0 = inlined_call_operand.vmem [shape: f32[4,32], index: 0, kind: input, shape index: {}]   ;;  %s59_s1 = inlined_call_operand.vmem [shape: f32[1,128], index: 1, kind: output, shape index: {}]  }
   0x1   :  { %v5_v0 = vld [vmem:[%s58_s0] sm:$0xf]  ;;  %s39_s0 = smov 96  }
   0x2   :  { %6 = vst [vmem:[#allocation1] sm:$0xf] %v5_v0 }
   0x9   :  { %v11_v1 = vld [vmem:[#allocation1 + $0x3] sm:$0x1]   ;;  %v23_v2 = vld [vmem:[#allocation1 + $0x1] sm:$0x1]   ;;  %v7_v3 = vld [vmem:[#allocation1] sm:$0x1]  }
   0xa   :  { %12 = vrot.lane.b32.xlu0 %v11_v1, %s39_s0  ;;  %24 = vrot.lane.b32.xlu1 %v23_v2, %s40_s8  ;;  %v17_v4 = vld [vmem:[#allocation1 + $0x2] sm:$0x1]   ;;  %9 = vst.msk [vmem:[#allocation0] sm:$0x1] %vm8_vm0, %v7_v3  }
   0xe   :  { %18 = vrot.lane.b32.xlu0 %v17_v4, %s41_s9 }
  0x7c   :  { %v13_v5 = vpop.permute.xlu0 %12   ;;  %v25_v6 = vpop.permute.xlu1 %24  }
  0x7d   :  { %15 = vst.msk [vmem:[#allocation0] sm:$0x1] %vm14_vm1, %v13_v5  }
  0x80   :  { %v19_v7 = vpop.permute.xlu0 %18  }
  0x81   :  { %21 = vst.msk [vmem:[#allocation0] sm:$0x1] %vm20_vm2, %v19_v7  }
  0x82   :  { %27 = vst.msk [vmem:[#allocation0] sm:$0x1] %vm26_vm3, %v25_v6  }
  0x89   :  { %v32_v8 = vld [vmem:[#allocation0] sm:$0x1] }
  0x8a   :  { %35 = vst [vmem:[%s59_s1] sm:$0x1] %v32_v8 }

// kernel: tile.54
= control target key start
LH: loop header
LB: loop body
LE: loop exit
PB: predicated region body
PF: predicated region fallthrough
CT: control target
= control target key end

     0   :  { %s22_s0 = inlined_call_operand.vmem [shape: f32[32], index: 0, kind: input, shape index: {}]   ;;  %s23_s1 = inlined_call_operand.vmem [shape: f32[4,32], index: 1, kind: output, shape index: {}]  }
   0x1   :  { %v4_v0 = vld [vmem:[%s22_s0] ss:$0 sm:$0xff] }
   0x2   :  { %5 = vst [vmem:[%s23_s1] sm:$0xf] %v4_v0 }

// kernel: tile.62
= control target key start
LH: loop header
LB: loop body
LE: loop exit
PB: predicated region body
PF: predicated region fallthrough
CT: control target
= control target key end

     0   :  { %s22_s0 = inlined_call_operand.vmem [shape: f32[16], index: 0, kind: input, shape index: {}]   ;;  %s23_s1 = inlined_call_operand.vmem [shape: f32[4,16], index: 1, kind: output, shape index: {}]  }
   0x1   :  { %v4_v0 = vld [vmem:[%s22_s0] ss:$0 sm:$0xff] }
   0x2   :  { %5 = vst [vmem:[%s23_s1] sm:$0xf] %v4_v0 }

// kernel: tile.78
= control target key start
LH: loop header
LB: loop body
LE: loop exit
PB: predicated region body
PF: predicated region fallthrough
CT: control target
= control target key end

     0   :  { %s22_s0 = inlined_call_operand.vmem [shape: f32[8], index: 0, kind: input, shape index: {}]   ;;  %s23_s1 = inlined_call_operand.vmem [shape: f32[4,8], index: 1, kind: output, shape index: {}]  }
   0x1   :  { %v4_v0 = vld [vmem:[%s22_s0] ss:$0 sm:$0xff] }
   0x2   :  { %5 = vst [vmem:[%s23_s1] sm:$0xf] %v4_v0 }

// kernel: tile.63
= control target key start
LH: loop header
LB: loop body
LE: loop exit
PB: predicated region body
PF: predicated region fallthrough
CT: control target
= control target key end

     0   :  { %vm8_vm0 = vcmask 130048   ;;  %s40_s8 = smov 16   ;;  %s41_s9 = smov 32   ;;  %vm14_vm1 = vcmask 523648   ;;  %vm20_vm2 = vcmask 392448   ;;  %vm26_vm3 = vcmask 261248   ;;  %s58_s0 = inlined_call_operand.vmem [shape: f32[4,16], index: 0, kind: input, shape index: {}]   ;;  %s59_s1 = inlined_call_operand.vmem [shape: f32[64], index: 1, kind: output, shape index: {}]  }
   0x1   :  { %v5_v0 = vld [vmem:[%s58_s0] sm:$0xf]  ;;  %s39_s0 = smov 48  }
   0x2   :  { %6 = vst [vmem:[#allocation1] sm:$0xf] %v5_v0 }
   0x9   :  { %v11_v1 = vld [vmem:[#allocation1 + $0x3] sm:$0x1]   ;;  %v23_v2 = vld [vmem:[#allocation1 + $0x1] sm:$0x1]   ;;  %v7_v3 = vld [vmem:[#allocation1] sm:$0x1]  }
   0xa   :  { %12 = vrot.lane.b32.xlu0 %v11_v1, %s39_s0  ;;  %24 = vrot.lane.b32.xlu1 %v23_v2, %s40_s8  ;;  %v17_v4 = vld [vmem:[#allocation1 + $0x2] sm:$0x1]   ;;  %9 = vst.msk [vmem:[#allocation0] sm:$0x1] %vm8_vm0, %v7_v3  }
   0xe   :  { %18 = vrot.lane.b32.xlu0 %v17_v4, %s41_s9 }
  0x7c   :  { %v13_v5 = vpop.permute.xlu0 %12   ;;  %v25_v6 = vpop.permute.xlu1 %24  }
  0x7d   :  { %15 = vst.msk [vmem:[#allocation0] sm:$0x1] %vm14_vm1, %v13_v5  }
  0x80   :  { %v19_v7 = vpop.permute.xlu0 %18  }
  0x81   :  { %21 = vst.msk [vmem:[#allocation0] sm:$0x1] %vm20_vm2, %v19_v7  }
  0x82   :  { %27 = vst.msk [vmem:[#allocation0] sm:$0x1] %vm26_vm3, %v25_v6  }
  0x89   :  { %v32_v8 = vld [vmem:[#allocation0] sm:$0x1] }
  0x8a   :  { %35 = vst [vmem:[%s59_s1] sm:$0x1] %v32_v8 }

// kernel: tile.94
= control target key start
LH: loop header
LB: loop body
LE: loop exit
PB: predicated region body
PF: predicated region fallthrough
CT: control target
= control target key end

     0   :  { %s22_s0 = inlined_call_operand.vmem [shape: f32[4], index: 0, kind: input, shape index: {}]   ;;  %s23_s1 = inlined_call_operand.vmem [shape: f32[4,4], index: 1, kind: output, shape index: {}]  }
   0x1   :  { %v4_v0 = vld [vmem:[%s22_s0] ss:$0 sm:$0xff] }
   0x2   :  { %5 = vst [vmem:[%s23_s1] sm:$0xf] %v4_v0 }

// kernel: tile.79
= control target key start
LH: loop header
LB: loop body
LE: loop exit
PB: predicated region body
PF: predicated region fallthrough
CT: control target
= control target key end

     0   :  { %vm8_vm0 = vcmask 64512   ;;  %s40_s8 = smov 8   ;;  %s41_s9 = smov 16   ;;  %vm14_vm1 = vcmask 261312   ;;  %vm20_vm2 = vcmask 195712   ;;  %vm26_vm3 = vcmask 130112   ;;  %s58_s0 = inlined_call_operand.vmem [shape: f32[4,8], index: 0, kind: input, shape index: {}]   ;;  %s59_s1 = inlined_call_operand.vmem [shape: f32[32], index: 1, kind: output, shape index: {}]  }
   0x1   :  { %v5_v0 = vld [vmem:[%s58_s0] sm:$0xf]  ;;  %s39_s0 = smov 24  }
   0x2   :  { %6 = vst [vmem:[#allocation1] sm:$0xf] %v5_v0 }
   0x9   :  { %v11_v1 = vld [vmem:[#allocation1 + $0x3] sm:$0x1]   ;;  %v23_v2 = vld [vmem:[#allocation1 + $0x1] sm:$0x1]   ;;  %v7_v3 = vld [vmem:[#allocation1] sm:$0x1]  }
   0xa   :  { %12 = vrot.lane.b32.xlu0 %v11_v1, %s39_s0  ;;  %24 = vrot.lane.b32.xlu1 %v23_v2, %s40_s8  ;;  %v17_v4 = vld [vmem:[#allocation1 + $0x2] sm:$0x1]   ;;  %9 = vst.msk [vmem:[#allocation0] sm:$0x1] %vm8_vm0, %v7_v3  }
   0xe   :  { %18 = vrot.lane.b32.xlu0 %v17_v4, %s41_s9 }
  0x7c   :  { %v13_v5 = vpop.permute.xlu0 %12   ;;  %v25_v6 = vpop.permute.xlu1 %24  }
  0x7d   :  { %15 = vst.msk [vmem:[#allocation0] sm:$0x1] %vm14_vm1, %v13_v5  }
  0x80   :  { %v19_v7 = vpop.permute.xlu0 %18  }
  0x81   :  { %21 = vst.msk [vmem:[#allocation0] sm:$0x1] %vm20_vm2, %v19_v7  }
  0x82   :  { %27 = vst.msk [vmem:[#allocation0] sm:$0x1] %vm26_vm3, %v25_v6  }
  0x89   :  { %v32_v8 = vld [vmem:[#allocation0] sm:$0x1] }
  0x8a   :  { %35 = vst [vmem:[%s59_s1] sm:$0x1] %v32_v8 }

// kernel: tile.95
= control target key start
LH: loop header
LB: loop body
LE: loop exit
PB: predicated region body
PF: predicated region fallthrough
CT: control target
= control target key end

     0   :  { %vm8_vm0 = vcmask 31744   ;;  %s40_s8 = smov 4   ;;  %s41_s9 = smov 8   ;;  %vm14_vm1 = vcmask 130144   ;;  %vm20_vm2 = vcmask 97344   ;;  %vm26_vm3 = vcmask 64544   ;;  %s58_s0 = inlined_call_operand.vmem [shape: f32[4,4], index: 0, kind: input, shape index: {}]   ;;  %s59_s1 = inlined_call_operand.vmem [shape: f32[16], index: 1, kind: output, shape index: {}]  }
   0x1   :  { %v5_v0 = vld [vmem:[%s58_s0] sm:$0xf]  ;;  %s39_s0 = smov 12  }
   0x2   :  { %6 = vst [vmem:[#allocation1] sm:$0xf] %v5_v0 }
   0x9   :  { %v11_v1 = vld [vmem:[#allocation1 + $0x3] sm:$0x1]   ;;  %v23_v2 = vld [vmem:[#allocation1 + $0x1] sm:$0x1]   ;;  %v7_v3 = vld [vmem:[#allocation1] sm:$0x1]  }
   0xa   :  { %12 = vrot.lane.b32.xlu0 %v11_v1, %s39_s0  ;;  %24 = vrot.lane.b32.xlu1 %v23_v2, %s40_s8  ;;  %v17_v4 = vld [vmem:[#allocation1 + $0x2] sm:$0x1]   ;;  %9 = vst.msk [vmem:[#allocation0] sm:$0x1] %vm8_vm0, %v7_v3  }
   0xe   :  { %18 = vrot.lane.b32.xlu0 %v17_v4, %s41_s9 }
  0x7c   :  { %v13_v5 = vpop.permute.xlu0 %12   ;;  %v25_v6 = vpop.permute.xlu1 %24  }
  0x7d   :  { %15 = vst.msk [vmem:[#allocation0] sm:$0x1] %vm14_vm1, %v13_v5  }
  0x80   :  { %v19_v7 = vpop.permute.xlu0 %18  }
  0x81   :  { %21 = vst.msk [vmem:[#allocation0] sm:$0x1] %vm20_vm2, %v19_v7  }
  0x82   :  { %27 = vst.msk [vmem:[#allocation0] sm:$0x1] %vm26_vm3, %v25_v6  }
  0x89   :  { %v32_v8 = vld [vmem:[#allocation0] sm:$0x1] }
  0x8a   :  { %35 = vst [vmem:[%s59_s1] sm:$0x1] %v32_v8 }

// kernel: _lambda_.18
= control target key start
LH: loop header
LB: loop body
LE: loop exit
PB: predicated region body
PF: predicated region fallthrough
CT: control target
= control target key end

     0   :  { %vm123_vm0 = vcmask 1041408   ;;  %vm98_vm1 = vcmask 293888   ;;  %s619_s1 = inlined_call_operand.vmem [shape: bf16[36,128], index: 1, kind: input, shape index: {}]   ;;  %s620_s0 = inlined_call_operand.vmem [shape: bf16[128,36], index: 0, kind: input, shape index: {}]   ;;  %s621_s2 = inlined_call_operand.vmem [shape: f32[1,128], index: 2, kind: input, shape index: {}]   ;;  %s622_s3 = inlined_call_operand.vmem [shape: bf16[128,128], index: 3, kind: output, shape index: {}]  }
   0x1   :  { %v496_v0 = vld [vmem:[%s619_s1 + $0x10] ss:$0 sps:$4 sm:$0x33]   ;;  %v497_v1 = vld [vmem:[%s619_s1 + $0x8] sm:$0xff]   ;;  %v498_v3 = vld [vmem:[%s619_s1] sm:$0xff]  }
   0x2   :  { %494 = vmatprep.subr.msk.bf16.mxu0 %vm123_vm0, %v496_v0  ;;  %495 = vmatprep.subr.msk.bf16.mxu1 %vm123_vm0, %v496_v0  ;;  %v125_v2 = vsel %vm123_vm0, %v496_v0, 0  ;;  %v499_v4 = vld [vmem:[%s620_s0] sm:$0xff]   ;;  %v501_v6 = vld [vmem:[%s620_s0 + $0x8] sm:$0xff]   ;;  %v503_v8 = vld [vmem:[%s620_s0 + $0x10] sm:$0xff]  }
   0x3   :  { %467 = vmatpush3.bf16.msra.mxu0 %v125_v2  ;;  %491 = vmatpush3.bf16.msra.mxu1 %v125_v2  ;;  %v500_v5 = vld [vmem:[%s620_s0 + $0x20] sm:$0xff]   ;;  %v502_v7 = vld [vmem:[%s620_s0 + $0x28] sm:$0xff]   ;;  %v504_v9 = vld [vmem:[%s620_s0 + $0x30] sm:$0xff]  }
   0x4   :  { %468 = vmatprep.subr.bf16.mxu0 %v497_v1  ;;  %489 = vmatprep.subr.bf16.mxu1 %v497_v1  ;;  %v505_v10 = vld [vmem:[%s620_s0 + $0x18] sm:$0xff]   ;;  %v571_v12 = vld [vmem:[%s621_s2] ss:$0 sm:$0xff] }
   0x5   :  { %472 = vmatprep.mubr.msk.bf16.mxu0 %vm98_vm1, %v499_v4  ;;  %480 = vmatprep.mubr.msk.bf16.mxu1 %vm98_vm1, %v500_v5  ;;  %v506_v11 = vld [vmem:[%s620_s0 + $0x38] sm:$0xff]  }
   0x7   :  { %469 = vmatpush3.bf16.msra.mxu0 %v497_v1  ;;  %492 = vmatpush3.bf16.msra.mxu1 %v497_v1 }
   0x8   :  { %470 = vmatprep.subr.bf16.mxu0 %v498_v3  ;;  %490 = vmatprep.subr.bf16.mxu1 %v498_v3 }
   0xb   :  { %471 = vmatpush3.bf16.msra.mxu0 %v498_v3  ;;  %493 = vmatpush3.bf16.msra.mxu1 %v498_v3 }
   0xe   :  { %473 = vmatmul.mubr.msk.bf16.vlgmr.msra.gmra.mxu0 %vm98_vm1, %v501_v6  ;;  %481 = vmatmul.mubr.msk.bf16.vlgmr.msra.gmra.mxu1 %vm98_vm1, %v502_v7 }
   0xf   :  { %476 = vmatprep.mubr.msk.bf16.mxu0 %vm98_vm1, %v503_v8  ;;  %484 = vmatprep.mubr.msk.bf16.mxu1 %vm98_vm1, %v504_v9 }
  0x16   :  { %477 = vmatmul.mubr.msk.bf16.gmra.mxu0 %vm98_vm1, %v505_v10  ;;  %485 = vmatmul.mubr.msk.bf16.gmra.mxu1 %vm98_vm1, %v506_v11 }
  0xce   :  { %v474_v13 = vpop.f32.mrf.mxu0  ;;  %v482_v14 = vpop.f32.mrf.mxu1 }
  0xcf   :  { %v170_v15 = vadd.f32 %v474_v13, %v571_v12  ;;  %v202_v16 = vadd.f32 %v482_v14, %v571_v12 }
  0xd0   :  { %v161_v17 = vpop.f32.mrf.mxu0  ;;  %v193_v18 = vpop.f32.mrf.mxu1 }
  0xd1   :  { %vm226_vm2 = vcmp.gt.f32.partialorder %v170_v15, 0.0  ;;  %v242_v19 = vmul.f32 0.2, %v170_v15  ;;  %vm234_vm3 = vcmp.gt.f32.partialorder %v202_v16, 0.0  ;;  %v250_v20 = vmul.f32 0.2, %v202_v16 }
  0xd2   :  { %v162_v21 = vadd.f32 %v571_v12, %v161_v17  ;;  %v194_v22 = vadd.f32 %v571_v12, %v193_v18  ;;  %v475_v23 = vpop.f32.mrf.mxu0  ;;  %v483_v24 = vpop.f32.mrf.mxu1 }
  0xd3   :  { %v173_v25 = vadd.f32 %v475_v23, %v571_v12  ;;  %v205_v26 = vadd.f32 %v483_v24, %v571_v12  ;;  %v258_v27 = vsel %vm226_vm2, %v170_v15, %v242_v19  ;;  %v266_v28 = vsel %vm234_vm3, %v202_v16, %v250_v20 }
  0xd4   :  { %vm224_vm4 = vcmp.gt.f32.partialorder %v162_v21, 0.0  ;;  %v240_v29 = vmul.f32 0.2, %v162_v21  ;;  %v164_v30 = vpop.f32.mrf.mxu0  ;;  %v196_v31 = vpop.f32.mrf.mxu1  ;;  %vm232_vm7 = vcmp.gt.f32.partialorder %v194_v22, 0.0  ;;  %v248_v34 = vmul.f32 0.2, %v194_v22 }
  0xd5   :  { %vm227_vm5 = vcmp.gt.f32.partialorder %v173_v25, 0.0  ;;  %v243_v32 = vmul.f32 0.2, %v173_v25  ;;  %vm235_vm6 = vcmp.gt.f32.partialorder %v205_v26, 0.0  ;;  %v251_v33 = vmul.f32 0.2, %v205_v26 }
  0xd6   :  { %v165_v35 = vadd.f32 %v571_v12, %v164_v30  ;;  %v197_v36 = vadd.f32 %v571_v12, %v196_v31  ;;  %v478_v37 = vpop.f32.mrf.mxu0  ;;  %v486_v38 = vpop.f32.mrf.mxu1  ;;  %v256_v49 = vsel %vm224_vm4, %v162_v21, %v240_v29  ;;  %v264_v54 = vsel %vm232_vm7, %v194_v22, %v248_v34 }
  0xd7   :  { %v259_v39 = vsel %vm227_vm5, %v173_v25, %v243_v32  ;;  %v267_v40 = vsel %vm235_vm6, %v205_v26, %v251_v33  ;;  %v186_v41 = vadd.f32 %v478_v37, %v571_v12  ;;  %v218_v42 = vadd.f32 %v486_v38, %v571_v12 }
  0xd8   :  { %v416_v43 = vpack.c.bf16 %v259_v39, %v258_v27  ;;  %v436_v44 = vpack.c.bf16 %v267_v40, %v266_v28  ;;  %vm225_vm8 = vcmp.gt.f32.partialorder %v165_v35, 0.0  ;;  %v241_v45 = vmul.f32 0.2, %v165_v35  ;;  %v177_v46 = vpop.f32.mrf.mxu0  ;;  %v209_v47 = vpop.f32.mrf.mxu1 }
  0xd9   :  { %vm233_vm9 = vcmp.gt.f32.partialorder %v197_v36, 0.0  ;;  %v249_v48 = vmul.f32 0.2, %v197_v36  ;;  %v178_v51 = vadd.f32 %v571_v12, %v177_v46  ;;  %v210_v57 = vadd.f32 %v571_v12, %v209_v47 }
  0xda   :  { %448 = vst [vmem:[%s622_s3 + $0x8] sm:$0xff] %v416_v43   ;;  %452 = vst [vmem:[%s622_s3 + $0x28] sm:$0xff] %v436_v44   ;;  %v257_v50 = vsel %vm225_vm8, %v165_v35, %v241_v45  ;;  %v479_v52 = vpop.f32.mrf.mxu0  ;;  %v487_v53 = vpop.f32.mrf.mxu1  ;;  %vm230_vm10 = vcmp.gt.f32.partialorder %v186_v41, 0.0  ;;  %v246_v59 = vmul.f32 0.2, %v186_v41  ;;  %vm238_vm11 = vcmp.gt.f32.partialorder %v218_v42, 0.0 }
  0xdb   :  { %v411_v55 = vpack.c.bf16 %v257_v50, %v256_v49  ;;  %v265_v56 = vsel %vm233_vm9, %v197_v36, %v249_v48  ;;  %v254_v62 = vmul.f32 0.2, %v218_v42  ;;  %vm228_vm12 = vcmp.gt.f32.partialorder %v178_v51, 0.0 }
  0xdc   :  { %v431_v58 = vpack.c.bf16 %v265_v56, %v264_v54  ;;  %v180_v60 = vpop.f32.mrf.mxu0  ;;  %v212_v61 = vpop.f32.mrf.mxu1  ;;  %v189_v63 = vadd.f32 %v479_v52, %v571_v12  ;;  %v221_v0 = vadd.f32 %v487_v53, %v571_v12  ;;  %v244_v1 = vmul.f32 0.2, %v178_v51 }
  0xdd   :  { %412 = vst [vmem:[%s622_s3] sm:$0xff] %v411_v55   ;;  %vm236_vm13 = vcmp.gt.f32.partialorder %v210_v57, 0.0  ;;  %v181_v2 = vadd.f32 %v571_v12, %v180_v60  ;;  %v213_v3 = vadd.f32 %v571_v12, %v212_v61  ;;  %v252_v4 = vmul.f32 0.2, %v210_v57 }
  0xde   :  { %451 = vst [vmem:[%s622_s3 + $0x20] sm:$0xff] %v431_v58   ;;  %vm231_vm14 = vcmp.gt.f32.partialorder %v189_v63, 0.0  ;;  %v247_v5 = vmul.f32 0.2, %v189_v63  ;;  %vm239_vm15 = vcmp.gt.f32.partialorder %v221_v0, 0.0  ;;  %v262_v8 = vsel %vm230_vm10, %v186_v41, %v246_v59 }
  0xdf   :  { %v255_v6 = vmul.f32 0.2, %v221_v0  ;;  %vm229_vm0 = vcmp.gt.f32.partialorder %v181_v2, 0.0  ;;  %v245_v7 = vmul.f32 0.2, %v181_v2  ;;  %vm237_vm1 = vcmp.gt.f32.partialorder %v213_v3, 0.0 }
  0xe0   :  { %v270_v9 = vsel %vm238_vm11, %v218_v42, %v254_v62  ;;  %v263_v10 = vsel %vm231_vm14, %v189_v63, %v247_v5  ;;  %v253_v11 = vmul.f32 0.2, %v213_v3  ;;  %v260_v13 = vsel %vm228_vm12, %v178_v51, %v244_v1 }
  0xe1   :  { %v426_v14 = vpack.c.bf16 %v263_v10, %v262_v8  ;;  %v271_v15 = vsel %vm239_vm15, %v221_v0, %v255_v6  ;;  %v261_v16 = vsel %vm229_vm0, %v181_v2, %v245_v7  ;;  %v268_v12 = vsel %vm236_vm13, %v210_v57, %v252_v4 }
  0xe2   :  { %v446_v17 = vpack.c.bf16 %v271_v15, %v270_v9  ;;  %v421_v18 = vpack.c.bf16 %v261_v16, %v260_v13  ;;  %v269_v19 = vsel %vm237_vm1, %v213_v3, %v253_v11 }
  0xe3   :  { %450 = vst [vmem:[%s622_s3 + $0x18] sm:$0xff] %v426_v14   ;;  %v441_v20 = vpack.c.bf16 %v269_v19, %v268_v12 }
  0xe4   :  { %454 = vst [vmem:[%s622_s3 + $0x38] sm:$0xff] %v446_v17   ;;  %449 = vst [vmem:[%s622_s3 + $0x10] sm:$0xff] %v421_v18  }
  0xe5   :  { %453 = vst [vmem:[%s622_s3 + $0x30] sm:$0xff] %v441_v20  }

// kernel: _lambda_.19
= control target key start
LH: loop header
LB: loop body
LE: loop exit
PB: predicated region body
PF: predicated region fallthrough
CT: control target
= control target key end

     0   :  { %vm139_vm0 = vcmask 1043456   ;;  %vm114_vm1 = vcmask 588800   ;;  %s655_s1 = inlined_call_operand.vmem [shape: bf16[72,128], index: 1, kind: input, shape index: {}]   ;;  %s656_s0 = inlined_call_operand.vmem [shape: bf16[128,72], index: 0, kind: input, shape index: {}]   ;;  %s657_s2 = inlined_call_operand.vmem [shape: f32[1,128], index: 2, kind: input, shape index: {}]   ;;  %s658_s3 = inlined_call_operand.vmem [shape: bf16[128,128], index: 3, kind: output, shape index: {}]  }
   0x1   :  { %v524_v0 = vld [vmem:[%s655_s1 + $0x20] ss:$0 sps:$4 sm:$0xff]   ;;  %v525_v1 = vld [vmem:[%s655_s1 + $0x18] sm:$0xff]   ;;  %v526_v3 = vld [vmem:[%s655_s1 + $0x10] sm:$0xff]  }
   0x2   :  { %522 = vmatprep.subr.msk.bf16.mxu0 %vm139_vm0, %v524_v0  ;;  %523 = vmatprep.subr.msk.bf16.mxu1 %vm139_vm0, %v524_v0  ;;  %v141_v2 = vsel %vm139_vm0, %v524_v0, 0  ;;  %v529_v4 = vld [vmem:[%s656_s0] sm:$0xff]   ;;  %v527_v6 = vld [vmem:[%s655_s1 + $0x8] sm:$0xff]   ;;  %v533_v10 = vld [vmem:[%s656_s0 + $0x10] sm:$0xff]  }
   0x3   :  { %487 = vmatpush3.bf16.msra.mxu0 %v141_v2  ;;  %517 = vmatpush3.bf16.msra.mxu1 %v141_v2  ;;  %v530_v5 = vld [vmem:[%s656_s0 + $0x20] sm:$0xff]   ;;  %v531_v8 = vld [vmem:[%s656_s0 + $0x8] sm:$0xff]   ;;  %v534_v11 = vld [vmem:[%s656_s0 + $0x30] sm:$0xff]  }
   0x4   :  { %488 = vmatprep.subr.bf16.mxu0 %v525_v1  ;;  %513 = vmatprep.subr.bf16.mxu1 %v525_v1  ;;  %v528_v7 = vld [vmem:[%s655_s1] sm:$0xff]   ;;  %v532_v9 = vld [vmem:[%s656_s0 + $0x28] sm:$0xff]   ;;  %v535_v12 = vld [vmem:[%s656_s0 + $0x18] sm:$0xff]  }
   0x5   :  { %496 = vmatprep.mubr.msk.bf16.mxu0 %vm114_vm1, %v529_v4  ;;  %504 = vmatprep.mubr.msk.bf16.mxu1 %vm114_vm1, %v530_v5  ;;  %v536_v13 = vld [vmem:[%s656_s0 + $0x38] sm:$0xff]   ;;  %v607_v14 = vld [vmem:[%s657_s2] ss:$0 sm:$0xff] }
   0x7   :  { %489 = vmatpush3.bf16.msra.mxu0 %v525_v1  ;;  %518 = vmatpush3.bf16.msra.mxu1 %v525_v1 }
   0x8   :  { %490 = vmatprep.subr.bf16.mxu0 %v526_v3  ;;  %514 = vmatprep.subr.bf16.mxu1 %v526_v3 }
   0xb   :  { %491 = vmatpush3.bf16.msra.mxu0 %v526_v3  ;;  %519 = vmatpush3.bf16.msra.mxu1 %v526_v3 }
   0xc   :  { %492 = vmatprep.subr.bf16.mxu0 %v527_v6  ;;  %515 = vmatprep.subr.bf16.mxu1 %v527_v6 }
   0xf   :  { %493 = vmatpush3.bf16.msra.mxu0 %v527_v6  ;;  %520 = vmatpush3.bf16.msra.mxu1 %v527_v6 }
  0x10   :  { %494 = vmatprep.subr.bf16.mxu0 %v528_v7  ;;  %516 = vmatprep.subr.bf16.mxu1 %v528_v7 }
  0x13   :  { %495 = vmatpush3.bf16.msra.mxu0 %v528_v7  ;;  %521 = vmatpush3.bf16.msra.mxu1 %v528_v7 }
  0x16   :  { %497 = vmatmul.mubr.msk.bf16.vlgmr.msra.gmra.mxu0 %vm114_vm1, %v531_v8  ;;  %505 = vmatmul.mubr.msk.bf16.vlgmr.msra.gmra.mxu1 %vm114_vm1, %v532_v9 }
  0x17   :  { %500 = vmatprep.mubr.msk.bf16.mxu0 %vm114_vm1, %v533_v10  ;;  %508 = vmatprep.mubr.msk.bf16.mxu1 %vm114_vm1, %v534_v11 }
  0x1e   :  { %501 = vmatmul.mubr.msk.bf16.gmra.mxu0 %vm114_vm1, %v535_v12  ;;  %509 = vmatmul.mubr.msk.bf16.gmra.mxu1 %vm114_vm1, %v536_v13 }
  0xd6   :  { %v498_v15 = vpop.f32.mrf.mxu0  ;;  %v506_v16 = vpop.f32.mrf.mxu1 }
  0xd7   :  { %v186_v17 = vadd.f32 %v498_v15, %v607_v14  ;;  %v218_v18 = vadd.f32 %v506_v16, %v607_v14 }
  0xd8   :  { %v177_v19 = vpop.f32.mrf.mxu0  ;;  %v209_v20 = vpop.f32.mrf.mxu1 }
  0xd9   :  { %vm242_vm2 = vcmp.gt.f32.partialorder %v186_v17, 0.0  ;;  %v258_v21 = vmul.f32 0.2, %v186_v17  ;;  %vm250_vm3 = vcmp.gt.f32.partialorder %v218_v18, 0.0  ;;  %v266_v22 = vmul.f32 0.2, %v218_v18 }
  0xda   :  { %v178_v23 = vadd.f32 %v607_v14, %v177_v19  ;;  %v210_v24 = vadd.f32 %v607_v14, %v209_v20  ;;  %v499_v25 = vpop.f32.mrf.mxu0  ;;  %v507_v26 = vpop.f32.mrf.mxu1 }
  0xdb   :  { %v189_v27 = vadd.f32 %v499_v25, %v607_v14  ;;  %v221_v28 = vadd.f32 %v507_v26, %v607_v14  ;;  %v274_v29 = vsel %vm242_vm2, %v186_v17, %v258_v21  ;;  %v282_v30 = vsel %vm250_vm3, %v218_v18, %v266_v22 }
  0xdc   :  { %vm240_vm4 = vcmp.gt.f32.partialorder %v178_v23, 0.0  ;;  %v256_v31 = vmul.f32 0.2, %v178_v23  ;;  %v180_v32 = vpop.f32.mrf.mxu0  ;;  %v212_v33 = vpop.f32.mrf.mxu1  ;;  %vm248_vm7 = vcmp.gt.f32.partialorder %v210_v24, 0.0  ;;  %v264_v36 = vmul.f32 0.2, %v210_v24 }
  0xdd   :  { %vm243_vm5 = vcmp.gt.f32.partialorder %v189_v27, 0.0  ;;  %v259_v34 = vmul.f32 0.2, %v189_v27  ;;  %vm251_vm6 = vcmp.gt.f32.partialorder %v221_v28, 0.0  ;;  %v267_v35 = vmul.f32 0.2, %v221_v28 }
  0xde   :  { %v181_v37 = vadd.f32 %v607_v14, %v180_v32  ;;  %v213_v38 = vadd.f32 %v607_v14, %v212_v33  ;;  %v502_v39 = vpop.f32.mrf.mxu0  ;;  %v510_v40 = vpop.f32.mrf.mxu1  ;;  %v272_v51 = vsel %vm240_vm4, %v178_v23, %v256_v31  ;;  %v280_v56 = vsel %vm248_vm7, %v210_v24, %v264_v36 }
  0xdf   :  { %v275_v41 = vsel %vm243_vm5, %v189_v27, %v259_v34  ;;  %v283_v42 = vsel %vm251_vm6, %v221_v28, %v267_v35  ;;  %v202_v43 = vadd.f32 %v502_v39, %v607_v14  ;;  %v234_v44 = vadd.f32 %v510_v40, %v607_v14 }
  0xe0   :  { %v434_v45 = vpack.c.bf16 %v275_v41, %v274_v29  ;;  %v454_v46 = vpack.c.bf16 %v283_v42, %v282_v30  ;;  %vm241_vm8 = vcmp.gt.f32.partialorder %v181_v37, 0.0  ;;  %v257_v47 = vmul.f32 0.2, %v181_v37  ;;  %v193_v48 = vpop.f32.mrf.mxu0  ;;  %v225_v49 = vpop.f32.mrf.mxu1 }
  0xe1   :  { %vm249_vm9 = vcmp.gt.f32.partialorder %v213_v38, 0.0  ;;  %v265_v50 = vmul.f32 0.2, %v213_v38  ;;  %v194_v53 = vadd.f32 %v607_v14, %v193_v48  ;;  %v226_v59 = vadd.f32 %v607_v14, %v225_v49 }
  0xe2   :  { %466 = vst [vmem:[%s658_s3 + $0x8] sm:$0xff] %v434_v45   ;;  %470 = vst [vmem:[%s658_s3 + $0x28] sm:$0xff] %v454_v46   ;;  %v273_v52 = vsel %vm241_vm8, %v181_v37, %v257_v47  ;;  %v503_v54 = vpop.f32.mrf.mxu0  ;;  %v511_v55 = vpop.f32.mrf.mxu1  ;;  %vm246_vm10 = vcmp.gt.f32.partialorder %v202_v43, 0.0  ;;  %v262_v61 = vmul.f32 0.2, %v202_v43  ;;  %vm254_vm11 = vcmp.gt.f32.partialorder %v234_v44, 0.0 }
  0xe3   :  { %v429_v57 = vpack.c.bf16 %v273_v52, %v272_v51  ;;  %v281_v58 = vsel %vm249_vm9, %v213_v38, %v265_v50  ;;  %v270_v0 = vmul.f32 0.2, %v234_v44  ;;  %vm244_vm12 = vcmp.gt.f32.partialorder %v194_v53, 0.0 }
  0xe4   :  { %v449_v60 = vpack.c.bf16 %v281_v58, %v280_v56  ;;  %v196_v62 = vpop.f32.mrf.mxu0  ;;  %v228_v63 = vpop.f32.mrf.mxu1  ;;  %v205_v1 = vadd.f32 %v503_v54, %v607_v14  ;;  %v237_v2 = vadd.f32 %v511_v55, %v607_v14  ;;  %v260_v3 = vmul.f32 0.2, %v194_v53 }
  0xe5   :  { %430 = vst [vmem:[%s658_s3] sm:$0xff] %v429_v57   ;;  %vm252_vm13 = vcmp.gt.f32.partialorder %v226_v59, 0.0  ;;  %v197_v4 = vadd.f32 %v607_v14, %v196_v62  ;;  %v229_v5 = vadd.f32 %v607_v14, %v228_v63  ;;  %v268_v6 = vmul.f32 0.2, %v226_v59 }
  0xe6   :  { %469 = vst [vmem:[%s658_s3 + $0x20] sm:$0xff] %v449_v60   ;;  %vm247_vm14 = vcmp.gt.f32.partialorder %v205_v1, 0.0  ;;  %v263_v7 = vmul.f32 0.2, %v205_v1  ;;  %vm255_vm15 = vcmp.gt.f32.partialorder %v237_v2, 0.0  ;;  %v278_v10 = vsel %vm246_vm10, %v202_v43, %v262_v61 }
  0xe7   :  { %v271_v8 = vmul.f32 0.2, %v237_v2  ;;  %vm245_vm0 = vcmp.gt.f32.partialorder %v197_v4, 0.0  ;;  %v261_v9 = vmul.f32 0.2, %v197_v4  ;;  %vm253_vm1 = vcmp.gt.f32.partialorder %v229_v5, 0.0 }
  0xe8   :  { %v286_v11 = vsel %vm254_vm11, %v234_v44, %v270_v0  ;;  %v279_v12 = vsel %vm247_vm14, %v205_v1, %v263_v7  ;;  %v269_v13 = vmul.f32 0.2, %v229_v5  ;;  %v276_v15 = vsel %vm244_vm12, %v194_v53, %v260_v3 }
  0xe9   :  { %v444_v16 = vpack.c.bf16 %v279_v12, %v278_v10  ;;  %v287_v17 = vsel %vm255_vm15, %v237_v2, %v271_v8  ;;  %v277_v18 = vsel %vm245_vm0, %v197_v4, %v261_v9  ;;  %v284_v14 = vsel %vm252_vm13, %v226_v59, %v268_v6 }
  0xea   :  { %v464_v19 = vpack.c.bf16 %v287_v17, %v286_v11  ;;  %v439_v20 = vpack.c.bf16 %v277_v18, %v276_v15  ;;  %v285_v21 = vsel %vm253_vm1, %v229_v5, %v269_v13 }
  0xeb   :  { %468 = vst [vmem:[%s658_s3 + $0x18] sm:$0xff] %v444_v16   ;;  %v459_v22 = vpack.c.bf16 %v285_v21, %v284_v14 }
  0xec   :  { %472 = vst [vmem:[%s658_s3 + $0x38] sm:$0xff] %v464_v19   ;;  %467 = vst [vmem:[%s658_s3 + $0x10] sm:$0xff] %v439_v20  }
  0xed   :  { %471 = vst [vmem:[%s658_s3 + $0x30] sm:$0xff] %v459_v22  }

// kernel: _lambda_.20
= control target key start
LH: loop header
LB: loop body
LE: loop exit
PB: predicated region body
PF: predicated region fallthrough
CT: control target
= control target key end

     0   :  { %s316_s1 = inlined_call_operand.vmem [shape: bf16[128,128], index: 1, kind: input, shape index: {}]   ;;  %s317_s0 = inlined_call_operand.vmem [shape: bf16[32,128], index: 0, kind: input, shape index: {}]   ;;  %s318_s2 = inlined_call_operand.vmem [shape: f32[1,128], index: 2, kind: input, shape index: {}]   ;;  %s319_s3 = inlined_call_operand.vmem [shape: bf16[32,128], index: 3, kind: output, shape index: {}]  }
   0x1   :  { %v247_v0 = vld [vmem:[%s316_s1 + $0x38] sm:$0xff]   ;;  %v248_v1 = vld [vmem:[%s316_s1 + $0x30] sm:$0xff]   ;;  %v249_v2 = vld [vmem:[%s316_s1 + $0x28] sm:$0xff]  }
   0x2   :  { %227 = vmatprep.subr.bf16.mxu0 %v247_v0  ;;  %v250_v3 = vld [vmem:[%s316_s1 + $0x20] sm:$0xff]   ;;  %v251_v5 = vld [vmem:[%s316_s1 + $0x18] sm:$0xff]   ;;  %v252_v6 = vld [vmem:[%s316_s1 + $0x10] sm:$0xff]  }
   0x3   :  { %228 = vmatpush3.bf16.msra.mxu0 %v247_v0  ;;  %v255_v4 = vld [vmem:[%s317_s0] sm:$0xff]   ;;  %v253_v7 = vld [vmem:[%s316_s1 + $0x8] sm:$0xff]  }
   0x4   :  { %229 = vmatprep.subr.bf16.mxu0 %v248_v1  ;;  %243 = vmatprep.mubr.bf16.mxu0 %v255_v4  ;;  %v254_v8 = vld [vmem:[%s316_s1] sm:$0xff]   ;;  %v256_v9 = vld [vmem:[%s317_s0 + $0x8] sm:$0xff]  }
   0x5   :  { %v187_v10 = vld [vmem:[%s318_s2] ss:$0 sm:$0xff] }
   0x7   :  { %230 = vmatpush3.bf16.msra.mxu0 %v248_v1 }
   0x8   :  { %231 = vmatprep.subr.bf16.mxu0 %v249_v2 }
   0xb   :  { %232 = vmatpush3.bf16.msra.mxu0 %v249_v2 }
   0xc   :  { %233 = vmatprep.subr.bf16.mxu0 %v250_v3 }
   0xf   :  { %234 = vmatpush3.bf16.msra.mxu0 %v250_v3 }
  0x10   :  { %235 = vmatprep.subr.bf16.mxu0 %v251_v5 }
  0x13   :  { %236 = vmatpush3.bf16.msra.mxu0 %v251_v5 }
  0x14   :  { %237 = vmatprep.subr.bf16.mxu0 %v252_v6 }
  0x17   :  { %238 = vmatpush3.bf16.msra.mxu0 %v252_v6 }
  0x18   :  { %239 = vmatprep.subr.bf16.mxu0 %v253_v7 }
  0x1b   :  { %240 = vmatpush3.bf16.msra.mxu0 %v253_v7 }
  0x1c   :  { %241 = vmatprep.subr.bf16.mxu0 %v254_v8 }
  0x1f   :  { %242 = vmatpush3.bf16.msra.mxu0 %v254_v8 }
  0x22   :  { %244 = vmatmul.mubr.bf16.vlgmr.msra.gmra.mxu0 %v256_v9 }
  0xe2   :  { %v245_v11 = vpop.f32.mrf.mxu0 }
  0xe3   :  { %v145_v12 = vadd.f32 %v245_v11, %v187_v10 }
  0xe4   :  { %v136_v13 = vpop.f32.mrf.mxu0 }
  0xe5   :  { %v137_v14 = vadd.f32 %v187_v10, %v136_v13  ;;  %v157_v16 = vmul.f32 0.2, %v145_v12  ;;  %vm153_vm0 = vcmp.gt.f32.partialorder %v145_v12, 0.0 }
  0xe6   :  { %v246_v15 = vpop.f32.mrf.mxu0 }
  0xe7   :  { %v148_v17 = vadd.f32 %v246_v15, %v187_v10  ;;  %v155_v19 = vmul.f32 0.2, %v137_v14  ;;  %vm151_vm2 = vcmp.gt.f32.partialorder %v137_v14, 0.0  ;;  %v161_v22 = vsel %vm153_vm0, %v145_v12, %v157_v16 }
  0xe8   :  { %v139_v18 = vpop.f32.mrf.mxu0 }
  0xe9   :  { %vm154_vm1 = vcmp.gt.f32.partialorder %v148_v17, 0.0  ;;  %v158_v20 = vmul.f32 0.2, %v148_v17  ;;  %v140_v21 = vadd.f32 %v187_v10, %v139_v18  ;;  %v159_v26 = vsel %vm151_vm2, %v137_v14, %v155_v19 }
  0xeb   :  { %v162_v23 = vsel %vm154_vm1, %v148_v17, %v158_v20  ;;  %vm152_vm3 = vcmp.gt.f32.partialorder %v140_v21, 0.0  ;;  %v156_v24 = vmul.f32 0.2, %v140_v21 }
  0xec   :  { %v214_v25 = vpack.c.bf16 %v162_v23, %v161_v22 }
  0xed   :  { %v160_v27 = vsel %vm152_vm3, %v140_v21, %v156_v24 }
  0xee   :  { %216 = vst [vmem:[%s319_s3 + $0x8] sm:$0xff] %v214_v25   ;;  %v209_v28 = vpack.c.bf16 %v160_v27, %v159_v26 }
  0xf0   :  { %210 = vst [vmem:[%s319_s3] sm:$0xff] %v209_v28  }

// kernel: _lambda_.21
= control target key start
LH: loop header
LB: loop body
LE: loop exit
PB: predicated region body
PF: predicated region fallthrough
CT: control target
= control target key end

     0   :  { %v277_v0 = vmov 0   ;;  %vm116_vm0 = vcmask 130048   ;;  %s346_s1 = inlined_call_operand.vmem [shape: bf16[144,128], index: 1, kind: input, shape index: {}]   ;;  %s347_s0 = inlined_call_operand.vmem [shape: bf16[32,144], index: 0, kind: input, shape index: {}]   ;;  %s348_s2 = inlined_call_operand.vmem [shape: f32[1,128], index: 2, kind: input, shape index: {}]   ;;  %s349_s3 = inlined_call_operand.vmem [shape: bf16[32,128], index: 3, kind: output, shape index: {}]  }
   0x1   :  { %123 = vmatprep.subr.bf16.mxu0 %v277_v0  ;;  %243 = vmatprep.subr.bf16.mxu1 %v277_v0  ;;  %v262_v1 = vld [vmem:[%s346_s1 + $0x38] sm:$0xff]   ;;  %v263_v2 = vld [vmem:[%s346_s1 + $0x30] sm:$0xff]   ;;  %v264_v3 = vld [vmem:[%s346_s1 + $0x28] sm:$0xff]  }
   0x2   :  { %124 = vmatpush1.bf16.msra.mxu0 %v262_v1  ;;  %252 = vmatpush1.bf16.msra.mxu1 %v262_v1  ;;  %v265_v4 = vld [vmem:[%s346_s1 + $0x20] sm:$0xff]   ;;  %v276_v6 = vld [vmem:[%s347_s0 + $0x14] ss:$8 sps:$4 sm:$0xff]   ;;  %v268_v9 = vld [vmem:[%s346_s1 + $0x8] sm:$0xff]  }
   0x3   :  { %125 = vmatprep.subr.bf16.mxu0 %v277_v0  ;;  %244 = vmatprep.subr.bf16.mxu1 %v277_v0  ;;  %v273_v5 = vld [vmem:[%s347_s0 + $0x4] ss:$8 sps:$4 sm:$0xff]   ;;  %v266_v7 = vld [vmem:[%s346_s1 + $0x18] sm:$0xff]   ;;  %v267_v8 = vld [vmem:[%s346_s1 + $0x10] sm:$0xff]  }
   0x4   :  { %222 = vmatprep.mubr.msk.bf16.mxu0 %vm116_vm0, %v273_v5  ;;  %223 = vmatprep.mubr.msk.bf16.mxu1 %vm116_vm0, %v276_v6  ;;  %v269_v10 = vld [vmem:[%s346_s1] sm:$0xff]   ;;  %v274_v13 = vld [vmem:[%s347_s0 + $0x10] ss:$8 sps:$4 sm:$0xff]  }
   0x5   :  { %v270_v11 = vld [vmem:[%s346_s1 + $0x40] sm:$0xff]  }
   0x6   :  { %126 = vmatpush1.bf16.msra.mxu0 %v263_v2  ;;  %253 = vmatpush1.bf16.msra.mxu1 %v263_v2  ;;  %v271_v12 = vld [vmem:[%s347_s0] ss:$8 sps:$4 sm:$0xff]  }
   0x7   :  { %127 = vmatprep.subr.bf16.mxu0 %v277_v0  ;;  %245 = vmatprep.subr.bf16.mxu1 %v277_v0  ;;  %v208_v14 = vld [vmem:[%s348_s2] ss:$0 sm:$0xff] }
   0xa   :  { %128 = vmatpush1.bf16.msra.mxu0 %v264_v3  ;;  %254 = vmatpush1.bf16.msra.mxu1 %v264_v3 }
   0xb   :  { %129 = vmatprep.subr.bf16.mxu0 %v277_v0  ;;  %246 = vmatprep.subr.bf16.mxu1 %v277_v0 }
   0xe   :  { %130 = vmatpush1.bf16.msra.mxu0 %v265_v4  ;;  %255 = vmatpush1.bf16.msra.mxu1 %v265_v4 }
   0xf   :  { %131 = vmatprep.subr.bf16.mxu0 %v277_v0  ;;  %247 = vmatprep.subr.bf16.mxu1 %v277_v0 }
  0x12   :  { %132 = vmatpush1.bf16.msra.mxu0 %v266_v7  ;;  %256 = vmatpush1.bf16.msra.mxu1 %v266_v7 }
  0x13   :  { %133 = vmatprep.subr.bf16.mxu0 %v277_v0  ;;  %248 = vmatprep.subr.bf16.mxu1 %v277_v0 }
  0x16   :  { %134 = vmatpush1.bf16.msra.mxu0 %v267_v8  ;;  %257 = vmatpush1.bf16.msra.mxu1 %v267_v8 }
  0x17   :  { %135 = vmatprep.subr.bf16.mxu0 %v277_v0  ;;  %249 = vmatprep.subr.bf16.mxu1 %v277_v0 }
  0x1a   :  { %136 = vmatpush1.bf16.msra.mxu0 %v268_v9  ;;  %258 = vmatpush1.bf16.msra.mxu1 %v268_v9 }
  0x1b   :  { %137 = vmatprep.subr.bf16.mxu0 %v277_v0  ;;  %250 = vmatprep.subr.bf16.mxu1 %v277_v0 }
  0x1e   :  { %138 = vmatpush1.bf16.msra.mxu0 %v269_v10  ;;  %259 = vmatpush1.bf16.msra.mxu1 %v269_v10 }
  0x1f   :  { %153 = vmatprep.subr.bf16.mxu0 %v277_v0  ;;  %251 = vmatprep.subr.bf16.mxu1 %v277_v0 }
  0x22   :  { %154 = vmatpush2.bf16.msra.mxu0 %v270_v11  ;;  %260 = vmatpush2.bf16.msra.mxu1 %v270_v11 }
  0x25   :  { %156 = vmatmul.mubr.bf16.vlgmr.msra.gmra.mxu0 %v271_v12  ;;  %164 = vmatmul.mubr.bf16.vlgmr.msra.gmra.mxu1 %v274_v13 }
  0xe5   :  { %v157_v15 = vpop.f32.mrf.mxu0  ;;  %v165_v16 = vpop.f32.mrf.mxu1 }
  0xe6   :  { %v158_v17 = vadd.f32 %v208_v14, %v157_v15  ;;  %v166_v18 = vadd.f32 %v208_v14, %v165_v16 }
  0xe7   :  { %v159_v19 = vpop.f32.mrf.mxu0  ;;  %v167_v20 = vpop.f32.mrf.mxu1 }
  0xe8   :  { %v176_v23 = vmul.f32 0.2, %v158_v17  ;;  %v178_v24 = vmul.f32 0.2, %v166_v18  ;;  %vm172_vm1 = vcmp.gt.f32.partialorder %v158_v17, 0.0  ;;  %vm174_vm2 = vcmp.gt.f32.partialorder %v166_v18, 0.0 }
  0xe9   :  { %v160_v21 = vpop.f32.mrf.mxu0  ;;  %v168_v22 = vpop.f32.mrf.mxu1 }
  0xea   :  { %v161_v25 = vadd.f32 %v208_v14, %v160_v21  ;;  %v169_v26 = vadd.f32 %v208_v14, %v168_v22  ;;  %v180_v31 = vsel %vm172_vm1, %v158_v17, %v176_v23  ;;  %v182_v32 = vsel %vm174_vm2, %v166_v18, %v178_v24 }
  0xeb   :  { %v162_v27 = vpop.f32.mrf.mxu0  ;;  %v170_v28 = vpop.f32.mrf.mxu1 }
  0xec   :  { %vm173_vm3 = vcmp.gt.f32.partialorder %v161_v25, 0.0  ;;  %v177_v29 = vmul.f32 0.2, %v161_v25  ;;  %vm175_vm4 = vcmp.gt.f32.partialorder %v169_v26, 0.0  ;;  %v179_v30 = vmul.f32 0.2, %v169_v26 }
  0xee   :  { %v181_v33 = vsel %vm173_vm3, %v161_v25, %v177_v29  ;;  %v183_v34 = vsel %vm175_vm4, %v169_v26, %v179_v30 }
  0xef   :  { %v235_v35 = vpack.c.bf16 %v181_v33, %v180_v31  ;;  %v240_v36 = vpack.c.bf16 %v183_v34, %v182_v32 }
  0xf1   :  { %236 = vst [vmem:[%s349_s3] sm:$0xff] %v235_v35   ;;  %242 = vst [vmem:[%s349_s3 + $0x8] sm:$0xff] %v240_v36  }

// kernel: _lambda_.22
= control target key start
LH: loop header
LB: loop body
LE: loop exit
PB: predicated region body
PF: predicated region fallthrough
CT: control target
= control target key end

     0   :  { %s372_s1 = inlined_call_operand.vmem [shape: bf16[256,128], index: 1, kind: input, shape index: {}]   ;;  %s373_s0 = inlined_call_operand.vmem [shape: bf16[16,256], index: 0, kind: input, shape index: {}]   ;;  %s374_s2 = inlined_call_operand.vmem [shape: f32[1,128], index: 2, kind: input, shape index: {}]   ;;  %s375_s3 = inlined_call_operand.vmem [shape: bf16[16,128], index: 3, kind: output, shape index: {}]  }
   0x1   :  { %v273_v0 = vld [vmem:[%s372_s1 + $0x78] sm:$0xff]   ;;  %v275_v2 = vld [vmem:[%s372_s1 + $0x70] sm:$0xff]   ;;  %v277_v4 = vld [vmem:[%s372_s1 + $0x68] sm:$0xff]  }
   0x2   :  { %v274_v1 = vld [vmem:[%s372_s1 + $0x38] sm:$0xff]   ;;  %251 = vmatprep.subr.bf16.mxu0 %v273_v0  ;;  %v276_v3 = vld [vmem:[%s372_s1 + $0x30] sm:$0xff]   ;;  %v278_v5 = vld [vmem:[%s372_s1 + $0x28] sm:$0xff]  }
   0x3   :  { %252 = vmatpush3.bf16.msra.mxu0 %v274_v1  ;;  %v279_v6 = vld [vmem:[%s372_s1 + $0x60] sm:$0xff]   ;;  %v281_v8 = vld [vmem:[%s372_s1 + $0x58] sm:$0xff]   ;;  %v283_v10 = vld [vmem:[%s372_s1 + $0x50] sm:$0xff]  }
   0x4   :  { %253 = vmatprep.subr.bf16.mxu0 %v275_v2  ;;  %v280_v7 = vld [vmem:[%s372_s1 + $0x20] sm:$0xff]   ;;  %v282_v9 = vld [vmem:[%s372_s1 + $0x18] sm:$0xff]   ;;  %v284_v12 = vld [vmem:[%s372_s1 + $0x10] sm:$0xff]  }
   0x5   :  { %v291_v11 = vld [vmem:[%s373_s0 + $0x4] ss:$8 sps:$4 sm:$0xff]   ;;  %v289_v17 = vld [vmem:[%s373_s0] ss:$8 sps:$4 sm:$0xff]  }
   0x6   :  { %194 = vmatprep.mubr.bf16.mxu0 %v291_v11  ;;  %v285_v13 = vld [vmem:[%s372_s1 + $0x48] sm:$0xff]   ;;  %v287_v15 = vld [vmem:[%s372_s1 + $0x40] sm:$0xff]  }
   0x7   :  { %254 = vmatpush3.bf16.msra.mxu0 %v276_v3  ;;  %v286_v14 = vld [vmem:[%s372_s1 + $0x8] sm:$0xff]   ;;  %v288_v16 = vld [vmem:[%s372_s1] sm:$0xff]  }
   0x8   :  { %255 = vmatprep.subr.bf16.mxu0 %v277_v4  ;;  %v223_v19 = vld [vmem:[%s374_s2] ss:$0 sm:$0xff] }
   0xb   :  { %256 = vmatpush3.bf16.msra.mxu0 %v278_v5 }
   0xc   :  { %257 = vmatprep.subr.bf16.mxu0 %v279_v6 }
   0xf   :  { %258 = vmatpush3.bf16.msra.mxu0 %v280_v7 }
  0x10   :  { %259 = vmatprep.subr.bf16.mxu0 %v281_v8 }
  0x13   :  { %260 = vmatpush3.bf16.msra.mxu0 %v282_v9 }
  0x14   :  { %261 = vmatprep.subr.bf16.mxu0 %v283_v10 }
  0x17   :  { %262 = vmatpush3.bf16.msra.mxu0 %v284_v12 }
  0x18   :  { %263 = vmatprep.subr.bf16.mxu0 %v285_v13 }
  0x1b   :  { %264 = vmatpush3.bf16.msra.mxu0 %v286_v14 }
  0x1c   :  { %265 = vmatprep.subr.bf16.mxu0 %v287_v15 }
  0x1f   :  { %266 = vmatpush3.bf16.msra.mxu0 %v288_v16 }
  0x22   :  { %195 = vmatmul.mubr.bf16.vlgmr.msra.gmra.mxu0 %v289_v17 }
  0xe2   :  { %v267_v18 = vpop.f32.mrf.mxu0 }
  0xe4   :  { %v268_v20 = vpop.f32.mrf.mxu0 }
  0xe5   :  { %v269_v21 = vadd.f32 %v268_v20, %v267_v18 }
  0xe6   :  { %v270_v22 = vpop.f32.mrf.mxu0 }
  0xe7   :  { %v197_v23 = vadd.f32 %v269_v21, %v223_v19 }
  0xe8   :  { %v271_v24 = vpop.f32.mrf.mxu0 }
  0xe9   :  { %v272_v25 = vadd.f32 %v271_v24, %v270_v22  ;;  %v205_v26 = vmul.f32 0.2, %v197_v23  ;;  %vm203_vm0 = vcmp.gt.f32.partialorder %v197_v23, 0.0 }
  0xeb   :  { %v200_v27 = vadd.f32 %v272_v25, %v223_v19  ;;  %v207_v29 = vsel %vm203_vm0, %v197_v23, %v205_v26 }
  0xed   :  { %vm204_vm1 = vcmp.gt.f32.partialorder %v200_v27, 0.0  ;;  %v206_v28 = vmul.f32 0.2, %v200_v27 }
  0xef   :  { %v208_v30 = vsel %vm204_vm1, %v200_v27, %v206_v28 }
  0xf0   :  { %v249_v31 = vpack.c.bf16 %v208_v30, %v207_v29 }
  0xf2   :  { %250 = vst [vmem:[%s375_s3] sm:$0xff] %v249_v31  }

// kernel: _lambda_.23
= control target key start
LH: loop header
LB: loop body
LE: loop exit
PB: predicated region body
PF: predicated region fallthrough
CT: control target
= control target key end

     0   :  { %v380_v1 = vmov 0.0   ;;  %vm381_vm0 = vmmov 0   ;;  %vm185_vm1 = vcmask 261120   ;;  %s471_s1 = inlined_call_operand.vmem [shape: bf16[288,128], index: 1, kind: input, shape index: {}]   ;;  %s472_s0 = inlined_call_operand.vmem [shape: bf16[16,288], index: 0, kind: input, shape index: {}]   ;;  %s473_s2 = inlined_call_operand.vmem [shape: f32[1,128], index: 2, kind: input, shape index: {}]   ;;  %s474_s3 = inlined_call_operand.vmem [shape: bf16[16,128], index: 3, kind: output, shape index: {}]  }
   0x1   :  { %v358_v0 = vld [vmem:[%s471_s1 + $0x78] sm:$0xff]   ;;  %348 = vmatprep.subr.bf16.mxu1 %v380_v1  ;;  %352 = vmatprep.mubr.msk.bf16.mxu1 %vm381_vm0, %v380_v1  ;;  %v360_v3 = vld [vmem:[%s471_s1 + $0x70] sm:$0xff]   ;;  %v362_v5 = vld [vmem:[%s471_s1 + $0x68] sm:$0xff]  }
   0x2   :  { %v359_v2 = vld [vmem:[%s471_s1 + $0x38] sm:$0xff]   ;;  %323 = vmatprep.subr.bf16.mxu0 %v358_v0  ;;  %v361_v4 = vld [vmem:[%s471_s1 + $0x30] sm:$0xff]   ;;  %v363_v6 = vld [vmem:[%s471_s1 + $0x28] sm:$0xff]  }
   0x3   :  { %324 = vmatpush3.bf16.msra.mxu0 %v359_v2  ;;  %v364_v7 = vld [vmem:[%s471_s1 + $0x60] sm:$0xff]   ;;  %v366_v9 = vld [vmem:[%s471_s1 + $0x58] sm:$0xff]   ;;  %v372_v10 = vld [vmem:[%s471_s1 + $0x88] sm:$0xff]  }
   0x4   :  { %325 = vmatprep.subr.bf16.mxu0 %v360_v3  ;;  %v365_v8 = vld [vmem:[%s471_s1 + $0x20] sm:$0xff]   ;;  %v367_v11 = vld [vmem:[%s471_s1 + $0x18] sm:$0xff]   ;;  %v368_v12 = vld [vmem:[%s471_s1 + $0x50] sm:$0xff]   ;;  %349 = vmatpush3.bf16.msra.mxu1 %v372_v10 }
   0x5   :  { %350 = vmatprep.subr.bf16.mxu1 %v380_v1  ;;  %v375_v13 = vld [vmem:[%s471_s1 + $0x80] sm:$0xff]   ;;  %v369_v14 = vld [vmem:[%s471_s1 + $0x10] sm:$0xff]   ;;  %v370_v16 = vld [vmem:[%s471_s1 + $0x48] sm:$0xff]  }
   0x6   :  { %v378_v15 = vld [vmem:[%s472_s0 + $0x4] ss:$12 sps:$4 sm:$0xff]   ;;  %v379_v17 = vld [vmem:[%s472_s0 + $0x8] ss:$12 sps:$4 sm:$0xff]   ;;  %v376_v21 = vld [vmem:[%s472_s0] ss:$12 sps:$4 sm:$0xff]  }
   0x7   :  { %326 = vmatpush3.bf16.msra.mxu0 %v361_v4  ;;  %221 = vmatprep.mubr.bf16.mxu0 %v378_v15  ;;  %v371_v18 = vld [vmem:[%s471_s1 + $0x8] sm:$0xff]   ;;  %v373_v19 = vld [vmem:[%s471_s1 + $0x40] sm:$0xff]  }
   0x8   :  { %327 = vmatprep.subr.bf16.mxu0 %v362_v5  ;;  %351 = vmatpush3.bf16.msra.mxu1 %v375_v13  ;;  %v374_v20 = vld [vmem:[%s471_s1] sm:$0xff]  }
   0x9   :  { %v291_v27 = vld [vmem:[%s473_s2] ss:$0 sm:$0xff] }
   0xb   :  { %328 = vmatpush3.bf16.msra.mxu0 %v363_v6  ;;  %353 = vmatmul.mubr.msk.bf16.vlgmr.msra.gmra.mxu1 %vm185_vm1, %v379_v17 }
   0xc   :  { %329 = vmatprep.subr.bf16.mxu0 %v364_v7 }
   0xf   :  { %330 = vmatpush3.bf16.msra.mxu0 %v365_v8 }
  0x10   :  { %331 = vmatprep.subr.bf16.mxu0 %v366_v9 }
  0x13   :  { %332 = vmatpush3.bf16.msra.mxu0 %v367_v11 }
  0x14   :  { %333 = vmatprep.subr.bf16.mxu0 %v368_v12 }
  0x17   :  { %334 = vmatpush3.bf16.msra.mxu0 %v369_v14 }
  0x18   :  { %335 = vmatprep.subr.bf16.mxu0 %v370_v16 }
  0x1b   :  { %336 = vmatpush3.bf16.msra.mxu0 %v371_v18 }
  0x1c   :  { %337 = vmatprep.subr.bf16.mxu0 %v373_v19 }
  0x1f   :  { %338 = vmatpush3.bf16.msra.mxu0 %v374_v20 }
  0x22   :  { %222 = vmatmul.mubr.bf16.vlgmr.msra.gmra.mxu0 %v376_v21 }
  0xcb   :  { %v264_v22 = vpop.f32.mrf.mxu1 }
  0xcd   :  { %v354_v23 = vpop.f32.mrf.mxu1 }
  0xcf   :  { %v267_v24 = vpop.f32.mrf.mxu1 }
  0xd1   :  { %v355_v25 = vpop.f32.mrf.mxu1 }
  0xe2   :  { %v339_v26 = vpop.f32.mrf.mxu0 }
  0xe4   :  { %v340_v28 = vpop.f32.mrf.mxu0 }
  0xe5   :  { %v341_v29 = vadd.f32 %v340_v28, %v339_v26 }
  0xe6   :  { %v342_v30 = vpop.f32.mrf.mxu0 }
  0xe7   :  { %v224_v31 = vadd.f32 %v341_v29, %v291_v27 }
  0xe8   :  { %v343_v32 = vpop.f32.mrf.mxu0 }
  0xe9   :  { %v265_v33 = vadd.f32 %v264_v22, %v224_v31  ;;  %v344_v34 = vadd.f32 %v343_v32, %v342_v30 }
  0xeb   :  { %v227_v35 = vadd.f32 %v344_v34, %v291_v27  ;;  %v273_v36 = vmul.f32 0.2, %v265_v33  ;;  %vm271_vm2 = vcmp.gt.f32.partialorder %v265_v33, 0.0 }
  0xed   :  { %v268_v37 = vadd.f32 %v267_v24, %v227_v35  ;;  %v275_v39 = vsel %vm271_vm2, %v265_v33, %v273_v36 }
  0xef   :  { %vm272_vm3 = vcmp.gt.f32.partialorder %v268_v37, 0.0  ;;  %v274_v38 = vmul.f32 0.2, %v268_v37 }
  0xf1   :  { %v276_v40 = vsel %vm272_vm3, %v268_v37, %v274_v38 }
  0xf2   :  { %v321_v41 = vpack.c.bf16 %v276_v40, %v275_v39 }
  0xf4   :  { %322 = vst [vmem:[%s474_s3] sm:$0xff] %v321_v41  }

// kernel: _lambda_.25
= control target key start
LH: loop header
LB: loop body
LE: loop exit
PB: predicated region body
PF: predicated region fallthrough
CT: control target
= control target key end

     0   :  { %v376_v1 = vmov 0.0   ;;  %vm377_vm0 = vmmov 0   ;;  %vm185_vm1 = vcmask 261120   ;;  %s467_s1 = inlined_call_operand.vmem [shape: bf16[288,128], index: 1, kind: input, shape index: {}]   ;;  %s468_s0 = inlined_call_operand.vmem [shape: bf16[16,288], index: 0, kind: input, shape index: {}]   ;;  %s469_s2 = inlined_call_operand.vmem [shape: f32[1,128], index: 2, kind: input, shape index: {}]   ;;  %s470_s3 = inlined_call_operand.vmem [shape: bf16[16,128], index: 3, kind: output, shape index: {}]  }
   0x1   :  { %v354_v0 = vld [vmem:[%s467_s1 + $0x78] sm:$0xff]   ;;  %344 = vmatprep.subr.bf16.mxu1 %v376_v1  ;;  %348 = vmatprep.mubr.msk.bf16.mxu1 %vm377_vm0, %v376_v1  ;;  %v356_v3 = vld [vmem:[%s467_s1 + $0x70] sm:$0xff]   ;;  %v358_v5 = vld [vmem:[%s467_s1 + $0x68] sm:$0xff]  }
   0x2   :  { %v355_v2 = vld [vmem:[%s467_s1 + $0x38] sm:$0xff]   ;;  %319 = vmatprep.subr.bf16.mxu0 %v354_v0  ;;  %v357_v4 = vld [vmem:[%s467_s1 + $0x30] sm:$0xff]   ;;  %v359_v6 = vld [vmem:[%s467_s1 + $0x28] sm:$0xff]  }
   0x3   :  { %320 = vmatpush3.bf16.msra.mxu0 %v355_v2  ;;  %v360_v7 = vld [vmem:[%s467_s1 + $0x60] sm:$0xff]   ;;  %v362_v9 = vld [vmem:[%s467_s1 + $0x58] sm:$0xff]   ;;  %v368_v10 = vld [vmem:[%s467_s1 + $0x88] sm:$0xff]  }
   0x4   :  { %321 = vmatprep.subr.bf16.mxu0 %v356_v3  ;;  %v361_v8 = vld [vmem:[%s467_s1 + $0x20] sm:$0xff]   ;;  %v363_v11 = vld [vmem:[%s467_s1 + $0x18] sm:$0xff]   ;;  %v364_v12 = vld [vmem:[%s467_s1 + $0x50] sm:$0xff]   ;;  %345 = vmatpush3.bf16.msra.mxu1 %v368_v10 }
   0x5   :  { %346 = vmatprep.subr.bf16.mxu1 %v376_v1  ;;  %v371_v13 = vld [vmem:[%s467_s1 + $0x80] sm:$0xff]   ;;  %v365_v14 = vld [vmem:[%s467_s1 + $0x10] sm:$0xff]   ;;  %v366_v16 = vld [vmem:[%s467_s1 + $0x48] sm:$0xff]  }
   0x6   :  { %v374_v15 = vld [vmem:[%s468_s0 + $0x4] ss:$12 sps:$4 sm:$0xff]   ;;  %v375_v17 = vld [vmem:[%s468_s0 + $0x8] ss:$12 sps:$4 sm:$0xff]   ;;  %v372_v21 = vld [vmem:[%s468_s0] ss:$12 sps:$4 sm:$0xff]  }
   0x7   :  { %322 = vmatpush3.bf16.msra.mxu0 %v357_v4  ;;  %221 = vmatprep.mubr.bf16.mxu0 %v374_v15  ;;  %v367_v18 = vld [vmem:[%s467_s1 + $0x8] sm:$0xff]   ;;  %v369_v19 = vld [vmem:[%s467_s1 + $0x40] sm:$0xff]  }
   0x8   :  { %323 = vmatprep.subr.bf16.mxu0 %v358_v5  ;;  %347 = vmatpush3.bf16.msra.mxu1 %v371_v13  ;;  %v370_v20 = vld [vmem:[%s467_s1] sm:$0xff]  }
   0x9   :  { %v287_v27 = vld [vmem:[%s469_s2] ss:$0 sm:$0xff] }
   0xb   :  { %324 = vmatpush3.bf16.msra.mxu0 %v359_v6  ;;  %349 = vmatmul.mubr.msk.bf16.vlgmr.msra.gmra.mxu1 %vm185_vm1, %v375_v17 }
   0xc   :  { %325 = vmatprep.subr.bf16.mxu0 %v360_v7 }
   0xf   :  { %326 = vmatpush3.bf16.msra.mxu0 %v361_v8 }
  0x10   :  { %327 = vmatprep.subr.bf16.mxu0 %v362_v9 }
  0x13   :  { %328 = vmatpush3.bf16.msra.mxu0 %v363_v11 }
  0x14   :  { %329 = vmatprep.subr.bf16.mxu0 %v364_v12 }
  0x17   :  { %330 = vmatpush3.bf16.msra.mxu0 %v365_v14 }
  0x18   :  { %331 = vmatprep.subr.bf16.mxu0 %v366_v16 }
  0x1b   :  { %332 = vmatpush3.bf16.msra.mxu0 %v367_v18 }
  0x1c   :  { %333 = vmatprep.subr.bf16.mxu0 %v369_v19 }
  0x1f   :  { %334 = vmatpush3.bf16.msra.mxu0 %v370_v20 }
  0x22   :  { %222 = vmatmul.mubr.bf16.vlgmr.msra.gmra.mxu0 %v372_v21 }
  0xcb   :  { %v264_v22 = vpop.f32.mrf.mxu1 }
  0xcd   :  { %v350_v23 = vpop.f32.mrf.mxu1 }
  0xcf   :  { %v267_v24 = vpop.f32.mrf.mxu1 }
  0xd1   :  { %v351_v25 = vpop.f32.mrf.mxu1 }
  0xe2   :  { %v335_v26 = vpop.f32.mrf.mxu0 }
  0xe4   :  { %v336_v28 = vpop.f32.mrf.mxu0 }
  0xe5   :  { %v337_v29 = vadd.f32 %v336_v28, %v335_v26 }
  0xe6   :  { %v338_v30 = vpop.f32.mrf.mxu0 }
  0xe7   :  { %v224_v31 = vadd.f32 %v337_v29, %v287_v27 }
  0xe8   :  { %v339_v32 = vpop.f32.mrf.mxu0 }
  0xe9   :  { %v340_v33 = vadd.f32 %v339_v32, %v338_v30  ;;  %v265_v34 = vadd.f32 %v264_v22, %v224_v31 }
  0xeb   :  { %v227_v35 = vadd.f32 %v340_v33, %v287_v27  ;;  %v271_v37 = vmax.f32 %v265_v34, 0.0 }
  0xed   :  { %v268_v36 = vadd.f32 %v267_v24, %v227_v35 }
  0xef   :  { %v272_v38 = vmax.f32 %v268_v36, 0.0 }
  0xf1   :  { %v317_v39 = vpack.c.bf16 %v272_v38, %v271_v37 }
  0xf3   :  { %318 = vst [vmem:[%s470_s3] sm:$0xff] %v317_v39  }

// kernel: _lambda_.24
= control target key start
LH: loop header
LB: loop body
LE: loop exit
PB: predicated region body
PF: predicated region fallthrough
CT: control target
= control target key end

     0   :  { %s666_s1 = inlined_call_operand.vmem [shape: bf16[512,128], index: 1, kind: input, shape index: {}]   ;;  %s667_s0 = inlined_call_operand.vmem [shape: bf16[16,512], index: 0, kind: input, shape index: {}]   ;;  %s668_s2 = inlined_call_operand.vmem [shape: f32[1,128], index: 2, kind: input, shape index: {}]   ;;  %s669_s3 = inlined_call_operand.vmem [shape: bf16[16,128], index: 3, kind: output, shape index: {}]  }
   0x1   :  { %v494_v0 = vld [vmem:[%s666_s1 + $0x78] sm:$0xff]   ;;  %v498_v4 = vld [vmem:[%s666_s1 + $0x70] sm:$0xff]   ;;  %v502_v8 = vld [vmem:[%s666_s1 + $0x68] sm:$0xff]  }
   0x2   :  { %v495_v1 = vld [vmem:[%s666_s1 + $0xf8] sm:$0xff]   ;;  %450 = vmatprep.subr.bf16.mxu0 %v494_v0  ;;  %v499_v5 = vld [vmem:[%s666_s1 + $0xf0] sm:$0xff]   ;;  %v503_v9 = vld [vmem:[%s666_s1 + $0xe8] sm:$0xff]  }
   0x3   :  { %v496_v2 = vld [vmem:[%s666_s1 + $0x38] sm:$0xff]   ;;  %472 = vmatprep.subr.bf16.mxu1 %v495_v1  ;;  %v500_v6 = vld [vmem:[%s666_s1 + $0x30] sm:$0xff]   ;;  %v504_v10 = vld [vmem:[%s666_s1 + $0x28] sm:$0xff]  }
   0x4   :  { %v497_v3 = vld [vmem:[%s666_s1 + $0xb8] sm:$0xff]   ;;  %451 = vmatpush3.bf16.msra.mxu0 %v496_v2  ;;  %v501_v7 = vld [vmem:[%s666_s1 + $0xb0] sm:$0xff]   ;;  %v505_v11 = vld [vmem:[%s666_s1 + $0xa8] sm:$0xff]  }
   0x5   :  { %473 = vmatpush3.bf16.msra.mxu1 %v497_v3  ;;  %452 = vmatprep.subr.bf16.mxu0 %v498_v4  ;;  %v506_v12 = vld [vmem:[%s666_s1 + $0x60] sm:$0xff]   ;;  %v510_v16 = vld [vmem:[%s666_s1 + $0x58] sm:$0xff]   ;;  %v514_v20 = vld [vmem:[%s666_s1 + $0x50] sm:$0xff]  }
   0x6   :  { %474 = vmatprep.subr.bf16.mxu1 %v499_v5  ;;  %v507_v13 = vld [vmem:[%s666_s1 + $0xe0] sm:$0xff]   ;;  %v511_v17 = vld [vmem:[%s666_s1 + $0xd8] sm:$0xff]   ;;  %v515_v21 = vld [vmem:[%s666_s1 + $0xd0] sm:$0xff]  }
   0x7   :  { %v508_v14 = vld [vmem:[%s666_s1 + $0x20] sm:$0xff]   ;;  %v512_v18 = vld [vmem:[%s666_s1 + $0x18] sm:$0xff]   ;;  %v516_v22 = vld [vmem:[%s666_s1 + $0x10] sm:$0xff]  }
   0x8   :  { %453 = vmatpush3.bf16.msra.mxu0 %v500_v6  ;;  %v509_v15 = vld [vmem:[%s666_s1 + $0xa0] sm:$0xff]   ;;  %v513_v19 = vld [vmem:[%s666_s1 + $0x98] sm:$0xff]   ;;  %v517_v23 = vld [vmem:[%s666_s1 + $0x90] sm:$0xff]  }
   0x9   :  { %475 = vmatpush3.bf16.msra.mxu1 %v501_v7  ;;  %454 = vmatprep.subr.bf16.mxu0 %v502_v8  ;;  %v518_v24 = vld [vmem:[%s666_s1 + $0x48] sm:$0xff]   ;;  %v522_v28 = vld [vmem:[%s666_s1 + $0x40] sm:$0xff]  }
   0xa   :  { %476 = vmatprep.subr.bf16.mxu1 %v503_v9  ;;  %v519_v25 = vld [vmem:[%s666_s1 + $0xc8] sm:$0xff]   ;;  %v523_v29 = vld [vmem:[%s666_s1 + $0xc0] sm:$0xff]  }
   0xb   :  { %v520_v26 = vld [vmem:[%s666_s1 + $0x8] sm:$0xff]   ;;  %v524_v30 = vld [vmem:[%s666_s1] sm:$0xff]  }
   0xc   :  { %455 = vmatpush3.bf16.msra.mxu0 %v504_v10  ;;  %v521_v27 = vld [vmem:[%s666_s1 + $0x88] sm:$0xff]   ;;  %v525_v31 = vld [vmem:[%s666_s1 + $0x80] sm:$0xff]  }
   0xd   :  { %477 = vmatpush3.bf16.msra.mxu1 %v505_v11  ;;  %456 = vmatprep.subr.bf16.mxu0 %v506_v12  ;;  %v526_v32 = vld [vmem:[%s667_s0] ss:$16 sps:$4 sm:$0xff]   ;;  %v528_v33 = vld [vmem:[%s667_s0 + $0x4] ss:$16 sps:$4 sm:$0xff]   ;;  %v529_v34 = vld [vmem:[%s667_s0 + $0x8] ss:$16 sps:$4 sm:$0xff]  }
   0xe   :  { %478 = vmatprep.subr.bf16.mxu1 %v507_v13  ;;  %v531_v35 = vld [vmem:[%s667_s0 + $0xc] ss:$16 sps:$4 sm:$0xff]   ;;  %334 = vmatprep.mubr.bf16.mxu0 %v528_v33  ;;  %v404_v38 = vld [vmem:[%s668_s2] ss:$0 sm:$0xff] }
   0xf   :  { %375 = vmatprep.mubr.bf16.mxu1 %v531_v35 }
  0x10   :  { %457 = vmatpush3.bf16.msra.mxu0 %v508_v14 }
  0x11   :  { %479 = vmatpush3.bf16.msra.mxu1 %v509_v15  ;;  %458 = vmatprep.subr.bf16.mxu0 %v510_v16 }
  0x12   :  { %480 = vmatprep.subr.bf16.mxu1 %v511_v17 }
  0x14   :  { %459 = vmatpush3.bf16.msra.mxu0 %v512_v18 }
  0x15   :  { %481 = vmatpush3.bf16.msra.mxu1 %v513_v19  ;;  %460 = vmatprep.subr.bf16.mxu0 %v514_v20 }
  0x16   :  { %482 = vmatprep.subr.bf16.mxu1 %v515_v21 }
  0x18   :  { %461 = vmatpush3.bf16.msra.mxu0 %v516_v22 }
  0x19   :  { %483 = vmatpush3.bf16.msra.mxu1 %v517_v23  ;;  %462 = vmatprep.subr.bf16.mxu0 %v518_v24 }
  0x1a   :  { %484 = vmatprep.subr.bf16.mxu1 %v519_v25 }
  0x1c   :  { %463 = vmatpush3.bf16.msra.mxu0 %v520_v26 }
  0x1d   :  { %485 = vmatpush3.bf16.msra.mxu1 %v521_v27  ;;  %464 = vmatprep.subr.bf16.mxu0 %v522_v28 }
  0x1e   :  { %486 = vmatprep.subr.bf16.mxu1 %v523_v29 }
  0x20   :  { %465 = vmatpush3.bf16.msra.mxu0 %v524_v30 }
  0x21   :  { %487 = vmatpush3.bf16.msra.mxu1 %v525_v31 }
  0x23   :  { %335 = vmatmul.mubr.bf16.vlgmr.msra.gmra.mxu0 %v526_v32 }
  0x24   :  { %376 = vmatmul.mubr.bf16.vlgmr.msra.gmra.mxu1 %v529_v34 }
  0xe3   :  { %v466_v36 = vpop.f32.mrf.mxu0 }
  0xe4   :  { %v488_v37 = vpop.f32.mrf.mxu1 }
  0xe5   :  { %v467_v39 = vpop.f32.mrf.mxu0 }
  0xe6   :  { %v468_v40 = vadd.f32 %v467_v39, %v466_v36  ;;  %v489_v41 = vpop.f32.mrf.mxu1 }
  0xe7   :  { %v469_v42 = vpop.f32.mrf.mxu0  ;;  %v490_v44 = vadd.f32 %v489_v41, %v488_v37 }
  0xe8   :  { %v337_v43 = vadd.f32 %v468_v40, %v404_v38  ;;  %v491_v45 = vpop.f32.mrf.mxu1 }
  0xe9   :  { %v470_v46 = vpop.f32.mrf.mxu0 }
  0xea   :  { %v378_v47 = vadd.f32 %v490_v44, %v337_v43  ;;  %v471_v48 = vadd.f32 %v470_v46, %v469_v42  ;;  %v492_v49 = vpop.f32.mrf.mxu1 }
  0xeb   :  { %v493_v51 = vadd.f32 %v492_v49, %v491_v45 }
  0xec   :  { %v340_v50 = vadd.f32 %v471_v48, %v404_v38  ;;  %v386_v52 = vmul.f32 0.2, %v378_v47  ;;  %vm384_vm0 = vcmp.gt.f32.partialorder %v378_v47, 0.0 }
  0xee   :  { %v381_v53 = vadd.f32 %v493_v51, %v340_v50  ;;  %v388_v55 = vsel %vm384_vm0, %v378_v47, %v386_v52 }
  0xf0   :  { %vm385_vm1 = vcmp.gt.f32.partialorder %v381_v53, 0.0  ;;  %v387_v54 = vmul.f32 0.2, %v381_v53 }
  0xf2   :  { %v389_v56 = vsel %vm385_vm1, %v381_v53, %v387_v54 }
  0xf3   :  { %v448_v57 = vpack.c.bf16 %v389_v56, %v388_v55 }
  0xf5   :  { %449 = vst [vmem:[%s669_s3] sm:$0xff] %v448_v57  }

// kernel: _lambda_.27
= control target key start
LH: loop header
LB: loop body
LE: loop exit
PB: predicated region body
PF: predicated region fallthrough
CT: control target
= control target key end

     0   :  { %v642_v33 = vmov 0.0   ;;  %vm643_vm0 = vmmov 0   ;;  %vm341_vm1 = vcmask 523264   ;;  %s793_s1 = inlined_call_operand.vmem [shape: bf16[576,128], index: 1, kind: input, shape index: {}]   ;;  %s794_s0 = inlined_call_operand.vmem [shape: bf16[16,576], index: 0, kind: input, shape index: {}]   ;;  %s795_s2 = inlined_call_operand.vmem [shape: f32[1,128], index: 2, kind: input, shape index: {}]   ;;  %s796_s3 = inlined_call_operand.vmem [shape: bf16[16,128], index: 3, kind: output, shape index: {}]  }
   0x1   :  { %v599_v0 = vld [vmem:[%s793_s1 + $0x78] sm:$0xff]   ;;  %v603_v4 = vld [vmem:[%s793_s1 + $0x70] sm:$0xff]   ;;  %v607_v8 = vld [vmem:[%s793_s1 + $0x68] sm:$0xff]  }
   0x2   :  { %v600_v1 = vld [vmem:[%s793_s1 + $0x38] sm:$0xff]   ;;  %536 = vmatprep.subr.bf16.mxu0 %v599_v0  ;;  %v604_v5 = vld [vmem:[%s793_s1 + $0x30] sm:$0xff]   ;;  %v608_v9 = vld [vmem:[%s793_s1 + $0x28] sm:$0xff]  }
   0x3   :  { %v601_v2 = vld [vmem:[%s793_s1 + $0xf8] sm:$0xff]   ;;  %537 = vmatpush3.bf16.msra.mxu0 %v600_v1  ;;  %v605_v6 = vld [vmem:[%s793_s1 + $0xf0] sm:$0xff]   ;;  %v609_v10 = vld [vmem:[%s793_s1 + $0xe8] sm:$0xff]  }
   0x4   :  { %v602_v3 = vld [vmem:[%s793_s1 + $0xb8] sm:$0xff]   ;;  %558 = vmatprep.subr.bf16.mxu1 %v601_v2  ;;  %538 = vmatprep.subr.bf16.mxu0 %v603_v4  ;;  %v606_v7 = vld [vmem:[%s793_s1 + $0xb0] sm:$0xff]   ;;  %v610_v11 = vld [vmem:[%s793_s1 + $0xa8] sm:$0xff]  }
   0x5   :  { %559 = vmatpush3.bf16.msra.mxu1 %v602_v3  ;;  %v611_v12 = vld [vmem:[%s793_s1 + $0x60] sm:$0xff]   ;;  %v615_v16 = vld [vmem:[%s793_s1 + $0x58] sm:$0xff]   ;;  %v619_v20 = vld [vmem:[%s793_s1 + $0x50] sm:$0xff]  }
   0x6   :  { %560 = vmatprep.subr.bf16.mxu1 %v605_v6  ;;  %v612_v13 = vld [vmem:[%s793_s1 + $0x20] sm:$0xff]   ;;  %v616_v17 = vld [vmem:[%s793_s1 + $0x18] sm:$0xff]   ;;  %v620_v21 = vld [vmem:[%s793_s1 + $0x10] sm:$0xff]  }
   0x7   :  { %539 = vmatpush3.bf16.msra.mxu0 %v604_v5  ;;  %v613_v14 = vld [vmem:[%s793_s1 + $0xe0] sm:$0xff]   ;;  %v617_v18 = vld [vmem:[%s793_s1 + $0xd8] sm:$0xff]   ;;  %v621_v22 = vld [vmem:[%s793_s1 + $0xd0] sm:$0xff]  }
   0x8   :  { %540 = vmatprep.subr.bf16.mxu0 %v607_v8  ;;  %v614_v15 = vld [vmem:[%s793_s1 + $0xa0] sm:$0xff]   ;;  %v618_v19 = vld [vmem:[%s793_s1 + $0x98] sm:$0xff]   ;;  %v622_v23 = vld [vmem:[%s793_s1 + $0x90] sm:$0xff]  }
   0x9   :  { %561 = vmatpush3.bf16.msra.mxu1 %v606_v7  ;;  %v623_v24 = vld [vmem:[%s793_s1 + $0x48] sm:$0xff]   ;;  %v627_v28 = vld [vmem:[%s793_s1 + $0x40] sm:$0xff]   ;;  %v637_v37 = vld [vmem:[%s793_s1 + $0x118] sm:$0xff]  }
   0xa   :  { %562 = vmatprep.subr.bf16.mxu1 %v609_v10  ;;  %v624_v25 = vld [vmem:[%s793_s1 + $0x8] sm:$0xff]   ;;  %v628_v29 = vld [vmem:[%s793_s1] sm:$0xff]   ;;  %v638_v38 = vld [vmem:[%s793_s1 + $0x110] sm:$0xff]  }
   0xb   :  { %541 = vmatpush3.bf16.msra.mxu0 %v608_v9  ;;  %v625_v26 = vld [vmem:[%s793_s1 + $0xc8] sm:$0xff]   ;;  %v629_v30 = vld [vmem:[%s793_s1 + $0xc0] sm:$0xff]  }
   0xc   :  { %542 = vmatprep.subr.bf16.mxu0 %v611_v12  ;;  %v626_v27 = vld [vmem:[%s793_s1 + $0x88] sm:$0xff]   ;;  %v630_v31 = vld [vmem:[%s794_s0] ss:$20 sps:$4 sm:$0xff]   ;;  %v632_v32 = vld [vmem:[%s794_s0 + $0x4] ss:$20 sps:$4 sm:$0xff]  }
   0xd   :  { %563 = vmatpush3.bf16.msra.mxu1 %v610_v11  ;;  %v633_v34 = vld [vmem:[%s793_s1 + $0x80] sm:$0xff]   ;;  %377 = vmatprep.mubr.bf16.mxu0 %v632_v32  ;;  %v634_v35 = vld [vmem:[%s794_s0 + $0x8] ss:$20 sps:$4 sm:$0xff]  }
   0xe   :  { %564 = vmatprep.subr.bf16.mxu1 %v613_v14  ;;  %v636_v36 = vld [vmem:[%s794_s0 + $0xc] ss:$20 sps:$4 sm:$0xff]   ;;  %v641_v41 = vld [vmem:[%s794_s0 + $0x10] ss:$20 sps:$4 sm:$0xff]  }
   0xf   :  { %543 = vmatpush3.bf16.msra.mxu0 %v612_v13  ;;  %418 = vmatprep.mubr.bf16.mxu1 %v636_v36  ;;  %v639_v39 = vld [vmem:[%s793_s1 + $0x108] sm:$0xff]   ;;  %v640_v40 = vld [vmem:[%s793_s1 + $0x100] sm:$0xff]  }
  0x10   :  { %544 = vmatprep.subr.bf16.mxu0 %v615_v16  ;;  %v484_v50 = vld [vmem:[%s795_s2] ss:$0 sm:$0xff] }
  0x11   :  { %565 = vmatpush3.bf16.msra.mxu1 %v614_v15 }
  0x12   :  { %566 = vmatprep.subr.bf16.mxu1 %v617_v18 }
  0x13   :  { %545 = vmatpush3.bf16.msra.mxu0 %v616_v17 }
  0x14   :  { %546 = vmatprep.subr.bf16.mxu0 %v619_v20 }
  0x15   :  { %567 = vmatpush3.bf16.msra.mxu1 %v618_v19 }
  0x16   :  { %568 = vmatprep.subr.bf16.mxu1 %v621_v22 }
  0x17   :  { %547 = vmatpush3.bf16.msra.mxu0 %v620_v21 }
  0x18   :  { %548 = vmatprep.subr.bf16.mxu0 %v623_v24 }
  0x19   :  { %569 = vmatpush3.bf16.msra.mxu1 %v622_v23 }
  0x1a   :  { %570 = vmatprep.subr.bf16.mxu1 %v625_v26 }
  0x1b   :  { %549 = vmatpush3.bf16.msra.mxu0 %v624_v25 }
  0x1c   :  { %550 = vmatprep.subr.bf16.mxu0 %v627_v28 }
  0x1d   :  { %571 = vmatpush3.bf16.msra.mxu1 %v626_v27 }
  0x1e   :  { %572 = vmatprep.subr.bf16.mxu1 %v629_v30 }
  0x1f   :  { %551 = vmatpush3.bf16.msra.mxu0 %v628_v29 }
  0x20   :  { %585 = vmatprep.subr.bf16.mxu0 %v642_v33 }
  0x21   :  { %573 = vmatpush3.bf16.msra.mxu1 %v633_v34 }
  0x22   :  { %378 = vmatmul.mubr.bf16.vlgmr.msra.gmra.mxu0 %v630_v31 }
  0x23   :  { %593 = vmatprep.mubr.msk.bf16.mxu0 %vm643_vm0, %v642_v33  ;;  %586 = vmatpush3.bf16.msra.mxu0 %v637_v37 }
  0x24   :  { %419 = vmatmul.mubr.bf16.vlgmr.msra.gmra.mxu1 %v634_v35  ;;  %587 = vmatprep.subr.bf16.mxu0 %v642_v33 }
  0x27   :  { %588 = vmatpush3.bf16.msra.mxu0 %v638_v38 }
  0x28   :  { %589 = vmatprep.subr.bf16.mxu0 %v642_v33 }
  0x2b   :  { %590 = vmatpush3.bf16.msra.mxu0 %v639_v39 }
  0x2c   :  { %591 = vmatprep.subr.bf16.mxu0 %v642_v33 }
  0x2f   :  { %592 = vmatpush3.bf16.msra.mxu0 %v640_v40 }
  0x32   :  { %594 = vmatmul.mubr.msk.bf16.vlgmr.msra.gmra.mxu0 %vm341_vm1, %v641_v41 }
  0xe2   :  { %v552_v42 = vpop.f32.mrf.mxu0 }
  0xe4   :  { %v553_v43 = vpop.f32.mrf.mxu0  ;;  %v574_v44 = vpop.f32.mrf.mxu1 }
  0xe5   :  { %v554_v49 = vadd.f32 %v553_v43, %v552_v42 }
  0xe6   :  { %v555_v45 = vpop.f32.mrf.mxu0  ;;  %v575_v46 = vpop.f32.mrf.mxu1 }
  0xe7   :  { %v380_v53 = vadd.f32 %v554_v49, %v484_v50  ;;  %v576_v54 = vadd.f32 %v575_v46, %v574_v44 }
  0xe8   :  { %v556_v47 = vpop.f32.mrf.mxu0  ;;  %v577_v48 = vpop.f32.mrf.mxu1 }
  0xe9   :  { %v557_v51 = vadd.f32 %v556_v47, %v555_v45  ;;  %v421_v58 = vadd.f32 %v576_v54, %v380_v53 }
  0xea   :  { %v578_v52 = vpop.f32.mrf.mxu1 }
  0xeb   :  { %v383_v55 = vadd.f32 %v557_v51, %v484_v50  ;;  %v579_v56 = vadd.f32 %v578_v52, %v577_v48 }
  0xed   :  { %v424_v61 = vadd.f32 %v579_v56, %v383_v55 }
  0xf2   :  { %v461_v57 = vpop.f32.mrf.mxu0 }
  0xf3   :  { %v462_v60 = vadd.f32 %v461_v57, %v421_v58 }
  0xf4   :  { %v595_v59 = vpop.f32.mrf.mxu0 }
  0xf5   :  { %v468_v1 = vmax.f32 %v462_v60, 0.0 }
  0xf6   :  { %v464_v62 = vpop.f32.mrf.mxu0 }
  0xf7   :  { %v465_v63 = vadd.f32 %v464_v62, %v424_v61 }
  0xf8   :  { %v596_v0 = vpop.f32.mrf.mxu0 }
  0xf9   :  { %v469_v2 = vmax.f32 %v465_v63, 0.0 }
  0xfb   :  { %v534_v3 = vpack.c.bf16 %v469_v2, %v468_v1 }
  0xfd   :  { %535 = vst [vmem:[%s796_s3] sm:$0xff] %v534_v3  }

// kernel: _lambda_.28
= control target key start
LH: loop header
LB: loop body
LE: loop exit
PB: predicated region body
PF: predicated region fallthrough
CT: control target
= control target key end

     0   :  { %v269_v0 = vmov 0   ;;  %vm116_vm0 = vcmask 130048   ;;  %s338_s1 = inlined_call_operand.vmem [shape: bf16[144,128], index: 1, kind: input, shape index: {}]   ;;  %s339_s0 = inlined_call_operand.vmem [shape: bf16[32,144], index: 0, kind: input, shape index: {}]   ;;  %s340_s2 = inlined_call_operand.vmem [shape: f32[1,128], index: 2, kind: input, shape index: {}]   ;;  %s341_s3 = inlined_call_operand.vmem [shape: bf16[32,128], index: 3, kind: output, shape index: {}]  }
   0x1   :  { %123 = vmatprep.subr.bf16.mxu0 %v269_v0  ;;  %235 = vmatprep.subr.bf16.mxu1 %v269_v0  ;;  %v254_v1 = vld [vmem:[%s338_s1 + $0x38] sm:$0xff]   ;;  %v255_v2 = vld [vmem:[%s338_s1 + $0x30] sm:$0xff]   ;;  %v256_v3 = vld [vmem:[%s338_s1 + $0x28] sm:$0xff]  }
   0x2   :  { %124 = vmatpush1.bf16.msra.mxu0 %v254_v1  ;;  %244 = vmatpush1.bf16.msra.mxu1 %v254_v1  ;;  %v257_v4 = vld [vmem:[%s338_s1 + $0x20] sm:$0xff]   ;;  %v268_v6 = vld [vmem:[%s339_s0 + $0x14] ss:$8 sps:$4 sm:$0xff]   ;;  %v260_v9 = vld [vmem:[%s338_s1 + $0x8] sm:$0xff]  }
   0x3   :  { %125 = vmatprep.subr.bf16.mxu0 %v269_v0  ;;  %236 = vmatprep.subr.bf16.mxu1 %v269_v0  ;;  %v265_v5 = vld [vmem:[%s339_s0 + $0x4] ss:$8 sps:$4 sm:$0xff]   ;;  %v258_v7 = vld [vmem:[%s338_s1 + $0x18] sm:$0xff]   ;;  %v259_v8 = vld [vmem:[%s338_s1 + $0x10] sm:$0xff]  }
   0x4   :  { %214 = vmatprep.mubr.msk.bf16.mxu0 %vm116_vm0, %v265_v5  ;;  %215 = vmatprep.mubr.msk.bf16.mxu1 %vm116_vm0, %v268_v6  ;;  %v261_v10 = vld [vmem:[%s338_s1] sm:$0xff]   ;;  %v266_v13 = vld [vmem:[%s339_s0 + $0x10] ss:$8 sps:$4 sm:$0xff]  }
   0x5   :  { %v262_v11 = vld [vmem:[%s338_s1 + $0x40] sm:$0xff]  }
   0x6   :  { %126 = vmatpush1.bf16.msra.mxu0 %v255_v2  ;;  %245 = vmatpush1.bf16.msra.mxu1 %v255_v2  ;;  %v263_v12 = vld [vmem:[%s339_s0] ss:$8 sps:$4 sm:$0xff]  }
   0x7   :  { %127 = vmatprep.subr.bf16.mxu0 %v269_v0  ;;  %237 = vmatprep.subr.bf16.mxu1 %v269_v0  ;;  %v200_v14 = vld [vmem:[%s340_s2] ss:$0 sm:$0xff] }
   0xa   :  { %128 = vmatpush1.bf16.msra.mxu0 %v256_v3  ;;  %246 = vmatpush1.bf16.msra.mxu1 %v256_v3 }
   0xb   :  { %129 = vmatprep.subr.bf16.mxu0 %v269_v0  ;;  %238 = vmatprep.subr.bf16.mxu1 %v269_v0 }
   0xe   :  { %130 = vmatpush1.bf16.msra.mxu0 %v257_v4  ;;  %247 = vmatpush1.bf16.msra.mxu1 %v257_v4 }
   0xf   :  { %131 = vmatprep.subr.bf16.mxu0 %v269_v0  ;;  %239 = vmatprep.subr.bf16.mxu1 %v269_v0 }
  0x12   :  { %132 = vmatpush1.bf16.msra.mxu0 %v258_v7  ;;  %248 = vmatpush1.bf16.msra.mxu1 %v258_v7 }
  0x13   :  { %133 = vmatprep.subr.bf16.mxu0 %v269_v0  ;;  %240 = vmatprep.subr.bf16.mxu1 %v269_v0 }
  0x16   :  { %134 = vmatpush1.bf16.msra.mxu0 %v259_v8  ;;  %249 = vmatpush1.bf16.msra.mxu1 %v259_v8 }
  0x17   :  { %135 = vmatprep.subr.bf16.mxu0 %v269_v0  ;;  %241 = vmatprep.subr.bf16.mxu1 %v269_v0 }
  0x1a   :  { %136 = vmatpush1.bf16.msra.mxu0 %v260_v9  ;;  %250 = vmatpush1.bf16.msra.mxu1 %v260_v9 }
  0x1b   :  { %137 = vmatprep.subr.bf16.mxu0 %v269_v0  ;;  %242 = vmatprep.subr.bf16.mxu1 %v269_v0 }
  0x1e   :  { %138 = vmatpush1.bf16.msra.mxu0 %v261_v10  ;;  %251 = vmatpush1.bf16.msra.mxu1 %v261_v10 }
  0x1f   :  { %153 = vmatprep.subr.bf16.mxu0 %v269_v0  ;;  %243 = vmatprep.subr.bf16.mxu1 %v269_v0 }
  0x22   :  { %154 = vmatpush2.bf16.msra.mxu0 %v262_v11  ;;  %252 = vmatpush2.bf16.msra.mxu1 %v262_v11 }
  0x25   :  { %156 = vmatmul.mubr.bf16.vlgmr.msra.gmra.mxu0 %v263_v12  ;;  %164 = vmatmul.mubr.bf16.vlgmr.msra.gmra.mxu1 %v266_v13 }
  0xe5   :  { %v157_v15 = vpop.f32.mrf.mxu0  ;;  %v165_v16 = vpop.f32.mrf.mxu1 }
  0xe6   :  { %v158_v19 = vadd.f32 %v200_v14, %v157_v15  ;;  %v166_v20 = vadd.f32 %v200_v14, %v165_v16 }
  0xe7   :  { %v159_v17 = vpop.f32.mrf.mxu0  ;;  %v167_v18 = vpop.f32.mrf.mxu1 }
  0xe8   :  { %v172_v27 = vmax.f32 %v158_v19, 0.0  ;;  %v174_v28 = vmax.f32 %v166_v20, 0.0 }
  0xe9   :  { %v160_v21 = vpop.f32.mrf.mxu0  ;;  %v168_v22 = vpop.f32.mrf.mxu1 }
  0xea   :  { %v161_v23 = vadd.f32 %v200_v14, %v160_v21  ;;  %v169_v24 = vadd.f32 %v200_v14, %v168_v22 }
  0xeb   :  { %v162_v25 = vpop.f32.mrf.mxu0  ;;  %v170_v26 = vpop.f32.mrf.mxu1 }
  0xec   :  { %v173_v29 = vmax.f32 %v161_v23, 0.0  ;;  %v175_v30 = vmax.f32 %v169_v24, 0.0 }
  0xee   :  { %v227_v31 = vpack.c.bf16 %v173_v29, %v172_v27  ;;  %v232_v32 = vpack.c.bf16 %v175_v30, %v174_v28 }
  0xf0   :  { %228 = vst [vmem:[%s341_s3] sm:$0xff] %v227_v31   ;;  %234 = vst [vmem:[%s341_s3 + $0x8] sm:$0xff] %v232_v32  }

// kernel: _lambda_.29
= control target key start
LH: loop header
LB: loop body
LE: loop exit
PB: predicated region body
PF: predicated region fallthrough
CT: control target
= control target key end

     0   :  { %vm204_vm0 = vcmask 261120   ;;  %s550_s1 = inlined_call_operand.vmem [shape: bf16[288,128], index: 1, kind: input, shape index: {}]   ;;  %s551_s0 = inlined_call_operand.vmem [shape: bf16[32,288], index: 0, kind: input, shape index: {}]   ;;  %s552_s2 = inlined_call_operand.vmem [shape: f32[1,128], index: 2, kind: input, shape index: {}]   ;;  %s553_s3 = inlined_call_operand.vmem [shape: bf16[32,128], index: 3, kind: output, shape index: {}]  }
   0x1   :  { %v423_v0 = vld [vmem:[%s550_s1 + $0x78] sm:$0xff]   ;;  %v425_v2 = vld [vmem:[%s550_s1 + $0x70] sm:$0xff]   ;;  %v427_v4 = vld [vmem:[%s550_s1 + $0x68] sm:$0xff]  }
   0x2   :  { %v424_v1 = vld [vmem:[%s550_s1 + $0x38] sm:$0xff]   ;;  %383 = vmatprep.subr.bf16.mxu0 %v423_v0  ;;  %v426_v3 = vld [vmem:[%s550_s1 + $0x30] sm:$0xff]   ;;  %v428_v5 = vld [vmem:[%s550_s1 + $0x28] sm:$0xff]  }
   0x3   :  { %384 = vmatpush3.bf16.msra.mxu0 %v424_v1  ;;  %v429_v6 = vld [vmem:[%s550_s1 + $0x60] sm:$0xff]   ;;  %v431_v8 = vld [vmem:[%s550_s1 + $0x58] sm:$0xff]   ;;  %v438_v10 = vld [vmem:[%s550_s1 + $0x88] sm:$0xff]  }
   0x4   :  { %385 = vmatprep.subr.bf16.mxu0 %v425_v2  ;;  %v430_v7 = vld [vmem:[%s550_s1 + $0x20] sm:$0xff]   ;;  %v432_v9 = vld [vmem:[%s550_s1 + $0x18] sm:$0xff]   ;;  %v433_v11 = vld [vmem:[%s550_s1 + $0x50] sm:$0xff]   ;;  %415 = vmatprep.subr.bf16.mxu1 %v438_v10 }
   0x5   :  { %v434_v12 = vld [vmem:[%s550_s1 + $0x10] sm:$0xff]   ;;  %v435_v13 = vld [vmem:[%s550_s1 + $0x48] sm:$0xff]   ;;  %416 = vmatpush3.bf16.msra.mxu1 %v438_v10  ;;  %v443_v15 = vld [vmem:[%s550_s1 + $0x80] sm:$0xff]  }
   0x6   :  { %v442_v14 = vld [vmem:[%s551_s0 + $0x4] ss:$12 sps:$4 sm:$0xff]   ;;  %v444_v16 = vld [vmem:[%s551_s0 + $0x8] ss:$12 sps:$4 sm:$0xff]   ;;  %417 = vmatprep.subr.bf16.mxu1 %v443_v15  ;;  %v445_v17 = vld [vmem:[%s551_s0 + $0x20] ss:$12 sps:$4 sm:$0xff]  }
   0x7   :  { %386 = vmatpush3.bf16.msra.mxu0 %v426_v3  ;;  %243 = vmatprep.mubr.bf16.mxu0 %v442_v14  ;;  %v436_v18 = vld [vmem:[%s550_s1 + $0x8] sm:$0xff]   ;;  %v437_v19 = vld [vmem:[%s550_s1 + $0x40] sm:$0xff]  }
   0x8   :  { %387 = vmatprep.subr.bf16.mxu0 %v427_v4  ;;  %419 = vmatprep.mubr.msk.bf16.mxu1 %vm204_vm0, %v444_v16  ;;  %v439_v20 = vld [vmem:[%s550_s1] sm:$0xff]   ;;  %v446_v22 = vld [vmem:[%s551_s0 + $0x1c] ss:$12 sps:$4 sm:$0xff]  }
   0x9   :  { %418 = vmatpush3.bf16.msra.mxu1 %v443_v15  ;;  %v440_v21 = vld [vmem:[%s551_s0] ss:$12 sps:$4 sm:$0xff]   ;;  %v448_v23 = vld [vmem:[%s551_s0 + $0x18] ss:$12 sps:$4 sm:$0xff]  }
   0xa   :  { %v337_v28 = vld [vmem:[%s552_s2] ss:$0 sm:$0xff] }
   0xb   :  { %388 = vmatpush3.bf16.msra.mxu0 %v428_v5 }
   0xc   :  { %389 = vmatprep.subr.bf16.mxu0 %v429_v6  ;;  %420 = vmatmul.mubr.msk.bf16.vlgmr.msra.gmra.mxu1 %vm204_vm0, %v445_v17 }
   0xf   :  { %390 = vmatpush3.bf16.msra.mxu0 %v430_v7 }
  0x10   :  { %391 = vmatprep.subr.bf16.mxu0 %v431_v8 }
  0x13   :  { %392 = vmatpush3.bf16.msra.mxu0 %v432_v9 }
  0x14   :  { %393 = vmatprep.subr.bf16.mxu0 %v433_v11 }
  0x17   :  { %394 = vmatpush3.bf16.msra.mxu0 %v434_v12 }
  0x18   :  { %395 = vmatprep.subr.bf16.mxu0 %v435_v13 }
  0x1b   :  { %396 = vmatpush3.bf16.msra.mxu0 %v436_v18 }
  0x1c   :  { %397 = vmatprep.subr.bf16.mxu0 %v437_v19 }
  0x1f   :  { %398 = vmatpush3.bf16.msra.mxu0 %v439_v20 }
  0x22   :  { %244 = vmatmul.mubr.bf16.vlgmr.msra.gmra.mxu0 %v440_v21 }
  0x23   :  { %251 = vmatprep.mubr.bf16.mxu0 %v446_v22 }
  0x2a   :  { %252 = vmatmul.mubr.bf16.gmra.mxu0 %v448_v23 }
  0xcc   :  { %v421_v24 = vpop.f32.mrf.mxu1 }
  0xce   :  { %v294_v26 = vpop.f32.mrf.mxu1 }
  0xd0   :  { %v422_v31 = vpop.f32.mrf.mxu1 }
  0xd2   :  { %v297_v36 = vpop.f32.mrf.mxu1 }
  0xe2   :  { %v399_v25 = vpop.f32.mrf.mxu0 }
  0xe4   :  { %v400_v27 = vpop.f32.mrf.mxu0 }
  0xe5   :  { %v401_v29 = vadd.f32 %v400_v27, %v399_v25 }
  0xe6   :  { %v402_v30 = vpop.f32.mrf.mxu0 }
  0xe7   :  { %v246_v32 = vadd.f32 %v401_v29, %v337_v28 }
  0xe8   :  { %v403_v33 = vpop.f32.mrf.mxu0 }
  0xe9   :  { %v404_v34 = vadd.f32 %v403_v33, %v402_v30  ;;  %v295_v37 = vadd.f32 %v294_v26, %v246_v32 }
  0xea   :  { %v405_v35 = vpop.f32.mrf.mxu0 }
  0xeb   :  { %v249_v38 = vadd.f32 %v404_v34, %v337_v28  ;;  %v309_v43 = vmax.f32 %v295_v37, 0.0 }
  0xec   :  { %v406_v39 = vpop.f32.mrf.mxu0 }
  0xed   :  { %v407_v40 = vadd.f32 %v406_v39, %v405_v35  ;;  %v298_v41 = vadd.f32 %v297_v36, %v249_v38 }
  0xee   :  { %v408_v42 = vpop.f32.mrf.mxu0 }
  0xef   :  { %v254_v44 = vadd.f32 %v407_v40, %v337_v28  ;;  %v310_v45 = vmax.f32 %v298_v41, 0.0 }
  0xf0   :  { %v409_v46 = vpop.f32.mrf.mxu0 }
  0xf1   :  { %v375_v47 = vpack.c.bf16 %v310_v45, %v309_v43  ;;  %v410_v48 = vadd.f32 %v409_v46, %v408_v42  ;;  %v303_v49 = vadd.f32 %v421_v24, %v254_v44 }
  0xf3   :  { %376 = vst [vmem:[%s553_s3] sm:$0xff] %v375_v47   ;;  %v257_v50 = vadd.f32 %v410_v48, %v337_v28  ;;  %v311_v52 = vmax.f32 %v303_v49, 0.0 }
  0xf5   :  { %v306_v51 = vadd.f32 %v422_v31, %v257_v50 }
  0xf7   :  { %v312_v53 = vmax.f32 %v306_v51, 0.0 }
  0xf9   :  { %v380_v54 = vpack.c.bf16 %v312_v53, %v311_v52 }
  0xfb   :  { %382 = vst [vmem:[%s553_s3 + $0x8] sm:$0xff] %v380_v54  }

// kernel: _lambda_.30
= control target key start
LH: loop header
LB: loop body
LE: loop exit
PB: predicated region body
PF: predicated region fallthrough
CT: control target
= control target key end

     0   :  { %vm139_vm0 = vcmask 1043456   ;;  %vm114_vm1 = vcmask 588800   ;;  %s599_s1 = inlined_call_operand.vmem [shape: bf16[72,128], index: 1, kind: input, shape index: {}]   ;;  %s600_s0 = inlined_call_operand.vmem [shape: bf16[128,72], index: 0, kind: input, shape index: {}]   ;;  %s601_s2 = inlined_call_operand.vmem [shape: f32[1,128], index: 2, kind: input, shape index: {}]   ;;  %s602_s3 = inlined_call_operand.vmem [shape: bf16[128,128], index: 3, kind: output, shape index: {}]  }
   0x1   :  { %v492_v0 = vld [vmem:[%s599_s1 + $0x20] ss:$0 sps:$4 sm:$0xff]   ;;  %v493_v1 = vld [vmem:[%s599_s1 + $0x18] sm:$0xff]   ;;  %v494_v3 = vld [vmem:[%s599_s1 + $0x10] sm:$0xff]  }
   0x2   :  { %490 = vmatprep.subr.msk.bf16.mxu0 %vm139_vm0, %v492_v0  ;;  %491 = vmatprep.subr.msk.bf16.mxu1 %vm139_vm0, %v492_v0  ;;  %v141_v2 = vsel %vm139_vm0, %v492_v0, 0  ;;  %v497_v4 = vld [vmem:[%s600_s0] sm:$0xff]   ;;  %v495_v6 = vld [vmem:[%s599_s1 + $0x8] sm:$0xff]   ;;  %v501_v10 = vld [vmem:[%s600_s0 + $0x10] sm:$0xff]  }
   0x3   :  { %455 = vmatpush3.bf16.msra.mxu0 %v141_v2  ;;  %485 = vmatpush3.bf16.msra.mxu1 %v141_v2  ;;  %v498_v5 = vld [vmem:[%s600_s0 + $0x20] sm:$0xff]   ;;  %v499_v8 = vld [vmem:[%s600_s0 + $0x8] sm:$0xff]   ;;  %v502_v11 = vld [vmem:[%s600_s0 + $0x30] sm:$0xff]  }
   0x4   :  { %456 = vmatprep.subr.bf16.mxu0 %v493_v1  ;;  %481 = vmatprep.subr.bf16.mxu1 %v493_v1  ;;  %v496_v7 = vld [vmem:[%s599_s1] sm:$0xff]   ;;  %v500_v9 = vld [vmem:[%s600_s0 + $0x28] sm:$0xff]   ;;  %v503_v12 = vld [vmem:[%s600_s0 + $0x18] sm:$0xff]  }
   0x5   :  { %464 = vmatprep.mubr.msk.bf16.mxu0 %vm114_vm1, %v497_v4  ;;  %472 = vmatprep.mubr.msk.bf16.mxu1 %vm114_vm1, %v498_v5  ;;  %v504_v13 = vld [vmem:[%s600_s0 + $0x38] sm:$0xff]   ;;  %v340_v14 = vld [vmem:[%s601_s2] ss:$0 sm:$0xff] }
   0x7   :  { %457 = vmatpush3.bf16.msra.mxu0 %v493_v1  ;;  %486 = vmatpush3.bf16.msra.mxu1 %v493_v1 }
   0x8   :  { %458 = vmatprep.subr.bf16.mxu0 %v494_v3  ;;  %482 = vmatprep.subr.bf16.mxu1 %v494_v3 }
   0xb   :  { %459 = vmatpush3.bf16.msra.mxu0 %v494_v3  ;;  %487 = vmatpush3.bf16.msra.mxu1 %v494_v3 }
   0xc   :  { %460 = vmatprep.subr.bf16.mxu0 %v495_v6  ;;  %483 = vmatprep.subr.bf16.mxu1 %v495_v6 }
   0xf   :  { %461 = vmatpush3.bf16.msra.mxu0 %v495_v6  ;;  %488 = vmatpush3.bf16.msra.mxu1 %v495_v6 }
  0x10   :  { %462 = vmatprep.subr.bf16.mxu0 %v496_v7  ;;  %484 = vmatprep.subr.bf16.mxu1 %v496_v7 }
  0x13   :  { %463 = vmatpush3.bf16.msra.mxu0 %v496_v7  ;;  %489 = vmatpush3.bf16.msra.mxu1 %v496_v7 }
  0x16   :  { %465 = vmatmul.mubr.msk.bf16.vlgmr.msra.gmra.mxu0 %vm114_vm1, %v499_v8  ;;  %473 = vmatmul.mubr.msk.bf16.vlgmr.msra.gmra.mxu1 %vm114_vm1, %v500_v9 }
  0x17   :  { %468 = vmatprep.mubr.msk.bf16.mxu0 %vm114_vm1, %v501_v10  ;;  %476 = vmatprep.mubr.msk.bf16.mxu1 %vm114_vm1, %v502_v11 }
  0x1e   :  { %469 = vmatmul.mubr.msk.bf16.gmra.mxu0 %vm114_vm1, %v503_v12  ;;  %477 = vmatmul.mubr.msk.bf16.gmra.mxu1 %vm114_vm1, %v504_v13 }
  0xd6   :  { %v466_v15 = vpop.f32.mrf.mxu0  ;;  %v474_v16 = vpop.f32.mrf.mxu1 }
  0xd7   :  { %v186_v17 = vadd.f32 %v466_v15, %v340_v14  ;;  %v218_v18 = vadd.f32 %v474_v16, %v340_v14 }
  0xd8   :  { %v177_v19 = vpop.f32.mrf.mxu0  ;;  %v209_v20 = vpop.f32.mrf.mxu1 }
  0xd9   :  { %v178_v21 = vadd.f32 %v340_v14, %v177_v19  ;;  %v210_v22 = vadd.f32 %v340_v14, %v209_v20  ;;  %v242_v27 = vmax.f32 %v186_v17, 0.0  ;;  %v250_v28 = vmax.f32 %v218_v18, 0.0 }
  0xda   :  { %v467_v23 = vpop.f32.mrf.mxu0  ;;  %v475_v24 = vpop.f32.mrf.mxu1 }
  0xdb   :  { %v189_v25 = vadd.f32 %v467_v23, %v340_v14  ;;  %v221_v26 = vadd.f32 %v475_v24, %v340_v14  ;;  %v240_v35 = vmax.f32 %v178_v21, 0.0  ;;  %v248_v36 = vmax.f32 %v210_v22, 0.0 }
  0xdc   :  { %v180_v29 = vpop.f32.mrf.mxu0  ;;  %v212_v30 = vpop.f32.mrf.mxu1 }
  0xdd   :  { %v243_v31 = vmax.f32 %v189_v25, 0.0  ;;  %v251_v32 = vmax.f32 %v221_v26, 0.0  ;;  %v181_v33 = vadd.f32 %v340_v14, %v180_v29  ;;  %v213_v34 = vadd.f32 %v340_v14, %v212_v30 }
  0xde   :  { %v470_v37 = vpop.f32.mrf.mxu0  ;;  %v478_v38 = vpop.f32.mrf.mxu1 }
  0xdf   :  { %v402_v39 = vpack.c.bf16 %v243_v31, %v242_v27  ;;  %v422_v40 = vpack.c.bf16 %v251_v32, %v250_v28  ;;  %v241_v41 = vmax.f32 %v181_v33, 0.0  ;;  %v249_v42 = vmax.f32 %v213_v34, 0.0 }
  0xe0   :  { %v202_v43 = vadd.f32 %v470_v37, %v340_v14  ;;  %v234_v44 = vadd.f32 %v478_v38, %v340_v14  ;;  %v193_v45 = vpop.f32.mrf.mxu0  ;;  %v225_v46 = vpop.f32.mrf.mxu1 }
  0xe1   :  { %434 = vst [vmem:[%s602_s3 + $0x8] sm:$0xff] %v402_v39   ;;  %438 = vst [vmem:[%s602_s3 + $0x28] sm:$0xff] %v422_v40   ;;  %v397_v47 = vpack.c.bf16 %v241_v41, %v240_v35  ;;  %v417_v48 = vpack.c.bf16 %v249_v42, %v248_v36  ;;  %v194_v49 = vadd.f32 %v340_v14, %v193_v45 }
  0xe2   :  { %v226_v50 = vadd.f32 %v340_v14, %v225_v46  ;;  %v471_v51 = vpop.f32.mrf.mxu0  ;;  %v479_v52 = vpop.f32.mrf.mxu1  ;;  %v246_v55 = vmax.f32 %v202_v43, 0.0  ;;  %v254_v56 = vmax.f32 %v234_v44, 0.0 }
  0xe3   :  { %398 = vst [vmem:[%s602_s3] sm:$0xff] %v397_v47   ;;  %437 = vst [vmem:[%s602_s3 + $0x20] sm:$0xff] %v417_v48   ;;  %v205_v53 = vadd.f32 %v471_v51, %v340_v14  ;;  %v237_v54 = vadd.f32 %v479_v52, %v340_v14  ;;  %v244_v63 = vmax.f32 %v194_v49, 0.0 }
  0xe4   :  { %v196_v57 = vpop.f32.mrf.mxu0  ;;  %v228_v58 = vpop.f32.mrf.mxu1  ;;  %v252_v0 = vmax.f32 %v226_v50, 0.0 }
  0xe5   :  { %v247_v59 = vmax.f32 %v205_v53, 0.0  ;;  %v255_v60 = vmax.f32 %v237_v54, 0.0  ;;  %v197_v61 = vadd.f32 %v340_v14, %v196_v57  ;;  %v229_v62 = vadd.f32 %v340_v14, %v228_v58 }
  0xe7   :  { %v412_v1 = vpack.c.bf16 %v247_v59, %v246_v55  ;;  %v432_v2 = vpack.c.bf16 %v255_v60, %v254_v56  ;;  %v245_v3 = vmax.f32 %v197_v61, 0.0  ;;  %v253_v4 = vmax.f32 %v229_v62, 0.0 }
  0xe9   :  { %436 = vst [vmem:[%s602_s3 + $0x18] sm:$0xff] %v412_v1   ;;  %440 = vst [vmem:[%s602_s3 + $0x38] sm:$0xff] %v432_v2   ;;  %v407_v5 = vpack.c.bf16 %v245_v3, %v244_v63  ;;  %v427_v6 = vpack.c.bf16 %v253_v4, %v252_v0 }
  0xeb   :  { %435 = vst [vmem:[%s602_s3 + $0x10] sm:$0xff] %v407_v5   ;;  %439 = vst [vmem:[%s602_s3 + $0x30] sm:$0xff] %v427_v6  }

// kernel: _lambda_.31
= control target key start
LH: loop header
LB: loop body
LE: loop exit
PB: predicated region body
PF: predicated region fallthrough
CT: control target
= control target key end

     0   :  { %v569_v0 = vmov 0   ;;  %vm182_vm0 = vcmask 130048   ;;  %s718_s1 = inlined_call_operand.vmem [shape: bf16[144,128], index: 1, kind: input, shape index: {}]   ;;  %s719_s0 = inlined_call_operand.vmem [shape: bf16[128,144], index: 0, kind: input, shape index: {}]   ;;  %s720_s2 = inlined_call_operand.vmem [shape: f32[1,128], index: 2, kind: input, shape index: {}]   ;;  %s721_s3 = inlined_call_operand.vmem [shape: bf16[128,128], index: 3, kind: output, shape index: {}]  }
   0x1   :  { %207 = vmatprep.subr.bf16.mxu0 %v569_v0  ;;  %517 = vmatprep.subr.bf16.mxu1 %v569_v0  ;;  %v536_v1 = vld [vmem:[%s718_s1 + $0x38] sm:$0xff]   ;;  %v537_v2 = vld [vmem:[%s718_s1 + $0x30] sm:$0xff]   ;;  %v538_v3 = vld [vmem:[%s718_s1 + $0x28] sm:$0xff]  }
   0x2   :  { %208 = vmatpush1.bf16.msra.mxu0 %v536_v1  ;;  %526 = vmatpush1.bf16.msra.mxu1 %v536_v1  ;;  %v539_v4 = vld [vmem:[%s718_s1 + $0x20] sm:$0xff]   ;;  %v540_v7 = vld [vmem:[%s718_s1 + $0x18] sm:$0xff]   ;;  %v541_v8 = vld [vmem:[%s718_s1 + $0x10] sm:$0xff]  }
   0x3   :  { %209 = vmatprep.subr.bf16.mxu0 %v569_v0  ;;  %518 = vmatprep.subr.bf16.mxu1 %v569_v0  ;;  %v547_v5 = vld [vmem:[%s719_s0 + $0x4] ss:$8 sps:$4 sm:$0xff]   ;;  %v545_v12 = vld [vmem:[%s719_s0] ss:$8 sps:$4 sm:$0xff]   ;;  %v551_v14 = vld [vmem:[%s719_s0 + $0x14] ss:$8 sps:$4 sm:$0xff]  }
   0x4   :  { %v550_v6 = vld [vmem:[%s719_s0 + $0x44] ss:$8 sps:$4 sm:$0xff]   ;;  %430 = vmatprep.mubr.msk.bf16.mxu0 %vm182_vm0, %v547_v5  ;;  %v548_v13 = vld [vmem:[%s719_s0 + $0x40] ss:$8 sps:$4 sm:$0xff]   ;;  %v553_v15 = vld [vmem:[%s719_s0 + $0x54] ss:$8 sps:$4 sm:$0xff]  }
   0x5   :  { %434 = vmatprep.mubr.msk.bf16.mxu1 %vm182_vm0, %v550_v6  ;;  %v542_v9 = vld [vmem:[%s718_s1 + $0x8] sm:$0xff]   ;;  %v543_v10 = vld [vmem:[%s718_s1] sm:$0xff]   ;;  %v555_v16 = vld [vmem:[%s719_s0 + $0x10] ss:$8 sps:$4 sm:$0xff]  }
   0x6   :  { %210 = vmatpush1.bf16.msra.mxu0 %v537_v2  ;;  %527 = vmatpush1.bf16.msra.mxu1 %v537_v2  ;;  %v544_v11 = vld [vmem:[%s718_s1 + $0x40] sm:$0xff]   ;;  %v556_v17 = vld [vmem:[%s719_s0 + $0x50] ss:$8 sps:$4 sm:$0xff]   ;;  %v563_v22 = vld [vmem:[%s719_s0 + $0x34] ss:$8 sps:$4 sm:$0xff]  }
   0x7   :  { %211 = vmatprep.subr.bf16.mxu0 %v569_v0  ;;  %519 = vmatprep.subr.bf16.mxu1 %v569_v0  ;;  %v557_v18 = vld [vmem:[%s719_s0 + $0x24] ss:$8 sps:$4 sm:$0xff]   ;;  %v561_v20 = vld [vmem:[%s719_s0 + $0x20] ss:$8 sps:$4 sm:$0xff]   ;;  %v565_v23 = vld [vmem:[%s719_s0 + $0x74] ss:$8 sps:$4 sm:$0xff]  }
   0x8   :  { %v559_v19 = vld [vmem:[%s719_s0 + $0x64] ss:$8 sps:$4 sm:$0xff]   ;;  %v562_v21 = vld [vmem:[%s719_s0 + $0x60] ss:$8 sps:$4 sm:$0xff]   ;;  %v567_v24 = vld [vmem:[%s719_s0 + $0x30] ss:$8 sps:$4 sm:$0xff]  }
   0x9   :  { %v568_v25 = vld [vmem:[%s719_s0 + $0x70] ss:$8 sps:$4 sm:$0xff]   ;;  %v676_v26 = vld [vmem:[%s720_s2] ss:$0 sm:$0xff] }
   0xa   :  { %212 = vmatpush1.bf16.msra.mxu0 %v538_v3  ;;  %528 = vmatpush1.bf16.msra.mxu1 %v538_v3 }
   0xb   :  { %213 = vmatprep.subr.bf16.mxu0 %v569_v0  ;;  %520 = vmatprep.subr.bf16.mxu1 %v569_v0 }
   0xe   :  { %214 = vmatpush1.bf16.msra.mxu0 %v539_v4  ;;  %529 = vmatpush1.bf16.msra.mxu1 %v539_v4 }
   0xf   :  { %215 = vmatprep.subr.bf16.mxu0 %v569_v0  ;;  %521 = vmatprep.subr.bf16.mxu1 %v569_v0 }
  0x12   :  { %216 = vmatpush1.bf16.msra.mxu0 %v540_v7  ;;  %530 = vmatpush1.bf16.msra.mxu1 %v540_v7 }
  0x13   :  { %217 = vmatprep.subr.bf16.mxu0 %v569_v0  ;;  %522 = vmatprep.subr.bf16.mxu1 %v569_v0 }
  0x16   :  { %218 = vmatpush1.bf16.msra.mxu0 %v541_v8  ;;  %531 = vmatpush1.bf16.msra.mxu1 %v541_v8 }
  0x17   :  { %219 = vmatprep.subr.bf16.mxu0 %v569_v0  ;;  %523 = vmatprep.subr.bf16.mxu1 %v569_v0 }
  0x1a   :  { %220 = vmatpush1.bf16.msra.mxu0 %v542_v9  ;;  %532 = vmatpush1.bf16.msra.mxu1 %v542_v9 }
  0x1b   :  { %221 = vmatprep.subr.bf16.mxu0 %v569_v0  ;;  %524 = vmatprep.subr.bf16.mxu1 %v569_v0 }
  0x1e   :  { %222 = vmatpush1.bf16.msra.mxu0 %v543_v10  ;;  %533 = vmatpush1.bf16.msra.mxu1 %v543_v10 }
  0x1f   :  { %237 = vmatprep.subr.bf16.mxu0 %v569_v0  ;;  %525 = vmatprep.subr.bf16.mxu1 %v569_v0 }
  0x22   :  { %238 = vmatpush2.bf16.msra.mxu0 %v544_v11  ;;  %534 = vmatpush2.bf16.msra.mxu1 %v544_v11 }
  0x25   :  { %240 = vmatmul.mubr.bf16.vlgmr.msra.gmra.mxu0 %v545_v12  ;;  %272 = vmatmul.mubr.bf16.vlgmr.msra.gmra.mxu1 %v548_v13 }
  0x26   :  { %431 = vmatprep.mubr.msk.bf16.mxu0 %vm182_vm0, %v551_v14  ;;  %435 = vmatprep.mubr.msk.bf16.mxu1 %vm182_vm0, %v553_v15 }
  0x2d   :  { %248 = vmatmul.mubr.bf16.gmra.mxu0 %v555_v16  ;;  %280 = vmatmul.mubr.bf16.gmra.mxu1 %v556_v17 }
  0x2e   :  { %432 = vmatprep.mubr.msk.bf16.mxu0 %vm182_vm0, %v557_v18  ;;  %436 = vmatprep.mubr.msk.bf16.mxu1 %vm182_vm0, %v559_v19 }
  0x35   :  { %256 = vmatmul.mubr.bf16.gmra.mxu0 %v561_v20  ;;  %288 = vmatmul.mubr.bf16.gmra.mxu1 %v562_v21 }
  0x36   :  { %433 = vmatprep.mubr.msk.bf16.mxu0 %vm182_vm0, %v563_v22  ;;  %437 = vmatprep.mubr.msk.bf16.mxu1 %vm182_vm0, %v565_v23 }
  0x3d   :  { %264 = vmatmul.mubr.bf16.gmra.mxu0 %v567_v24  ;;  %296 = vmatmul.mubr.bf16.gmra.mxu1 %v568_v25 }
  0xe5   :  { %v241_v27 = vpop.f32.mrf.mxu0  ;;  %v273_v28 = vpop.f32.mrf.mxu1 }
  0xe6   :  { %v242_v31 = vadd.f32 %v676_v26, %v241_v27  ;;  %v274_v32 = vadd.f32 %v676_v26, %v273_v28 }
  0xe7   :  { %v243_v29 = vpop.f32.mrf.mxu0  ;;  %v275_v30 = vpop.f32.mrf.mxu1 }
  0xe8   :  { %v304_v39 = vmax.f32 %v242_v31, 0.0  ;;  %v312_v40 = vmax.f32 %v274_v32, 0.0 }
  0xe9   :  { %v244_v33 = vpop.f32.mrf.mxu0  ;;  %v276_v34 = vpop.f32.mrf.mxu1 }
  0xea   :  { %v245_v35 = vadd.f32 %v676_v26, %v244_v33  ;;  %v277_v36 = vadd.f32 %v676_v26, %v276_v34 }
  0xeb   :  { %v246_v37 = vpop.f32.mrf.mxu0  ;;  %v278_v38 = vpop.f32.mrf.mxu1 }
  0xec   :  { %v305_v41 = vmax.f32 %v245_v35, 0.0  ;;  %v313_v42 = vmax.f32 %v277_v36, 0.0 }
  0xed   :  { %v249_v43 = vpop.f32.mrf.mxu0  ;;  %v281_v44 = vpop.f32.mrf.mxu1 }
  0xee   :  { %v473_v45 = vpack.c.bf16 %v305_v41, %v304_v39  ;;  %v493_v46 = vpack.c.bf16 %v313_v42, %v312_v40  ;;  %v250_v49 = vadd.f32 %v676_v26, %v249_v43  ;;  %v282_v50 = vadd.f32 %v676_v26, %v281_v44 }
  0xef   :  { %v251_v47 = vpop.f32.mrf.mxu0  ;;  %v283_v48 = vpop.f32.mrf.mxu1 }
  0xf0   :  { %474 = vst [vmem:[%s721_s3] sm:$0xff] %v473_v45   ;;  %513 = vst [vmem:[%s721_s3 + $0x20] sm:$0xff] %v493_v46   ;;  %v306_v57 = vmax.f32 %v250_v49, 0.0  ;;  %v314_v58 = vmax.f32 %v282_v50, 0.0 }
  0xf1   :  { %v252_v51 = vpop.f32.mrf.mxu0  ;;  %v284_v52 = vpop.f32.mrf.mxu1 }
  0xf2   :  { %v253_v53 = vadd.f32 %v676_v26, %v252_v51  ;;  %v285_v54 = vadd.f32 %v676_v26, %v284_v52 }
  0xf3   :  { %v254_v55 = vpop.f32.mrf.mxu0  ;;  %v286_v56 = vpop.f32.mrf.mxu1 }
  0xf4   :  { %v307_v59 = vmax.f32 %v253_v53, 0.0  ;;  %v315_v60 = vmax.f32 %v285_v54, 0.0 }
  0xf5   :  { %v257_v61 = vpop.f32.mrf.mxu0  ;;  %v289_v62 = vpop.f32.mrf.mxu1 }
  0xf6   :  { %v478_v63 = vpack.c.bf16 %v307_v59, %v306_v57  ;;  %v498_v0 = vpack.c.bf16 %v315_v60, %v314_v58  ;;  %v258_v3 = vadd.f32 %v676_v26, %v257_v61  ;;  %v290_v4 = vadd.f32 %v676_v26, %v289_v62 }
  0xf7   :  { %v259_v1 = vpop.f32.mrf.mxu0  ;;  %v291_v2 = vpop.f32.mrf.mxu1 }
  0xf8   :  { %510 = vst [vmem:[%s721_s3 + $0x8] sm:$0xff] %v478_v63   ;;  %514 = vst [vmem:[%s721_s3 + $0x28] sm:$0xff] %v498_v0   ;;  %v308_v11 = vmax.f32 %v258_v3, 0.0  ;;  %v316_v12 = vmax.f32 %v290_v4, 0.0 }
  0xf9   :  { %v260_v5 = vpop.f32.mrf.mxu0  ;;  %v292_v6 = vpop.f32.mrf.mxu1 }
  0xfa   :  { %v261_v7 = vadd.f32 %v676_v26, %v260_v5  ;;  %v293_v8 = vadd.f32 %v676_v26, %v292_v6 }
  0xfb   :  { %v262_v9 = vpop.f32.mrf.mxu0  ;;  %v294_v10 = vpop.f32.mrf.mxu1 }
  0xfc   :  { %v309_v13 = vmax.f32 %v261_v7, 0.0  ;;  %v317_v14 = vmax.f32 %v293_v8, 0.0 }
  0xfd   :  { %v265_v15 = vpop.f32.mrf.mxu0  ;;  %v297_v16 = vpop.f32.mrf.mxu1 }
  0xfe   :  { %v483_v17 = vpack.c.bf16 %v309_v13, %v308_v11  ;;  %v503_v18 = vpack.c.bf16 %v317_v14, %v316_v12  ;;  %v266_v21 = vadd.f32 %v676_v26, %v265_v15  ;;  %v298_v22 = vadd.f32 %v676_v26, %v297_v16 }
  0xff   :  { %v267_v19 = vpop.f32.mrf.mxu0  ;;  %v299_v20 = vpop.f32.mrf.mxu1 }
 0x100   :  { %511 = vst [vmem:[%s721_s3 + $0x10] sm:$0xff] %v483_v17   ;;  %515 = vst [vmem:[%s721_s3 + $0x30] sm:$0xff] %v503_v18   ;;  %v310_v30 = vmax.f32 %v266_v21, 0.0  ;;  %v318_v31 = vmax.f32 %v298_v22, 0.0 }
 0x101   :  { %v268_v23 = vpop.f32.mrf.mxu0  ;;  %v300_v24 = vpop.f32.mrf.mxu1 }
 0x102   :  { %v269_v25 = vadd.f32 %v676_v26, %v268_v23  ;;  %v301_v27 = vadd.f32 %v676_v26, %v300_v24 }
 0x103   :  { %v270_v28 = vpop.f32.mrf.mxu0  ;;  %v302_v29 = vpop.f32.mrf.mxu1 }
 0x104   :  { %v311_v32 = vmax.f32 %v269_v25, 0.0  ;;  %v319_v33 = vmax.f32 %v301_v27, 0.0 }
 0x106   :  { %v488_v34 = vpack.c.bf16 %v311_v32, %v310_v30  ;;  %v508_v35 = vpack.c.bf16 %v319_v33, %v318_v31 }
 0x108   :  { %512 = vst [vmem:[%s721_s3 + $0x18] sm:$0xff] %v488_v34   ;;  %516 = vst [vmem:[%s721_s3 + $0x38] sm:$0xff] %v508_v35  }

// kernel: _lambda_.33
= control target key start
LH: loop header
LB: loop body
LE: loop exit
PB: predicated region body
PF: predicated region fallthrough
CT: control target
= control target key end

     0   :  { %s1102_s12 = smov 0   ;;  %s1224_s0 = inlined_call_operand.vmem [shape: bf16[512,36], index: 0, kind: input, shape index: {}]   ;;  %s1225_s1 = inlined_call_operand.vmem [shape: bf16[36,128], index: 1, kind: input, shape index: {}]   ;;  %s1226_s2 = inlined_call_operand.vmem [shape: f32[1,128], index: 2, kind: input, shape index: {}]   ;;  %s1227_s3 = inlined_call_operand.vmem [shape: bf16[512,128], index: 3, kind: output, shape index: {}]  }
   0x1 LB: > { %s776_s13 = sadd.s32 4294967295, %s1080_s12   ;;  %p780_p0 = scmp.ge.s32.totalorder %s1080_s12, 1  ;;  %s1080_s12 = sphi %s1102_s12, %s13_s12  }
   0x2   : > { %p138_p1 = scmp.lt.s32.totalorder %s1080_s12, 3 }
   0x4   : > { %p139_p2 = pnand %p780_p0, %p138_p1 }
   0x5   : > { %s781_s18 = sshll.u32 (!%p139_p2), %s776_s13, 5 }
   0x6   : > { %142 = sbr.rel (%p139_p2) target bundleno = 254 (0xfe), region = 32  ;;  %p163_p3 = scmp.lt.s32.totalorder (!%p139_p2), %s781_s18, 63 }
   0xb   : > { %v1055_v0 = vld [vmem:[%s1225_s1 + $0x10] ss:$0 sps:$4 sm:$0x33]   ;;  %vm363_vm0 = vcmask 1041408   ;;  %v1056_v1 = vld [vmem:[%s1225_s1 + $0x8] sm:$0xff]   ;;  %v1057_v3 = vld [vmem:[%s1225_s1] sm:$0xff]  }
   0xc   : > { %1045 = vmatprep.subr.msk.bf16.mxu0 %vm363_vm0, %v1055_v0  ;;  %1046 = vmatprep.subr.msk.bf16.mxu1 %vm363_vm0, %v1055_v0  ;;  %v365_v2 = vsel %vm363_vm0, %v1055_v0, 0  ;;  %s1229_s18 = smov (!%p163_p3, %s781_s18), 63  ;;  %vm314_vm1 = vcmask 293888   ;;  %v1164_v20 = vld [vmem:[%s1226_s2] ss:$0 sm:$0xff] }
   0xd   : > { %1002 = vmatpush3.bf16.msra.mxu0 %v365_v2  ;;  %1042 = vmatpush3.bf16.msra.mxu1 %v365_v2  ;;  %s782_s21 = sshll.u32 %s1229_s18, 2 }
   0xe   : > { %1003 = vmatprep.subr.bf16.mxu0 %v1056_v1  ;;  %1040 = vmatprep.subr.bf16.mxu1 %v1056_v1  ;;  %s1127_s24 = scalar_lea.vmem %s1224_s0, %s782_s21  ;;  %s1179_s29 = scalar_lea.vmem %s1227_s3, %s782_s21 }
   0xf   : > { %v1058_v4 = vld [vmem:[%s1127_s24] sm:$0xff]   ;;  %v1060_v6 = vld [vmem:[%s1127_s24 + $0x8] sm:$0xff]   ;;  %v1062_v8 = vld [vmem:[%s1127_s24 + $0x10] sm:$0xff]  }
  0x10   : > { %v1059_v5 = vld [vmem:[%s1127_s24 + $0x40] sm:$0xff]   ;;  %1007 = vmatprep.mubr.msk.bf16.mxu0 %vm314_vm1, %v1058_v4  ;;  %v1061_v7 = vld [vmem:[%s1127_s24 + $0x48] sm:$0xff]   ;;  %v1063_v9 = vld [vmem:[%s1127_s24 + $0x50] sm:$0xff]  }
  0x11   : > { %1004 = vmatpush3.bf16.msra.mxu0 %v1056_v1  ;;  %1043 = vmatpush3.bf16.msra.mxu1 %v1056_v1  ;;  %v1064_v10 = vld [vmem:[%s1127_s24 + $0x18] sm:$0xff]   ;;  %v1066_v12 = vld [vmem:[%s1127_s24 + $0x20] sm:$0xff]   ;;  %v1068_v14 = vld [vmem:[%s1127_s24 + $0x28] sm:$0xff]  }
  0x12   : > { %1005 = vmatprep.subr.bf16.mxu0 %v1057_v3  ;;  %1041 = vmatprep.subr.bf16.mxu1 %v1057_v3  ;;  %v1065_v11 = vld [vmem:[%s1127_s24 + $0x58] sm:$0xff]   ;;  %v1067_v13 = vld [vmem:[%s1127_s24 + $0x60] sm:$0xff]   ;;  %v1069_v15 = vld [vmem:[%s1127_s24 + $0x68] sm:$0xff]  }
  0x13   : > { %1023 = vmatprep.mubr.msk.bf16.mxu1 %vm314_vm1, %v1059_v5  ;;  %v1070_v16 = vld [vmem:[%s1127_s24 + $0x30] sm:$0xff]   ;;  %v1072_v18 = vld [vmem:[%s1127_s24 + $0x38] sm:$0xff]  }
  0x14   : > { %v1071_v17 = vld [vmem:[%s1127_s24 + $0x70] sm:$0xff]   ;;  %v1073_v19 = vld [vmem:[%s1127_s24 + $0x78] sm:$0xff]  }
  0x15   : > { %1006 = vmatpush3.bf16.msra.mxu0 %v1057_v3  ;;  %1044 = vmatpush3.bf16.msra.mxu1 %v1057_v3 }
  0x18   : > { %1008 = vmatmul.mubr.msk.bf16.vlgmr.msra.gmra.mxu0 %vm314_vm1, %v1060_v6  ;;  %1024 = vmatmul.mubr.msk.bf16.vlgmr.msra.gmra.mxu1 %vm314_vm1, %v1061_v7 }
  0x19   : > { %1011 = vmatprep.mubr.msk.bf16.mxu0 %vm314_vm1, %v1062_v8  ;;  %1027 = vmatprep.mubr.msk.bf16.mxu1 %vm314_vm1, %v1063_v9 }
  0x20   : > { %1012 = vmatmul.mubr.msk.bf16.gmra.mxu0 %vm314_vm1, %v1064_v10  ;;  %1028 = vmatmul.mubr.msk.bf16.gmra.mxu1 %vm314_vm1, %v1065_v11 }
  0x21   : > { %1015 = vmatprep.mubr.msk.bf16.mxu0 %vm314_vm1, %v1066_v12  ;;  %1031 = vmatprep.mubr.msk.bf16.mxu1 %vm314_vm1, %v1067_v13 }
  0x28   : > { %1016 = vmatmul.mubr.msk.bf16.gmra.mxu0 %vm314_vm1, %v1068_v14  ;;  %1032 = vmatmul.mubr.msk.bf16.gmra.mxu1 %vm314_vm1, %v1069_v15 }
  0x29   : > { %1019 = vmatprep.mubr.msk.bf16.mxu0 %vm314_vm1, %v1070_v16  ;;  %1035 = vmatprep.mubr.msk.bf16.mxu1 %vm314_vm1, %v1071_v17 }
  0x30   : > { %1020 = vmatmul.mubr.msk.bf16.gmra.mxu0 %vm314_vm1, %v1072_v18  ;;  %1036 = vmatmul.mubr.msk.bf16.gmra.mxu1 %vm314_vm1, %v1073_v19 }
  0xd8   : > { %v1009_v21 = vpop.f32.mrf.mxu0  ;;  %v1025_v22 = vpop.f32.mrf.mxu1 }
  0xd9   : > { %v410_v23 = vadd.f32 %v1009_v21, %v1164_v20  ;;  %v474_v24 = vadd.f32 %v1025_v22, %v1164_v20 }
  0xda   : > { %v401_v25 = vpop.f32.mrf.mxu0  ;;  %v465_v26 = vpop.f32.mrf.mxu1 }
  0xdb   : > { %v402_v27 = vadd.f32 %v1164_v20, %v401_v25  ;;  %v466_v28 = vadd.f32 %v1164_v20, %v465_v26  ;;  %v530_v33 = vmax.f32 %v410_v23, 0.0  ;;  %v546_v34 = vmax.f32 %v474_v24, 0.0 }
  0xdc   : > { %v1010_v29 = vpop.f32.mrf.mxu0  ;;  %v1026_v30 = vpop.f32.mrf.mxu1 }
  0xdd   : > { %v413_v31 = vadd.f32 %v1010_v29, %v1164_v20  ;;  %v477_v32 = vadd.f32 %v1026_v30, %v1164_v20  ;;  %v528_v41 = vmax.f32 %v402_v27, 0.0  ;;  %v544_v42 = vmax.f32 %v466_v28, 0.0 }
  0xde   : > { %v404_v35 = vpop.f32.mrf.mxu0  ;;  %v468_v36 = vpop.f32.mrf.mxu1 }
  0xdf   : > { %v531_v37 = vmax.f32 %v413_v31, 0.0  ;;  %v547_v38 = vmax.f32 %v477_v32, 0.0  ;;  %v405_v39 = vadd.f32 %v1164_v20, %v404_v35  ;;  %v469_v40 = vadd.f32 %v1164_v20, %v468_v36 }
  0xe0   : > { %v1013_v43 = vpop.f32.mrf.mxu0  ;;  %v1029_v44 = vpop.f32.mrf.mxu1 }
  0xe1   : > { %v895_v45 = vpack.c.bf16 %v531_v37, %v530_v33  ;;  %v935_v46 = vpack.c.bf16 %v547_v38, %v546_v34  ;;  %v529_v47 = vmax.f32 %v405_v39, 0.0  ;;  %v545_v48 = vmax.f32 %v469_v40, 0.0 }
  0xe2   : > { %v426_v49 = vadd.f32 %v1013_v43, %v1164_v20  ;;  %v490_v50 = vadd.f32 %v1029_v44, %v1164_v20  ;;  %v417_v51 = vpop.f32.mrf.mxu0  ;;  %v481_v52 = vpop.f32.mrf.mxu1 }
  0xe3   : > { %967 = vst [vmem:[%s1179_s29 + $0x8] sm:$0xff] %v895_v45   ;;  %975 = vst [vmem:[%s1179_s29 + $0x48] sm:$0xff] %v935_v46   ;;  %v890_v53 = vpack.c.bf16 %v529_v47, %v528_v41  ;;  %v930_v54 = vpack.c.bf16 %v545_v48, %v544_v42  ;;  %v418_v55 = vadd.f32 %v1164_v20, %v417_v51 }
  0xe4   : > { %v482_v56 = vadd.f32 %v1164_v20, %v481_v52  ;;  %v1014_v57 = vpop.f32.mrf.mxu0  ;;  %v1030_v58 = vpop.f32.mrf.mxu1  ;;  %v534_v61 = vmax.f32 %v426_v49, 0.0  ;;  %v550_v62 = vmax.f32 %v490_v50, 0.0 }
  0xe5   : > { %891 = vst [vmem:[%s1179_s29] sm:$0xff] %v890_v53   ;;  %974 = vst [vmem:[%s1179_s29 + $0x40] sm:$0xff] %v930_v54   ;;  %v429_v59 = vadd.f32 %v1014_v57, %v1164_v20  ;;  %v493_v60 = vadd.f32 %v1030_v58, %v1164_v20  ;;  %v532_v5 = vmax.f32 %v418_v55, 0.0 }
  0xe6   : > { %v420_v63 = vpop.f32.mrf.mxu0  ;;  %v484_v0 = vpop.f32.mrf.mxu1  ;;  %v548_v6 = vmax.f32 %v482_v56, 0.0 }
  0xe7   : > { %v535_v1 = vmax.f32 %v429_v59, 0.0  ;;  %v551_v2 = vmax.f32 %v493_v60, 0.0  ;;  %v421_v3 = vadd.f32 %v1164_v20, %v420_v63  ;;  %v485_v4 = vadd.f32 %v1164_v20, %v484_v0 }
  0xe8   : > { %v1017_v7 = vpop.f32.mrf.mxu0  ;;  %v1033_v8 = vpop.f32.mrf.mxu1 }
  0xe9   : > { %v905_v9 = vpack.c.bf16 %v535_v1, %v534_v61  ;;  %v945_v10 = vpack.c.bf16 %v551_v2, %v550_v62  ;;  %v533_v11 = vmax.f32 %v421_v3, 0.0  ;;  %v549_v12 = vmax.f32 %v485_v4, 0.0 }
  0xea   : > { %v442_v13 = vadd.f32 %v1017_v7, %v1164_v20  ;;  %v506_v14 = vadd.f32 %v1033_v8, %v1164_v20  ;;  %v433_v15 = vpop.f32.mrf.mxu0  ;;  %v497_v16 = vpop.f32.mrf.mxu1 }
  0xeb   : > { %969 = vst [vmem:[%s1179_s29 + $0x18] sm:$0xff] %v905_v9   ;;  %977 = vst [vmem:[%s1179_s29 + $0x58] sm:$0xff] %v945_v10   ;;  %v900_v17 = vpack.c.bf16 %v533_v11, %v532_v5  ;;  %v940_v18 = vpack.c.bf16 %v549_v12, %v548_v6  ;;  %v434_v19 = vadd.f32 %v1164_v20, %v433_v15 }
  0xec   : > { %v498_v21 = vadd.f32 %v1164_v20, %v497_v16  ;;  %v1018_v22 = vpop.f32.mrf.mxu0  ;;  %v1034_v23 = vpop.f32.mrf.mxu1  ;;  %v538_v26 = vmax.f32 %v442_v13, 0.0  ;;  %v554_v27 = vmax.f32 %v506_v14, 0.0 }
  0xed   : > { %968 = vst [vmem:[%s1179_s29 + $0x10] sm:$0xff] %v900_v17   ;;  %976 = vst [vmem:[%s1179_s29 + $0x50] sm:$0xff] %v940_v18   ;;  %v445_v24 = vadd.f32 %v1018_v22, %v1164_v20  ;;  %v509_v25 = vadd.f32 %v1034_v23, %v1164_v20  ;;  %v536_v34 = vmax.f32 %v434_v19, 0.0 }
  0xee   : > { %v436_v28 = vpop.f32.mrf.mxu0  ;;  %v500_v29 = vpop.f32.mrf.mxu1  ;;  %v552_v35 = vmax.f32 %v498_v21, 0.0 }
  0xef   : > { %v539_v30 = vmax.f32 %v445_v24, 0.0  ;;  %v555_v31 = vmax.f32 %v509_v25, 0.0  ;;  %v437_v32 = vadd.f32 %v1164_v20, %v436_v28  ;;  %v501_v33 = vadd.f32 %v1164_v20, %v500_v29 }
  0xf0   : > { %v1021_v36 = vpop.f32.mrf.mxu0  ;;  %v1037_v37 = vpop.f32.mrf.mxu1 }
  0xf1   : > { %v915_v38 = vpack.c.bf16 %v539_v30, %v538_v26  ;;  %v955_v39 = vpack.c.bf16 %v555_v31, %v554_v27  ;;  %v537_v40 = vmax.f32 %v437_v32, 0.0  ;;  %v553_v41 = vmax.f32 %v501_v33, 0.0 }
  0xf2   : > { %v458_v42 = vadd.f32 %v1021_v36, %v1164_v20  ;;  %v522_v43 = vadd.f32 %v1037_v37, %v1164_v20  ;;  %v449_v44 = vpop.f32.mrf.mxu0  ;;  %v513_v45 = vpop.f32.mrf.mxu1 }
  0xf3   : > { %971 = vst [vmem:[%s1179_s29 + $0x28] sm:$0xff] %v915_v38   ;;  %979 = vst [vmem:[%s1179_s29 + $0x68] sm:$0xff] %v955_v39   ;;  %v910_v46 = vpack.c.bf16 %v537_v40, %v536_v34  ;;  %v950_v47 = vpack.c.bf16 %v553_v41, %v552_v35  ;;  %v450_v48 = vadd.f32 %v1164_v20, %v449_v44 }
  0xf4   : > { %v514_v49 = vadd.f32 %v1164_v20, %v513_v45  ;;  %v1022_v50 = vpop.f32.mrf.mxu0  ;;  %v1038_v51 = vpop.f32.mrf.mxu1  ;;  %v542_v54 = vmax.f32 %v458_v42, 0.0  ;;  %v558_v55 = vmax.f32 %v522_v43, 0.0 }
  0xf5   : > { %970 = vst [vmem:[%s1179_s29 + $0x20] sm:$0xff] %v910_v46   ;;  %978 = vst [vmem:[%s1179_s29 + $0x60] sm:$0xff] %v950_v47   ;;  %v461_v52 = vadd.f32 %v1022_v50, %v1164_v20  ;;  %v525_v53 = vadd.f32 %v1038_v51, %v1164_v20  ;;  %v540_v62 = vmax.f32 %v450_v48, 0.0 }
  0xf6   : > { %v452_v56 = vpop.f32.mrf.mxu0  ;;  %v516_v57 = vpop.f32.mrf.mxu1  ;;  %v556_v63 = vmax.f32 %v514_v49, 0.0 }
  0xf7   : > { %v543_v58 = vmax.f32 %v461_v52, 0.0  ;;  %v559_v59 = vmax.f32 %v525_v53, 0.0  ;;  %v453_v60 = vadd.f32 %v1164_v20, %v452_v56  ;;  %v517_v61 = vadd.f32 %v1164_v20, %v516_v57 }
  0xf9   : > { %v925_v0 = vpack.c.bf16 %v543_v58, %v542_v54  ;;  %v965_v1 = vpack.c.bf16 %v559_v59, %v558_v55  ;;  %v541_v2 = vmax.f32 %v453_v60, 0.0  ;;  %v557_v3 = vmax.f32 %v517_v61, 0.0 }
  0xfb   : > { %973 = vst [vmem:[%s1179_s29 + $0x38] sm:$0xff] %v925_v0   ;;  %981 = vst [vmem:[%s1179_s29 + $0x78] sm:$0xff] %v965_v1   ;;  %v920_v4 = vpack.c.bf16 %v541_v2, %v540_v62  ;;  %v960_v5 = vpack.c.bf16 %v557_v3, %v556_v63 }
  0xfd   : > { %972 = vst [vmem:[%s1179_s29 + $0x30] sm:$0xff] %v920_v4   ;;  %980 = vst [vmem:[%s1179_s29 + $0x70] sm:$0xff] %v960_v5  }
  0xfe PF: > { %s13_s12 = sadd.s32 1, %s1080_s12  }
  0xff   : > { %p10_p4 = scmp.ge.s32.totalorder %s13_s12, 4  }
 0x101   :  { %12 = sbr.rel (!%p10_p4) target bundleno = 1 (0x1), region = 62 }

// kernel: _lambda_.35
= control target key start
LH: loop header
LB: loop body
LE: loop exit
PB: predicated region body
PF: predicated region fallthrough
CT: control target
= control target key end

     0   :  { %s864_s12 = smov 0   ;;  %s996_s0 = inlined_call_operand.vmem [shape: bf16[512,18], index: 0, kind: input, shape index: {}]   ;;  %s997_s1 = inlined_call_operand.vmem [shape: bf16[18,128], index: 1, kind: input, shape index: {}]   ;;  %s998_s2 = inlined_call_operand.vmem [shape: f32[1,128], index: 2, kind: input, shape index: {}]   ;;  %s999_s3 = inlined_call_operand.vmem [shape: f32[512,128], index: 3, kind: output, shape index: {}]  }
   0x1 LB: > { %s640_s13 = sadd.s32 4294967295, %s842_s12   ;;  %p644_p0 = scmp.ge.s32.totalorder %s842_s12, 1  ;;  %s842_s12 = sphi %s864_s12, %s13_s12  }
   0x2   : > { %p138_p1 = scmp.lt.s32.totalorder %s842_s12, 3 }
   0x4   : > { %p139_p2 = pnand %p644_p0, %p138_p1 }
   0x5   : > { %s645_s18 = sshll.u32 (!%p139_p2), %s640_s13, 5 }
   0x6   : > { %142 = sbr.rel (%p139_p2) target bundleno = 261 (0x105), region = 32  ;;  %p163_p3 = scmp.lt.s32.totalorder (!%p139_p2), %s645_s18, 63 }
   0xb   : > { %v754_v0 = vld [vmem:[%s997_s1 + $0x8] ss:$0 sps:$4 sm:$0x11]   ;;  %vm355_vm0 = vcmask 1040384   ;;  %v755_v1 = vld [vmem:[%s997_s1] sm:$0xff]   ;;  %s1001_s18 = smov (!%p163_p3, %s645_s18), 63 }
   0xc   : > { %744 = vmatprep.subr.msk.bf16.mxu0 %vm355_vm0, %v754_v0  ;;  %745 = vmatprep.subr.msk.bf16.mxu1 %vm355_vm0, %v754_v0  ;;  %v357_v2 = vsel %vm355_vm0, %v754_v0, 0  ;;  %s646_s19 = sshll.u32 %s1001_s18, 2  ;;  %vm306_vm1 = vcmask 146432   ;;  %v921_v19 = vld [vmem:[%s998_s2] ss:$0 sm:$0xff]  ;;  %s648_s25 = sshll.u32 %s1001_s18, 3 }
   0xd   : > { %705 = vmatpush3.bf16.msra.mxu0 %v357_v2  ;;  %742 = vmatpush3.bf16.msra.mxu1 %v357_v2  ;;  %s884_s22 = scalar_lea.vmem %s996_s0, %s646_s19  ;;  %s940_s28 = scalar_lea.vmem %s999_s3, %s648_s25 }
   0xe   : > { %706 = vmatprep.subr.bf16.mxu0 %v755_v1  ;;  %741 = vmatprep.subr.bf16.mxu1 %v755_v1  ;;  %v756_v3 = vld [vmem:[%s884_s22] sm:$0xff]   ;;  %v758_v5 = vld [vmem:[%s884_s22 + $0x8] sm:$0xff]   ;;  %v760_v7 = vld [vmem:[%s884_s22 + $0x10] sm:$0xff]  }
   0xf   : > { %v757_v4 = vld [vmem:[%s884_s22 + $0x40] sm:$0xff]   ;;  %708 = vmatprep.mubr.msk.bf16.mxu0 %vm306_vm1, %v756_v3  ;;  %v759_v6 = vld [vmem:[%s884_s22 + $0x48] sm:$0xff]   ;;  %v761_v8 = vld [vmem:[%s884_s22 + $0x50] sm:$0xff]  }
  0x10   : > { %724 = vmatprep.mubr.msk.bf16.mxu1 %vm306_vm1, %v757_v4  ;;  %v762_v9 = vld [vmem:[%s884_s22 + $0x18] sm:$0xff]   ;;  %v764_v11 = vld [vmem:[%s884_s22 + $0x20] sm:$0xff]   ;;  %v766_v13 = vld [vmem:[%s884_s22 + $0x28] sm:$0xff]  }
  0x11   : > { %707 = vmatpush3.bf16.msra.mxu0 %v755_v1  ;;  %743 = vmatpush3.bf16.msra.mxu1 %v755_v1  ;;  %v763_v10 = vld [vmem:[%s884_s22 + $0x58] sm:$0xff]   ;;  %v765_v12 = vld [vmem:[%s884_s22 + $0x60] sm:$0xff]   ;;  %v767_v14 = vld [vmem:[%s884_s22 + $0x68] sm:$0xff]  }
  0x12   : > { %v768_v15 = vld [vmem:[%s884_s22 + $0x30] sm:$0xff]   ;;  %v770_v17 = vld [vmem:[%s884_s22 + $0x38] sm:$0xff]  }
  0x13   : > { %v769_v16 = vld [vmem:[%s884_s22 + $0x70] sm:$0xff]   ;;  %v771_v18 = vld [vmem:[%s884_s22 + $0x78] sm:$0xff]  }
  0x14   : > { %709 = vmatmul.mubr.msk.bf16.vlgmr.msra.gmra.mxu0 %vm306_vm1, %v758_v5  ;;  %725 = vmatmul.mubr.msk.bf16.vlgmr.msra.gmra.mxu1 %vm306_vm1, %v759_v6 }
  0x15   : > { %712 = vmatprep.mubr.msk.bf16.mxu0 %vm306_vm1, %v760_v7  ;;  %728 = vmatprep.mubr.msk.bf16.mxu1 %vm306_vm1, %v761_v8 }
  0x1c   : > { %713 = vmatmul.mubr.msk.bf16.gmra.mxu0 %vm306_vm1, %v762_v9  ;;  %729 = vmatmul.mubr.msk.bf16.gmra.mxu1 %vm306_vm1, %v763_v10 }
  0x1d   : > { %716 = vmatprep.mubr.msk.bf16.mxu0 %vm306_vm1, %v764_v11  ;;  %732 = vmatprep.mubr.msk.bf16.mxu1 %vm306_vm1, %v765_v12 }
  0x24   : > { %717 = vmatmul.mubr.msk.bf16.gmra.mxu0 %vm306_vm1, %v766_v13  ;;  %733 = vmatmul.mubr.msk.bf16.gmra.mxu1 %vm306_vm1, %v767_v14 }
  0x25   : > { %720 = vmatprep.mubr.msk.bf16.mxu0 %vm306_vm1, %v768_v15  ;;  %736 = vmatprep.mubr.msk.bf16.mxu1 %vm306_vm1, %v769_v16 }
  0x2c   : > { %721 = vmatmul.mubr.msk.bf16.gmra.mxu0 %vm306_vm1, %v770_v17  ;;  %737 = vmatmul.mubr.msk.bf16.gmra.mxu1 %vm306_vm1, %v771_v18 }
  0xd4   : > { %v710_v20 = vpop.f32.mrf.mxu0  ;;  %v726_v22 = vpop.f32.mrf.mxu1 }
  0xd5   : > { %v402_v21 = vadd.f32 %v710_v20, %v921_v19  ;;  %v466_v23 = vadd.f32 %v726_v22, %v921_v19 }
  0xd6   : > { %v393_v24 = vpop.f32.mrf.mxu0  ;;  %v457_v26 = vpop.f32.mrf.mxu1 }
  0xd7   : > { %772 = vtanh.f32 %v402_v21  ;;  %v394_v25 = vadd.f32 %v921_v19, %v393_v24  ;;  %v458_v27 = vadd.f32 %v921_v19, %v457_v26 }
  0xd8   : > { %774 = vtanh.f32 %v466_v23  ;;  %v711_v28 = vpop.f32.mrf.mxu0  ;;  %v727_v30 = vpop.f32.mrf.mxu1 }
  0xd9   : > { %776 = vtanh.f32 %v394_v25  ;;  %v405_v29 = vadd.f32 %v711_v28, %v921_v19  ;;  %v469_v31 = vadd.f32 %v727_v30, %v921_v19 }
  0xda   : > { %778 = vtanh.f32 %v458_v27  ;;  %v396_v32 = vpop.f32.mrf.mxu0  ;;  %v460_v34 = vpop.f32.mrf.mxu1 }
  0xdb   : > { %780 = vtanh.f32 %v405_v29  ;;  %v397_v33 = vadd.f32 %v921_v19, %v396_v32  ;;  %v461_v35 = vadd.f32 %v921_v19, %v460_v34 }
  0xdc   : > { %782 = vtanh.f32 %v469_v31  ;;  %v714_v36 = vpop.f32.mrf.mxu0  ;;  %v730_v38 = vpop.f32.mrf.mxu1 }
  0xdd   : > { %784 = vtanh.f32 %v397_v33  ;;  %v418_v37 = vadd.f32 %v714_v36, %v921_v19  ;;  %v482_v39 = vadd.f32 %v730_v38, %v921_v19 }
  0xde   : > { %786 = vtanh.f32 %v461_v35  ;;  %v409_v40 = vpop.f32.mrf.mxu0  ;;  %v473_v42 = vpop.f32.mrf.mxu1 }
  0xdf   : > { %788 = vtanh.f32 %v418_v37  ;;  %v410_v41 = vadd.f32 %v921_v19, %v409_v40  ;;  %v474_v43 = vadd.f32 %v921_v19, %v473_v42 }
  0xe0   : > { %790 = vtanh.f32 %v482_v39  ;;  %v715_v44 = vpop.f32.mrf.mxu0  ;;  %v731_v46 = vpop.f32.mrf.mxu1 }
  0xe1   : > { %792 = vtanh.f32 %v410_v41  ;;  %v421_v45 = vadd.f32 %v715_v44, %v921_v19  ;;  %v485_v47 = vadd.f32 %v731_v46, %v921_v19 }
  0xe2   : > { %794 = vtanh.f32 %v474_v43  ;;  %v412_v48 = vpop.f32.mrf.mxu0  ;;  %v476_v50 = vpop.f32.mrf.mxu1 }
  0xe3   : > { %796 = vtanh.f32 %v421_v45  ;;  %v413_v49 = vadd.f32 %v921_v19, %v412_v48  ;;  %v477_v52 = vadd.f32 %v921_v19, %v476_v50 }
  0xe4   : > { %v773_v51 = vpop.eup %772  ;;  %798 = vtanh.f32 %v485_v47  ;;  %v718_v53 = vpop.f32.mrf.mxu0 }
  0xe5   : > { %v775_v54 = vpop.eup %774  ;;  %554 = vst [vmem:[%s940_s28 + $0x10] sm:$0xff] %v773_v51  ;;  %800 = vtanh.f32 %v413_v49  ;;  %v434_v55 = vadd.f32 %v718_v53, %v921_v19  ;;  %v734_v56 = vpop.f32.mrf.mxu1 }
  0xe6   : > { %v777_v57 = vpop.eup %776  ;;  %570 = vst [vmem:[%s940_s28 + $0x90] sm:$0xff] %v775_v54  ;;  %802 = vtanh.f32 %v477_v52  ;;  %v498_v58 = vadd.f32 %v734_v56, %v921_v19  ;;  %v425_v59 = vpop.f32.mrf.mxu0 }
  0xe7   : > { %v779_v60 = vpop.eup %778  ;;  %552 = vst [vmem:[%s940_s28] sm:$0xff] %v777_v57  ;;  %804 = vtanh.f32 %v434_v55  ;;  %v426_v61 = vadd.f32 %v921_v19, %v425_v59  ;;  %v489_v62 = vpop.f32.mrf.mxu1 }
  0xe8   : > { %v781_v63 = vpop.eup %780  ;;  %568 = vst [vmem:[%s940_s28 + $0x80] sm:$0xff] %v779_v60  ;;  %806 = vtanh.f32 %v498_v58  ;;  %v490_v0 = vadd.f32 %v921_v19, %v489_v62  ;;  %v719_v1 = vpop.f32.mrf.mxu0 }
  0xe9   : > { %v783_v2 = vpop.eup %782  ;;  %555 = vst [vmem:[%s940_s28 + $0x18] sm:$0xff] %v781_v63  ;;  %808 = vtanh.f32 %v426_v61  ;;  %v437_v3 = vadd.f32 %v719_v1, %v921_v19  ;;  %v735_v4 = vpop.f32.mrf.mxu1 }
  0xea   : > { %v785_v5 = vpop.eup %784  ;;  %571 = vst [vmem:[%s940_s28 + $0x98] sm:$0xff] %v783_v2  ;;  %810 = vtanh.f32 %v490_v0  ;;  %v501_v6 = vadd.f32 %v735_v4, %v921_v19  ;;  %v428_v7 = vpop.f32.mrf.mxu0 }
  0xeb   : > { %v787_v8 = vpop.eup %786  ;;  %553 = vst [vmem:[%s940_s28 + $0x8] sm:$0xff] %v785_v5  ;;  %812 = vtanh.f32 %v437_v3  ;;  %v429_v9 = vadd.f32 %v921_v19, %v428_v7  ;;  %v492_v10 = vpop.f32.mrf.mxu1 }
  0xec   : > { %v789_v11 = vpop.eup %788  ;;  %569 = vst [vmem:[%s940_s28 + $0x88] sm:$0xff] %v787_v8  ;;  %814 = vtanh.f32 %v501_v6  ;;  %v493_v12 = vadd.f32 %v921_v19, %v492_v10  ;;  %v722_v13 = vpop.f32.mrf.mxu0 }
  0xed   : > { %v791_v14 = vpop.eup %790  ;;  %558 = vst [vmem:[%s940_s28 + $0x30] sm:$0xff] %v789_v11  ;;  %816 = vtanh.f32 %v429_v9  ;;  %v450_v15 = vadd.f32 %v722_v13, %v921_v19  ;;  %v738_v16 = vpop.f32.mrf.mxu1 }
  0xee   : > { %v793_v17 = vpop.eup %792  ;;  %574 = vst [vmem:[%s940_s28 + $0xb0] sm:$0xff] %v791_v14  ;;  %818 = vtanh.f32 %v493_v12  ;;  %v514_v18 = vadd.f32 %v738_v16, %v921_v19  ;;  %v441_v20 = vpop.f32.mrf.mxu0 }
  0xef   : > { %v795_v21 = vpop.eup %794  ;;  %556 = vst [vmem:[%s940_s28 + $0x20] sm:$0xff] %v793_v17  ;;  %820 = vtanh.f32 %v450_v15  ;;  %v442_v22 = vadd.f32 %v921_v19, %v441_v20  ;;  %v505_v23 = vpop.f32.mrf.mxu1 }
  0xf0   : > { %v797_v24 = vpop.eup %796  ;;  %572 = vst [vmem:[%s940_s28 + $0xa0] sm:$0xff] %v795_v21  ;;  %822 = vtanh.f32 %v514_v18  ;;  %v506_v25 = vadd.f32 %v921_v19, %v505_v23  ;;  %v723_v26 = vpop.f32.mrf.mxu0 }
  0xf1   : > { %v799_v27 = vpop.eup %798  ;;  %559 = vst [vmem:[%s940_s28 + $0x38] sm:$0xff] %v797_v24  ;;  %824 = vtanh.f32 %v442_v22  ;;  %v453_v28 = vadd.f32 %v723_v26, %v921_v19  ;;  %v739_v29 = vpop.f32.mrf.mxu1 }
  0xf2   : > { %v801_v30 = vpop.eup %800  ;;  %575 = vst [vmem:[%s940_s28 + $0xb8] sm:$0xff] %v799_v27  ;;  %826 = vtanh.f32 %v506_v25  ;;  %v517_v31 = vadd.f32 %v739_v29, %v921_v19  ;;  %v444_v32 = vpop.f32.mrf.mxu0 }
  0xf3   : > { %v803_v33 = vpop.eup %802  ;;  %557 = vst [vmem:[%s940_s28 + $0x28] sm:$0xff] %v801_v30  ;;  %828 = vtanh.f32 %v453_v28  ;;  %v445_v34 = vadd.f32 %v921_v19, %v444_v32  ;;  %v508_v35 = vpop.f32.mrf.mxu1 }
  0xf4   : > { %v805_v36 = vpop.eup %804  ;;  %573 = vst [vmem:[%s940_s28 + $0xa8] sm:$0xff] %v803_v33  ;;  %830 = vtanh.f32 %v517_v31  ;;  %v509_v37 = vadd.f32 %v921_v19, %v508_v35 }
  0xf5   : > { %v807_v38 = vpop.eup %806  ;;  %562 = vst [vmem:[%s940_s28 + $0x50] sm:$0xff] %v805_v36  ;;  %832 = vtanh.f32 %v445_v34 }
  0xf6   : > { %v809_v39 = vpop.eup %808  ;;  %578 = vst [vmem:[%s940_s28 + $0xd0] sm:$0xff] %v807_v38  ;;  %834 = vtanh.f32 %v509_v37 }
  0xf7   : > { %v811_v40 = vpop.eup %810  ;;  %560 = vst [vmem:[%s940_s28 + $0x40] sm:$0xff] %v809_v39 }
  0xf8   : > { %v813_v41 = vpop.eup %812  ;;  %576 = vst [vmem:[%s940_s28 + $0xc0] sm:$0xff] %v811_v40 }
  0xf9   : > { %v815_v42 = vpop.eup %814  ;;  %563 = vst [vmem:[%s940_s28 + $0x58] sm:$0xff] %v813_v41 }
  0xfa   : > { %v817_v19 = vpop.eup %816  ;;  %579 = vst [vmem:[%s940_s28 + $0xd8] sm:$0xff] %v815_v42 }
  0xfb   : > { %v819_v43 = vpop.eup %818  ;;  %561 = vst [vmem:[%s940_s28 + $0x48] sm:$0xff] %v817_v19 }
  0xfc   : > { %v821_v44 = vpop.eup %820  ;;  %577 = vst [vmem:[%s940_s28 + $0xc8] sm:$0xff] %v819_v43 }
  0xfd   : > { %v823_v45 = vpop.eup %822  ;;  %566 = vst [vmem:[%s940_s28 + $0x70] sm:$0xff] %v821_v44 }
  0xfe   : > { %v825_v46 = vpop.eup %824  ;;  %582 = vst [vmem:[%s940_s28 + $0xf0] sm:$0xff] %v823_v45 }
  0xff   : > { %v827_v47 = vpop.eup %826  ;;  %564 = vst [vmem:[%s940_s28 + $0x60] sm:$0xff] %v825_v46 }
 0x100   : > { %v829_v48 = vpop.eup %828  ;;  %580 = vst [vmem:[%s940_s28 + $0xe0] sm:$0xff] %v827_v47 }
 0x101   : > { %v831_v49 = vpop.eup %830  ;;  %567 = vst [vmem:[%s940_s28 + $0x78] sm:$0xff] %v829_v48 }
 0x102   : > { %v833_v50 = vpop.eup %832  ;;  %583 = vst [vmem:[%s940_s28 + $0xf8] sm:$0xff] %v831_v49 }
 0x103   : > { %v835_v51 = vpop.eup %834  ;;  %565 = vst [vmem:[%s940_s28 + $0x68] sm:$0xff] %v833_v50 }
 0x104   : > { %581 = vst [vmem:[%s940_s28 + $0xe8] sm:$0xff] %v835_v51 }
 0x105 PF: > { %s13_s12 = sadd.s32 1, %s842_s12  }
 0x106   : > { %p10_p4 = scmp.ge.s32.totalorder %s13_s12, 4  }
 0x108   :  { %12 = sbr.rel (!%p10_p4) target bundleno = 1 (0x1), region = 62 }

</bundles_post_ra>
